<compile_context>
chip_gen: v7x
topology: tpu7x:2x2x1
jax: 0.10.0
libtpu: 0.0.40
codegen_flags: <defaults>
</compile_context>

<pallas_src>
import functools

import jax
import jax.numpy as jnp
from jax.experimental import pallas as pl
from jax.experimental.pallas import tpu as pltpu

# ----------------------------- model dims (small) -----------------------------
B = 2          # batch
T_MAX = 16     # max sequence length (prompt 8 + generated slots)
PROMPT_LEN = 8
GEN_STEPS = 4
V = 256        # vocab
D = 128        # hidden
H = 4          # heads
DH = D // H    # head dim = 32
MLP = 256      # ffn hidden
L = 2          # layers

WEIGHT_KEYS = ("ln1_g", "ln1_b", "w_qkv", "b_qkv", "w_o", "b_o",
               "ln2_g", "ln2_b", "w_fc", "b_fc", "w_proj", "b_proj",
               "lnf_g", "lnf_b", "w_lm", "b_lm")


# ----------------------------- fused forward kernel -----------------------------
def _fused_forward_kernel(pos_ref,                       # SMEM (1,) int32: last valid row
                          x_ref,                         # (1, T, D) f32 embedded tokens
                          ln1_g, ln1_b, w_qkv, b_qkv, w_o, b_o,
                          ln2_g, ln2_b, w_fc, b_fc, w_proj, b_proj,
                          lnf_g, lnf_b, w_lm, b_lm,
                          tok_ref):                      # out (1, 1, 128) int32
    f32 = jnp.float32
    bf16 = jnp.bfloat16

    x = x_ref[0]                                         # (T, D) f32

    def ln(v, g, b):
        # f32 elementwise math (v5e has no bf16 VPU/EUP)
        mu = jnp.mean(v, axis=-1, keepdims=True)
        var = jnp.mean((v - mu) ** 2, axis=-1, keepdims=True)
        return (v - mu) * jax.lax.rsqrt(var + 1e-5) * g + b

    def mm(a, w, bias):
        # bf16 operands into the MXU, f32 accumulate
        return jnp.dot(a.astype(bf16), w, preferred_element_type=f32) + bias

    # causal mask (built once, reused per layer)
    row = jax.lax.broadcasted_iota(jnp.int32, (T_MAX, T_MAX), 0)
    col = jax.lax.broadcasted_iota(jnp.int32, (T_MAX, T_MAX), 1)
    causal = col <= row
    scale = 1.0 / (DH ** 0.5)

    for l in range(L):
        # --- attention block (all H heads in-kernel) ---
        h = ln(x, ln1_g[l], ln1_b[l])
        qkv = mm(h, w_qkv[l], b_qkv[l])                  # (T, 3D) f32
        q = qkv[:, 0 * D:1 * D]
        k = qkv[:, 1 * D:2 * D]
        v = qkv[:, 2 * D:3 * D]
        heads = []
        for hh in range(H):
            sl = slice(hh * DH, (hh + 1) * DH)
            s = jnp.dot(q[:, sl], k[:, sl].T, preferred_element_type=f32) * scale
            s = jnp.where(causal, s, jnp.float32(-1e30))
            m = jnp.max(s, axis=-1, keepdims=True)
            p = jnp.exp(s - m)
            p = p * pl.reciprocal(jnp.sum(p, axis=-1, keepdims=True), approx=True)
            heads.append(jnp.dot(p, v[:, sl], preferred_element_type=f32))
        attn = jnp.concatenate(heads, axis=-1)           # (T, D) lane-dense
        x = x + mm(attn, w_o[l], b_o[l])

        # --- MLP block ---
        h2 = ln(x, ln2_g[l], ln2_b[l])
        mact = jax.nn.gelu(mm(h2, w_fc[l], b_fc[l]))     # (T, MLP) f32
        x = x + mm(mact, w_proj[l], b_proj[l])

    # --- final LN + last-token lm_head + argmax (all in-kernel) ---
    hf = ln(x, lnf_g[...], lnf_b[...])                   # (T, D)
    pos = pos_ref[0]
    rid = jax.lax.broadcasted_iota(jnp.int32, (T_MAX, 1), 0)
    h_last = jnp.sum(jnp.where(rid == pos, hf, 0.0), axis=0, keepdims=True)  # (1, D)

    logits = mm(h_last, w_lm[...], b_lm[...])            # (1, V) f32
    cid = jax.lax.broadcasted_iota(jnp.int32, (1, V), 1).astype(jnp.float32)
    mx = jnp.max(logits, axis=-1, keepdims=True)
    cand = jnp.where(logits == mx, cid, jnp.float32(V))  # first-max index (argmax semantics)
    nxt = jnp.min(cand, axis=-1, keepdims=True).astype(jnp.int32)  # (1, 1)
    tok_ref[...] = jnp.broadcast_to(nxt[:, :, None], (1, 1, 128))


def _const_spec(shape):
    zeros = (0,) * len(shape)
    return pl.BlockSpec(shape, lambda bb, p, _z=zeros: _z)


def forward_next_token(params, tokens, cur_len):
    """tokens: (B, T_MAX) int32, cur_len: traced scalar -> next token per batch (B,) int32."""
    # embedding lookup + positional add in XLA (tiny); everything else fused in one kernel
    x0 = jnp.take(params["wte"], tokens, axis=0) + params["wpe"][None, :, :]   # (B,T,D) f32
    pos = jnp.reshape(cur_len - 1, (1,)).astype(jnp.int32)
    weights = [params[k] for k in WEIGHT_KEYS]

    in_specs = [pl.BlockSpec((1, T_MAX, D), lambda bb, p: (bb, 0, 0))]
    in_specs += [_const_spec(w.shape) for w in weights]

    out = pl.pallas_call(
        _fused_forward_kernel,
        out_shape=jax.ShapeDtypeStruct((B, 1, 128), jnp.int32),
        grid_spec=pltpu.PrefetchScalarGridSpec(
            num_scalar_prefetch=1,
            grid=(B,),
            in_specs=in_specs,
            out_specs=pl.BlockSpec((1, 1, 128), lambda bb, p: (bb, 0, 0)),
        ),
        compiler_params=pltpu.CompilerParams(
            dimension_semantics=("parallel",)),   # v7x: split batch across TensorCores
    )(pos, x0, *weights)
    return out[:, 0, 0]                                  # (B,) int32


# ----------------------------- parameter init -----------------------------
def init_params(key):
    ks = iter(jax.random.split(key, 16))
    s = 0.02

    def w(shape, dtype=jnp.bfloat16):
        return (s * jax.random.normal(next(ks), shape, dtype=jnp.float32)).astype(dtype)

    return {
        # embeddings stay f32 (used outside the kernel)
        "wte": w((V, D), jnp.float32),
        "wpe": w((T_MAX, D), jnp.float32),
        # per-layer weights stacked along a leading L axis; matmul weights in bf16
        "ln1_g": jnp.ones((L, 1, D), jnp.float32),
        "ln1_b": jnp.zeros((L, 1, D), jnp.float32),
        "w_qkv": w((L, D, 3 * D)),
        "b_qkv": jnp.zeros((L, 1, 3 * D), jnp.float32),
        "w_o": w((L, D, D)),
        "b_o": jnp.zeros((L, 1, D), jnp.float32),
        "ln2_g": jnp.ones((L, 1, D), jnp.float32),
        "ln2_b": jnp.zeros((L, 1, D), jnp.float32),
        "w_fc": w((L, D, MLP)),
        "b_fc": jnp.zeros((L, 1, MLP), jnp.float32),
        "w_proj": w((L, MLP, D)),
        "b_proj": jnp.zeros((L, 1, D), jnp.float32),
        "lnf_g": jnp.ones((1, D), jnp.float32),
        "lnf_b": jnp.zeros((1, D), jnp.float32),
        "w_lm": w((D, V)),
        "b_lm": jnp.zeros((1, V), jnp.float32),
    }


# ----------------------------- greedy generate (jitted) -----------------------------
@functools.partial(jax.jit, static_argnames=("prompt_len", "num_steps"))
def greedy_generate(params, tokens, *, prompt_len, num_steps):
    """Greedy decode (equivalent of model.generate with sampling off).

    tokens: (B, T_MAX) int32; positions >= prompt_len are padding slots; causal
    masking guarantees pad positions never influence the logits we read.
    """
    def step(i, toks):
        cur_len = prompt_len + i
        nxt = forward_next_token(params, toks, cur_len)            # (B,) int32
        return jax.lax.dynamic_update_slice(toks, nxt[:, None], (0, cur_len))

    return jax.lax.fori_loop(0, num_steps, step, tokens)


# ----------------------------- main -----------------------------
if __name__ == "__main__":
    key = jax.random.PRNGKey(0)
    pkey, tkey = jax.random.split(key)
    params = init_params(pkey)

    # synthetic "tokenized prompt" (what the tokenizer would have produced)
    prompt = jax.random.randint(tkey, (B, PROMPT_LEN), 1, V, dtype=jnp.int32)
    tokens = jnp.zeros((B, T_MAX), jnp.int32).at[:, :PROMPT_LEN].set(prompt)

    out_tokens = greedy_generate(params, tokens,
                                 prompt_len=PROMPT_LEN, num_steps=GEN_STEPS)
    out_tokens = jax.block_until_ready(out_tokens)

    assert out_tokens.shape == (B, T_MAX)
    assert bool(jnp.all(out_tokens[:, :PROMPT_LEN] == prompt))
    print("KERNEL_OK")
</pallas_src>

<mosaic_0001>
module attributes {stable_mosaic.version = 11 : i64} {
  func.func @_fused_forward_kernel(%arg0: i32, %arg1: memref<1xi32, #tpu.memory_space<smem>>, %arg2: memref<1x16x128xf32, #tpu.memory_space<vmem>>, %arg3: memref<2x1x128xf32, #tpu.memory_space<vmem>>, %arg4: memref<2x1x128xf32, #tpu.memory_space<vmem>>, %arg5: memref<2x128x384xbf16, #tpu.memory_space<vmem>>, %arg6: memref<2x1x384xf32, #tpu.memory_space<vmem>>, %arg7: memref<2x128x128xbf16, #tpu.memory_space<vmem>>, %arg8: memref<2x1x128xf32, #tpu.memory_space<vmem>>, %arg9: memref<2x1x128xf32, #tpu.memory_space<vmem>>, %arg10: memref<2x1x128xf32, #tpu.memory_space<vmem>>, %arg11: memref<2x128x256xbf16, #tpu.memory_space<vmem>>, %arg12: memref<2x1x256xf32, #tpu.memory_space<vmem>>, %arg13: memref<2x256x128xbf16, #tpu.memory_space<vmem>>, %arg14: memref<2x1x128xf32, #tpu.memory_space<vmem>>, %arg15: memref<1x128xf32, #tpu.memory_space<vmem>>, %arg16: memref<1x128xf32, #tpu.memory_space<vmem>>, %arg17: memref<128x256xbf16, #tpu.memory_space<vmem>>, %arg18: memref<1x256xf32, #tpu.memory_space<vmem>>, %arg19: memref<1x1x128xi32, #tpu.memory_space<vmem>>) attributes {dimension_semantics = [#tpu.dimension_semantics<parallel>], iteration_bounds = array<i64: 2>, scalar_prefetch = 1 : i64, scratch_operands = 0 : i64, tpu.core_type = #tpu.core_type<tc>, window_params = [{transform_indices = @transform_0, window_bounds = array<i64: 1, 16, 128>}, {pipeline_mode = #tpu.pipeline_mode<synchronous>, transform_indices = @transform_1, window_bounds = array<i64: 2, 1, 128>}, {pipeline_mode = #tpu.pipeline_mode<synchronous>, transform_indices = @transform_2, window_bounds = array<i64: 2, 1, 128>}, {pipeline_mode = #tpu.pipeline_mode<synchronous>, transform_indices = @transform_3, window_bounds = array<i64: 2, 128, 384>}, {pipeline_mode = #tpu.pipeline_mode<synchronous>, transform_indices = @transform_4, window_bounds = array<i64: 2, 1, 384>}, {pipeline_mode = #tpu.pipeline_mode<synchronous>, transform_indices = @transform_5, window_bounds = array<i64: 2, 128, 128>}, {pipeline_mode = #tpu.pipeline_mode<synchronous>, transform_indices = @transform_6, window_bounds = array<i64: 2, 1, 128>}, {pipeline_mode = #tpu.pipeline_mode<synchronous>, transform_indices = @transform_7, window_bounds = array<i64: 2, 1, 128>}, {pipeline_mode = #tpu.pipeline_mode<synchronous>, transform_indices = @transform_8, window_bounds = array<i64: 2, 1, 128>}, {pipeline_mode = #tpu.pipeline_mode<synchronous>, transform_indices = @transform_9, window_bounds = array<i64: 2, 128, 256>}, {pipeline_mode = #tpu.pipeline_mode<synchronous>, transform_indices = @transform_10, window_bounds = array<i64: 2, 1, 256>}, {pipeline_mode = #tpu.pipeline_mode<synchronous>, transform_indices = @transform_11, window_bounds = array<i64: 2, 256, 128>}, {pipeline_mode = #tpu.pipeline_mode<synchronous>, transform_indices = @transform_12, window_bounds = array<i64: 2, 1, 128>}, {pipeline_mode = #tpu.pipeline_mode<synchronous>, transform_indices = @transform_13, window_bounds = array<i64: 1, 128>}, {pipeline_mode = #tpu.pipeline_mode<synchronous>, transform_indices = @transform_14, window_bounds = array<i64: 1, 128>}, {pipeline_mode = #tpu.pipeline_mode<synchronous>, transform_indices = @transform_15, window_bounds = array<i64: 128, 256>}, {pipeline_mode = #tpu.pipeline_mode<synchronous>, transform_indices = @transform_16, window_bounds = array<i64: 1, 256>}, {transform_indices = @transform_17, window_bounds = array<i64: 1, 1, 128>}]} {
    %c0 = arith.constant 0 : index
    %c0_0 = arith.constant 0 : index
    %c0_1 = arith.constant 0 : index
    %0 = vector.load %arg2[%c0, %c0_0, %c0_1] : memref<1x16x128xf32, #tpu.memory_space<vmem>>, vector<1x16x128xf32>
    %1 = vector.shape_cast %0 : vector<1x16x128xf32> to vector<16x128xf32>
    %2 = tpu.iota {dimensions = array<i32: 0>} : vector<16x16xi32>
    %3 = tpu.iota {dimensions = array<i32: 1>} : vector<16x16xi32>
    %4 = arith.cmpi sle, %3, %2 : vector<16x16xi32>
    %c0_2 = arith.constant 0 : index
    %c0_3 = arith.constant 0 : index
    %c0_4 = arith.constant 0 : index
    %5 = vector.load %arg3[%c0_2, %c0_3, %c0_4] : memref<2x1x128xf32, #tpu.memory_space<vmem>>, vector<1x1x128xf32>
    %6 = vector.shape_cast %5 : vector<1x1x128xf32> to vector<1x128xf32>
    %c0_5 = arith.constant 0 : index
    %c0_6 = arith.constant 0 : index
    %c0_7 = arith.constant 0 : index
    %7 = vector.load %arg4[%c0_5, %c0_6, %c0_7] : memref<2x1x128xf32, #tpu.memory_space<vmem>>, vector<1x1x128xf32>
    %8 = vector.shape_cast %7 : vector<1x1x128xf32> to vector<1x128xf32>
    %cst = arith.constant dense<0.000000e+00> : vector<16xf32>
    %9 = vector.multi_reduction <add>, %1, %cst [1] : vector<16x128xf32> to vector<16xf32>
    %10 = vector.shape_cast %9 : vector<16xf32> to vector<16x1xf32>
    %cst_8 = arith.constant 1.280000e+02 : f32
    %11 = vector.broadcast %cst_8 : f32 to vector<16x1xf32>
    %12 = arith.divf %10, %11 : vector<16x1xf32>
    %13 = vector.broadcast %12 : vector<16x1xf32> to vector<16x128xf32>
    %14 = arith.subf %1, %13 : vector<16x128xf32>
    %15 = arith.mulf %14, %14 : vector<16x128xf32>
    %cst_9 = arith.constant dense<0.000000e+00> : vector<16xf32>
    %16 = vector.multi_reduction <add>, %15, %cst_9 [1] : vector<16x128xf32> to vector<16xf32>
    %17 = vector.shape_cast %16 : vector<16xf32> to vector<16x1xf32>
    %cst_10 = arith.constant 1.280000e+02 : f32
    %18 = vector.broadcast %cst_10 : f32 to vector<16x1xf32>
    %19 = arith.divf %17, %18 : vector<16x1xf32>
    %20 = vector.broadcast %12 : vector<16x1xf32> to vector<16x128xf32>
    %21 = arith.subf %1, %20 : vector<16x128xf32>
    %cst_11 = arith.constant 9.99999974E-6 : f32
    %22 = vector.broadcast %cst_11 : f32 to vector<16x1xf32>
    %23 = arith.addf %19, %22 : vector<16x1xf32>
    %24 = math.rsqrt %23 : vector<16x1xf32>
    %25 = vector.broadcast %24 : vector<16x1xf32> to vector<16x128xf32>
    %26 = arith.mulf %21, %25 : vector<16x128xf32>
    %27 = vector.broadcast %6 : vector<1x128xf32> to vector<16x128xf32>
    %28 = arith.mulf %26, %27 : vector<16x128xf32>
    %29 = vector.broadcast %8 : vector<1x128xf32> to vector<16x128xf32>
    %30 = arith.addf %28, %29 : vector<16x128xf32>
    %c0_12 = arith.constant 0 : index
    %c0_13 = arith.constant 0 : index
    %c0_14 = arith.constant 0 : index
    %31 = vector.load %arg5[%c0_12, %c0_13, %c0_14] : memref<2x128x384xbf16, #tpu.memory_space<vmem>>, vector<1x128x384xbf16>
    %32 = vector.shape_cast %31 : vector<1x128x384xbf16> to vector<128x384xbf16>
    %c0_15 = arith.constant 0 : index
    %c0_16 = arith.constant 0 : index
    %c0_17 = arith.constant 0 : index
    %33 = vector.load %arg6[%c0_15, %c0_16, %c0_17] : memref<2x1x384xf32, #tpu.memory_space<vmem>>, vector<1x1x384xf32>
    %34 = vector.shape_cast %33 : vector<1x1x384xf32> to vector<1x384xf32>
    %35 = arith.truncf %30 : vector<16x128xf32> to vector<16x128xbf16>
    %cst_18 = arith.constant dense<0.000000e+00> : vector<16x384xf32>
    %36 = tpu.matmul %35, %32, %cst_18 {dimension_numbers = #tpu.dot_dimension_numbers<[1], [0], [0], [1], [0, 0, 1, 1], [], []>} : vector<16x128xbf16>, vector<128x384xbf16>, vector<16x384xf32> -> vector<16x384xf32>
    %37 = vector.broadcast %34 : vector<1x384xf32> to vector<16x384xf32>
    %38 = arith.addf %36, %37 : vector<16x384xf32>
    %39 = vector.extract_strided_slice %38 {offsets = [0, 0], sizes = [16, 128], strides = [1, 1]} : vector<16x384xf32> to vector<16x128xf32>
    %40 = vector.extract_strided_slice %38 {offsets = [0, 128], sizes = [16, 128], strides = [1, 1]} : vector<16x384xf32> to vector<16x128xf32>
    %41 = vector.extract_strided_slice %38 {offsets = [0, 256], sizes = [16, 128], strides = [1, 1]} : vector<16x384xf32> to vector<16x128xf32>
    %42 = vector.extract_strided_slice %39 {offsets = [0, 0], sizes = [16, 32], strides = [1, 1]} : vector<16x128xf32> to vector<16x32xf32>
    %43 = vector.extract_strided_slice %40 {offsets = [0, 0], sizes = [16, 32], strides = [1, 1]} : vector<16x128xf32> to vector<16x32xf32>
    %44 = tpu.transpose %43, [1, 0] : vector<16x32xf32> -> vector<32x16xf32>
    %cst_19 = arith.constant dense<0.000000e+00> : vector<16x16xf32>
    %45 = tpu.matmul %42, %44, %cst_19 {dimension_numbers = #tpu.dot_dimension_numbers<[1], [0], [0], [1], [0, 0, 1, 1], [], []>} : vector<16x32xf32>, vector<32x16xf32>, vector<16x16xf32> -> vector<16x16xf32>
    %cst_20 = arith.constant 0.176776692 : f32
    %46 = vector.broadcast %cst_20 : f32 to vector<16x16xf32>
    %47 = arith.mulf %45, %46 : vector<16x16xf32>
    %cst_21 = arith.constant -1.000000e+30 : f32
    %48 = vector.broadcast %cst_21 : f32 to vector<16x16xf32>
    %49 = arith.select %4, %47, %48 : vector<16x16xi1>, vector<16x16xf32>
    %cst_22 = arith.constant dense<0xFF800000> : vector<16xf32>
    %50 = vector.multi_reduction <maximumf>, %49, %cst_22 [1] : vector<16x16xf32> to vector<16xf32>
    %51 = vector.shape_cast %50 : vector<16xf32> to vector<16x1xf32>
    %52 = vector.broadcast %51 : vector<16x1xf32> to vector<16x16xf32>
    %53 = arith.subf %49, %52 : vector<16x16xf32>
    %54 = math.exp %53 : vector<16x16xf32>
    %cst_23 = arith.constant dense<0.000000e+00> : vector<16xf32>
    %55 = vector.multi_reduction <add>, %54, %cst_23 [1] : vector<16x16xf32> to vector<16xf32>
    %56 = vector.shape_cast %55 : vector<16xf32> to vector<16x1xf32>
    %57 = tpu.reciprocal %56 {approx = true} : vector<16x1xf32> -> vector<16x1xf32>
    %58 = vector.broadcast %57 : vector<16x1xf32> to vector<16x16xf32>
    %59 = arith.mulf %54, %58 : vector<16x16xf32>
    %60 = vector.extract_strided_slice %41 {offsets = [0, 0], sizes = [16, 32], strides = [1, 1]} : vector<16x128xf32> to vector<16x32xf32>
    %cst_24 = arith.constant dense<0.000000e+00> : vector<16x32xf32>
    %61 = tpu.matmul %59, %60, %cst_24 {dimension_numbers = #tpu.dot_dimension_numbers<[1], [0], [0], [1], [0, 0, 1, 1], [], []>} : vector<16x16xf32>, vector<16x32xf32>, vector<16x32xf32> -> vector<16x32xf32>
    %62 = vector.extract_strided_slice %39 {offsets = [0, 32], sizes = [16, 32], strides = [1, 1]} : vector<16x128xf32> to vector<16x32xf32>
    %63 = vector.extract_strided_slice %40 {offsets = [0, 32], sizes = [16, 32], strides = [1, 1]} : vector<16x128xf32> to vector<16x32xf32>
    %64 = tpu.transpose %63, [1, 0] : vector<16x32xf32> -> vector<32x16xf32>
    %cst_25 = arith.constant dense<0.000000e+00> : vector<16x16xf32>
    %65 = tpu.matmul %62, %64, %cst_25 {dimension_numbers = #tpu.dot_dimension_numbers<[1], [0], [0], [1], [0, 0, 1, 1], [], []>} : vector<16x32xf32>, vector<32x16xf32>, vector<16x16xf32> -> vector<16x16xf32>
    %cst_26 = arith.constant 0.176776692 : f32
    %66 = vector.broadcast %cst_26 : f32 to vector<16x16xf32>
    %67 = arith.mulf %65, %66 : vector<16x16xf32>
    %cst_27 = arith.constant -1.000000e+30 : f32
    %68 = vector.broadcast %cst_27 : f32 to vector<16x16xf32>
    %69 = arith.select %4, %67, %68 : vector<16x16xi1>, vector<16x16xf32>
    %cst_28 = arith.constant dense<0xFF800000> : vector<16xf32>
    %70 = vector.multi_reduction <maximumf>, %69, %cst_28 [1] : vector<16x16xf32> to vector<16xf32>
    %71 = vector.shape_cast %70 : vector<16xf32> to vector<16x1xf32>
    %72 = vector.broadcast %71 : vector<16x1xf32> to vector<16x16xf32>
    %73 = arith.subf %69, %72 : vector<16x16xf32>
    %74 = math.exp %73 : vector<16x16xf32>
    %cst_29 = arith.constant dense<0.000000e+00> : vector<16xf32>
    %75 = vector.multi_reduction <add>, %74, %cst_29 [1] : vector<16x16xf32> to vector<16xf32>
    %76 = vector.shape_cast %75 : vector<16xf32> to vector<16x1xf32>
    %77 = tpu.reciprocal %76 {approx = true} : vector<16x1xf32> -> vector<16x1xf32>
    %78 = vector.broadcast %77 : vector<16x1xf32> to vector<16x16xf32>
    %79 = arith.mulf %74, %78 : vector<16x16xf32>
    %80 = vector.extract_strided_slice %41 {offsets = [0, 32], sizes = [16, 32], strides = [1, 1]} : vector<16x128xf32> to vector<16x32xf32>
    %cst_30 = arith.constant dense<0.000000e+00> : vector<16x32xf32>
    %81 = tpu.matmul %79, %80, %cst_30 {dimension_numbers = #tpu.dot_dimension_numbers<[1], [0], [0], [1], [0, 0, 1, 1], [], []>} : vector<16x16xf32>, vector<16x32xf32>, vector<16x32xf32> -> vector<16x32xf32>
    %82 = vector.extract_strided_slice %39 {offsets = [0, 64], sizes = [16, 32], strides = [1, 1]} : vector<16x128xf32> to vector<16x32xf32>
    %83 = vector.extract_strided_slice %40 {offsets = [0, 64], sizes = [16, 32], strides = [1, 1]} : vector<16x128xf32> to vector<16x32xf32>
    %84 = tpu.transpose %83, [1, 0] : vector<16x32xf32> -> vector<32x16xf32>
    %cst_31 = arith.constant dense<0.000000e+00> : vector<16x16xf32>
    %85 = tpu.matmul %82, %84, %cst_31 {dimension_numbers = #tpu.dot_dimension_numbers<[1], [0], [0], [1], [0, 0, 1, 1], [], []>} : vector<16x32xf32>, vector<32x16xf32>, vector<16x16xf32> -> vector<16x16xf32>
    %cst_32 = arith.constant 0.176776692 : f32
    %86 = vector.broadcast %cst_32 : f32 to vector<16x16xf32>
    %87 = arith.mulf %85, %86 : vector<16x16xf32>
    %cst_33 = arith.constant -1.000000e+30 : f32
    %88 = vector.broadcast %cst_33 : f32 to vector<16x16xf32>
    %89 = arith.select %4, %87, %88 : vector<16x16xi1>, vector<16x16xf32>
    %cst_34 = arith.constant dense<0xFF800000> : vector<16xf32>
    %90 = vector.multi_reduction <maximumf>, %89, %cst_34 [1] : vector<16x16xf32> to vector<16xf32>
    %91 = vector.shape_cast %90 : vector<16xf32> to vector<16x1xf32>
    %92 = vector.broadcast %91 : vector<16x1xf32> to vector<16x16xf32>
    %93 = arith.subf %89, %92 : vector<16x16xf32>
    %94 = math.exp %93 : vector<16x16xf32>
    %cst_35 = arith.constant dense<0.000000e+00> : vector<16xf32>
    %95 = vector.multi_reduction <add>, %94, %cst_35 [1] : vector<16x16xf32> to vector<16xf32>
    %96 = vector.shape_cast %95 : vector<16xf32> to vector<16x1xf32>
    %97 = tpu.reciprocal %96 {approx = true} : vector<16x1xf32> -> vector<16x1xf32>
    %98 = vector.broadcast %97 : vector<16x1xf32> to vector<16x16xf32>
    %99 = arith.mulf %94, %98 : vector<16x16xf32>
    %100 = vector.extract_strided_slice %41 {offsets = [0, 64], sizes = [16, 32], strides = [1, 1]} : vector<16x128xf32> to vector<16x32xf32>
    %cst_36 = arith.constant dense<0.000000e+00> : vector<16x32xf32>
    %101 = tpu.matmul %99, %100, %cst_36 {dimension_numbers = #tpu.dot_dimension_numbers<[1], [0], [0], [1], [0, 0, 1, 1], [], []>} : vector<16x16xf32>, vector<16x32xf32>, vector<16x32xf32> -> vector<16x32xf32>
    %102 = vector.extract_strided_slice %39 {offsets = [0, 96], sizes = [16, 32], strides = [1, 1]} : vector<16x128xf32> to vector<16x32xf32>
    %103 = vector.extract_strided_slice %40 {offsets = [0, 96], sizes = [16, 32], strides = [1, 1]} : vector<16x128xf32> to vector<16x32xf32>
    %104 = tpu.transpose %103, [1, 0] : vector<16x32xf32> -> vector<32x16xf32>
    %cst_37 = arith.constant dense<0.000000e+00> : vector<16x16xf32>
    %105 = tpu.matmul %102, %104, %cst_37 {dimension_numbers = #tpu.dot_dimension_numbers<[1], [0], [0], [1], [0, 0, 1, 1], [], []>} : vector<16x32xf32>, vector<32x16xf32>, vector<16x16xf32> -> vector<16x16xf32>
    %cst_38 = arith.constant 0.176776692 : f32
    %106 = vector.broadcast %cst_38 : f32 to vector<16x16xf32>
    %107 = arith.mulf %105, %106 : vector<16x16xf32>
    %cst_39 = arith.constant -1.000000e+30 : f32
    %108 = vector.broadcast %cst_39 : f32 to vector<16x16xf32>
    %109 = arith.select %4, %107, %108 : vector<16x16xi1>, vector<16x16xf32>
    %cst_40 = arith.constant dense<0xFF800000> : vector<16xf32>
    %110 = vector.multi_reduction <maximumf>, %109, %cst_40 [1] : vector<16x16xf32> to vector<16xf32>
    %111 = vector.shape_cast %110 : vector<16xf32> to vector<16x1xf32>
    %112 = vector.broadcast %111 : vector<16x1xf32> to vector<16x16xf32>
    %113 = arith.subf %109, %112 : vector<16x16xf32>
    %114 = math.exp %113 : vector<16x16xf32>
    %cst_41 = arith.constant dense<0.000000e+00> : vector<16xf32>
    %115 = vector.multi_reduction <add>, %114, %cst_41 [1] : vector<16x16xf32> to vector<16xf32>
    %116 = vector.shape_cast %115 : vector<16xf32> to vector<16x1xf32>
    %117 = tpu.reciprocal %116 {approx = true} : vector<16x1xf32> -> vector<16x1xf32>
    %118 = vector.broadcast %117 : vector<16x1xf32> to vector<16x16xf32>
    %119 = arith.mulf %114, %118 : vector<16x16xf32>
    %120 = vector.extract_strided_slice %41 {offsets = [0, 96], sizes = [16, 32], strides = [1, 1]} : vector<16x128xf32> to vector<16x32xf32>
    %cst_42 = arith.constant dense<0.000000e+00> : vector<16x32xf32>
    %121 = tpu.matmul %119, %120, %cst_42 {dimension_numbers = #tpu.dot_dimension_numbers<[1], [0], [0], [1], [0, 0, 1, 1], [], []>} : vector<16x16xf32>, vector<16x32xf32>, vector<16x32xf32> -> vector<16x32xf32>
    %122 = tpu.concatenate %61, %81, %101, %121 in 1 : vector<16x32xf32>, vector<16x32xf32>, vector<16x32xf32>, vector<16x32xf32> -> vector<16x128xf32>
    %c0_43 = arith.constant 0 : index
    %c0_44 = arith.constant 0 : index
    %c0_45 = arith.constant 0 : index
    %123 = vector.load %arg7[%c0_43, %c0_44, %c0_45] : memref<2x128x128xbf16, #tpu.memory_space<vmem>>, vector<1x128x128xbf16>
    %124 = vector.shape_cast %123 : vector<1x128x128xbf16> to vector<128x128xbf16>
    %c0_46 = arith.constant 0 : index
    %c0_47 = arith.constant 0 : index
    %c0_48 = arith.constant 0 : index
    %125 = vector.load %arg8[%c0_46, %c0_47, %c0_48] : memref<2x1x128xf32, #tpu.memory_space<vmem>>, vector<1x1x128xf32>
    %126 = vector.shape_cast %125 : vector<1x1x128xf32> to vector<1x128xf32>
    %127 = arith.truncf %122 : vector<16x128xf32> to vector<16x128xbf16>
    %cst_49 = arith.constant dense<0.000000e+00> : vector<16x128xf32>
    %128 = tpu.matmul %127, %124, %cst_49 {dimension_numbers = #tpu.dot_dimension_numbers<[1], [0], [0], [1], [0, 0, 1, 1], [], []>} : vector<16x128xbf16>, vector<128x128xbf16>, vector<16x128xf32> -> vector<16x128xf32>
    %129 = vector.broadcast %126 : vector<1x128xf32> to vector<16x128xf32>
    %130 = arith.addf %128, %129 : vector<16x128xf32>
    %131 = arith.addf %1, %130 : vector<16x128xf32>
    %c0_50 = arith.constant 0 : index
    %c0_51 = arith.constant 0 : index
    %c0_52 = arith.constant 0 : index
    %132 = vector.load %arg9[%c0_50, %c0_51, %c0_52] : memref<2x1x128xf32, #tpu.memory_space<vmem>>, vector<1x1x128xf32>
    %133 = vector.shape_cast %132 : vector<1x1x128xf32> to vector<1x128xf32>
    %c0_53 = arith.constant 0 : index
    %c0_54 = arith.constant 0 : index
    %c0_55 = arith.constant 0 : index
    %134 = vector.load %arg10[%c0_53, %c0_54, %c0_55] : memref<2x1x128xf32, #tpu.memory_space<vmem>>, vector<1x1x128xf32>
    %135 = vector.shape_cast %134 : vector<1x1x128xf32> to vector<1x128xf32>
    %cst_56 = arith.constant dense<0.000000e+00> : vector<16xf32>
    %136 = vector.multi_reduction <add>, %131, %cst_56 [1] : vector<16x128xf32> to vector<16xf32>
    %137 = vector.shape_cast %136 : vector<16xf32> to vector<16x1xf32>
    %cst_57 = arith.constant 1.280000e+02 : f32
    %138 = vector.broadcast %cst_57 : f32 to vector<16x1xf32>
    %139 = arith.divf %137, %138 : vector<16x1xf32>
    %140 = vector.broadcast %139 : vector<16x1xf32> to vector<16x128xf32>
    %141 = arith.subf %131, %140 : vector<16x128xf32>
    %142 = arith.mulf %141, %141 : vector<16x128xf32>
    %cst_58 = arith.constant dense<0.000000e+00> : vector<16xf32>
    %143 = vector.multi_reduction <add>, %142, %cst_58 [1] : vector<16x128xf32> to vector<16xf32>
    %144 = vector.shape_cast %143 : vector<16xf32> to vector<16x1xf32>
    %cst_59 = arith.constant 1.280000e+02 : f32
    %145 = vector.broadcast %cst_59 : f32 to vector<16x1xf32>
    %146 = arith.divf %144, %145 : vector<16x1xf32>
    %147 = vector.broadcast %139 : vector<16x1xf32> to vector<16x128xf32>
    %148 = arith.subf %131, %147 : vector<16x128xf32>
    %cst_60 = arith.constant 9.99999974E-6 : f32
    %149 = vector.broadcast %cst_60 : f32 to vector<16x1xf32>
    %150 = arith.addf %146, %149 : vector<16x1xf32>
    %151 = math.rsqrt %150 : vector<16x1xf32>
    %152 = vector.broadcast %151 : vector<16x1xf32> to vector<16x128xf32>
    %153 = arith.mulf %148, %152 : vector<16x128xf32>
    %154 = vector.broadcast %133 : vector<1x128xf32> to vector<16x128xf32>
    %155 = arith.mulf %153, %154 : vector<16x128xf32>
    %156 = vector.broadcast %135 : vector<1x128xf32> to vector<16x128xf32>
    %157 = arith.addf %155, %156 : vector<16x128xf32>
    %c0_61 = arith.constant 0 : index
    %c0_62 = arith.constant 0 : index
    %c0_63 = arith.constant 0 : index
    %158 = vector.load %arg11[%c0_61, %c0_62, %c0_63] : memref<2x128x256xbf16, #tpu.memory_space<vmem>>, vector<1x128x256xbf16>
    %159 = vector.shape_cast %158 : vector<1x128x256xbf16> to vector<128x256xbf16>
    %c0_64 = arith.constant 0 : index
    %c0_65 = arith.constant 0 : index
    %c0_66 = arith.constant 0 : index
    %160 = vector.load %arg12[%c0_64, %c0_65, %c0_66] : memref<2x1x256xf32, #tpu.memory_space<vmem>>, vector<1x1x256xf32>
    %161 = vector.shape_cast %160 : vector<1x1x256xf32> to vector<1x256xf32>
    %162 = arith.truncf %157 : vector<16x128xf32> to vector<16x128xbf16>
    %cst_67 = arith.constant dense<0.000000e+00> : vector<16x256xf32>
    %163 = tpu.matmul %162, %159, %cst_67 {dimension_numbers = #tpu.dot_dimension_numbers<[1], [0], [0], [1], [0, 0, 1, 1], [], []>} : vector<16x128xbf16>, vector<128x256xbf16>, vector<16x256xf32> -> vector<16x256xf32>
    %164 = vector.broadcast %161 : vector<1x256xf32> to vector<16x256xf32>
    %165 = arith.addf %163, %164 : vector<16x256xf32>
    %166 = arith.mulf %165, %165 : vector<16x256xf32>
    %167 = arith.mulf %165, %166 : vector<16x256xf32>
    %cst_68 = arith.constant 4.471500e-02 : f32
    %168 = vector.broadcast %cst_68 : f32 to vector<16x256xf32>
    %169 = arith.mulf %168, %167 : vector<16x256xf32>
    %170 = arith.addf %165, %169 : vector<16x256xf32>
    %cst_69 = arith.constant 0.797884583 : f32
    %171 = vector.broadcast %cst_69 : f32 to vector<16x256xf32>
    %172 = arith.mulf %171, %170 : vector<16x256xf32>
    %173 = math.tanh %172 : vector<16x256xf32>
    %cst_70 = arith.constant 1.000000e+00 : f32
    %174 = vector.broadcast %cst_70 : f32 to vector<16x256xf32>
    %175 = arith.addf %174, %173 : vector<16x256xf32>
    %cst_71 = arith.constant 5.000000e-01 : f32
    %176 = vector.broadcast %cst_71 : f32 to vector<16x256xf32>
    %177 = arith.mulf %176, %175 : vector<16x256xf32>
    %178 = arith.mulf %165, %177 : vector<16x256xf32>
    %c0_72 = arith.constant 0 : index
    %c0_73 = arith.constant 0 : index
    %c0_74 = arith.constant 0 : index
    %179 = vector.load %arg13[%c0_72, %c0_73, %c0_74] : memref<2x256x128xbf16, #tpu.memory_space<vmem>>, vector<1x256x128xbf16>
    %180 = vector.shape_cast %179 : vector<1x256x128xbf16> to vector<256x128xbf16>
    %c0_75 = arith.constant 0 : index
    %c0_76 = arith.constant 0 : index
    %c0_77 = arith.constant 0 : index
    %181 = vector.load %arg14[%c0_75, %c0_76, %c0_77] : memref<2x1x128xf32, #tpu.memory_space<vmem>>, vector<1x1x128xf32>
    %182 = vector.shape_cast %181 : vector<1x1x128xf32> to vector<1x128xf32>
    %183 = arith.truncf %178 : vector<16x256xf32> to vector<16x256xbf16>
    %cst_78 = arith.constant dense<0.000000e+00> : vector<16x128xf32>
    %184 = tpu.matmul %183, %180, %cst_78 {dimension_numbers = #tpu.dot_dimension_numbers<[1], [0], [0], [1], [0, 0, 1, 1], [], []>} : vector<16x256xbf16>, vector<256x128xbf16>, vector<16x128xf32> -> vector<16x128xf32>
    %185 = vector.broadcast %182 : vector<1x128xf32> to vector<16x128xf32>
    %186 = arith.addf %184, %185 : vector<16x128xf32>
    %187 = arith.addf %131, %186 : vector<16x128xf32>
    %c1 = arith.constant 1 : index
    %c0_79 = arith.constant 0 : index
    %c0_80 = arith.constant 0 : index
    %188 = vector.load %arg3[%c1, %c0_79, %c0_80] : memref<2x1x128xf32, #tpu.memory_space<vmem>>, vector<1x1x128xf32>
    %189 = vector.shape_cast %188 : vector<1x1x128xf32> to vector<1x128xf32>
    %c1_81 = arith.constant 1 : index
    %c0_82 = arith.constant 0 : index
    %c0_83 = arith.constant 0 : index
    %190 = vector.load %arg4[%c1_81, %c0_82, %c0_83] : memref<2x1x128xf32, #tpu.memory_space<vmem>>, vector<1x1x128xf32>
    %191 = vector.shape_cast %190 : vector<1x1x128xf32> to vector<1x128xf32>
    %cst_84 = arith.constant dense<0.000000e+00> : vector<16xf32>
    %192 = vector.multi_reduction <add>, %187, %cst_84 [1] : vector<16x128xf32> to vector<16xf32>
    %193 = vector.shape_cast %192 : vector<16xf32> to vector<16x1xf32>
    %cst_85 = arith.constant 1.280000e+02 : f32
    %194 = vector.broadcast %cst_85 : f32 to vector<16x1xf32>
    %195 = arith.divf %193, %194 : vector<16x1xf32>
    %196 = vector.broadcast %195 : vector<16x1xf32> to vector<16x128xf32>
    %197 = arith.subf %187, %196 : vector<16x128xf32>
    %198 = arith.mulf %197, %197 : vector<16x128xf32>
    %cst_86 = arith.constant dense<0.000000e+00> : vector<16xf32>
    %199 = vector.multi_reduction <add>, %198, %cst_86 [1] : vector<16x128xf32> to vector<16xf32>
    %200 = vector.shape_cast %199 : vector<16xf32> to vector<16x1xf32>
    %cst_87 = arith.constant 1.280000e+02 : f32
    %201 = vector.broadcast %cst_87 : f32 to vector<16x1xf32>
    %202 = arith.divf %200, %201 : vector<16x1xf32>
    %203 = vector.broadcast %195 : vector<16x1xf32> to vector<16x128xf32>
    %204 = arith.subf %187, %203 : vector<16x128xf32>
    %cst_88 = arith.constant 9.99999974E-6 : f32
    %205 = vector.broadcast %cst_88 : f32 to vector<16x1xf32>
    %206 = arith.addf %202, %205 : vector<16x1xf32>
    %207 = math.rsqrt %206 : vector<16x1xf32>
    %208 = vector.broadcast %207 : vector<16x1xf32> to vector<16x128xf32>
    %209 = arith.mulf %204, %208 : vector<16x128xf32>
    %210 = vector.broadcast %189 : vector<1x128xf32> to vector<16x128xf32>
    %211 = arith.mulf %209, %210 : vector<16x128xf32>
    %212 = vector.broadcast %191 : vector<1x128xf32> to vector<16x128xf32>
    %213 = arith.addf %211, %212 : vector<16x128xf32>
    %c1_89 = arith.constant 1 : index
    %c0_90 = arith.constant 0 : index
    %c0_91 = arith.constant 0 : index
    %214 = vector.load %arg5[%c1_89, %c0_90, %c0_91] : memref<2x128x384xbf16, #tpu.memory_space<vmem>>, vector<1x128x384xbf16>
    %215 = vector.shape_cast %214 : vector<1x128x384xbf16> to vector<128x384xbf16>
    %c1_92 = arith.constant 1 : index
    %c0_93 = arith.constant 0 : index
    %c0_94 = arith.constant 0 : index
    %216 = vector.load %arg6[%c1_92, %c0_93, %c0_94] : memref<2x1x384xf32, #tpu.memory_space<vmem>>, vector<1x1x384xf32>
    %217 = vector.shape_cast %216 : vector<1x1x384xf32> to vector<1x384xf32>
    %218 = arith.truncf %213 : vector<16x128xf32> to vector<16x128xbf16>
    %cst_95 = arith.constant dense<0.000000e+00> : vector<16x384xf32>
    %219 = tpu.matmul %218, %215, %cst_95 {dimension_numbers = #tpu.dot_dimension_numbers<[1], [0], [0], [1], [0, 0, 1, 1], [], []>} : vector<16x128xbf16>, vector<128x384xbf16>, vector<16x384xf32> -> vector<16x384xf32>
    %220 = vector.broadcast %217 : vector<1x384xf32> to vector<16x384xf32>
    %221 = arith.addf %219, %220 : vector<16x384xf32>
    %222 = vector.extract_strided_slice %221 {offsets = [0, 0], sizes = [16, 128], strides = [1, 1]} : vector<16x384xf32> to vector<16x128xf32>
    %223 = vector.extract_strided_slice %221 {offsets = [0, 128], sizes = [16, 128], strides = [1, 1]} : vector<16x384xf32> to vector<16x128xf32>
    %224 = vector.extract_strided_slice %221 {offsets = [0, 256], sizes = [16, 128], strides = [1, 1]} : vector<16x384xf32> to vector<16x128xf32>
    %225 = vector.extract_strided_slice %222 {offsets = [0, 0], sizes = [16, 32], strides = [1, 1]} : vector<16x128xf32> to vector<16x32xf32>
    %226 = vector.extract_strided_slice %223 {offsets = [0, 0], sizes = [16, 32], strides = [1, 1]} : vector<16x128xf32> to vector<16x32xf32>
    %227 = tpu.transpose %226, [1, 0] : vector<16x32xf32> -> vector<32x16xf32>
    %cst_96 = arith.constant dense<0.000000e+00> : vector<16x16xf32>
    %228 = tpu.matmul %225, %227, %cst_96 {dimension_numbers = #tpu.dot_dimension_numbers<[1], [0], [0], [1], [0, 0, 1, 1], [], []>} : vector<16x32xf32>, vector<32x16xf32>, vector<16x16xf32> -> vector<16x16xf32>
    %cst_97 = arith.constant 0.176776692 : f32
    %229 = vector.broadcast %cst_97 : f32 to vector<16x16xf32>
    %230 = arith.mulf %228, %229 : vector<16x16xf32>
    %cst_98 = arith.constant -1.000000e+30 : f32
    %231 = vector.broadcast %cst_98 : f32 to vector<16x16xf32>
    %232 = arith.select %4, %230, %231 : vector<16x16xi1>, vector<16x16xf32>
    %cst_99 = arith.constant dense<0xFF800000> : vector<16xf32>
    %233 = vector.multi_reduction <maximumf>, %232, %cst_99 [1] : vector<16x16xf32> to vector<16xf32>
    %234 = vector.shape_cast %233 : vector<16xf32> to vector<16x1xf32>
    %235 = vector.broadcast %234 : vector<16x1xf32> to vector<16x16xf32>
    %236 = arith.subf %232, %235 : vector<16x16xf32>
    %237 = math.exp %236 : vector<16x16xf32>
    %cst_100 = arith.constant dense<0.000000e+00> : vector<16xf32>
    %238 = vector.multi_reduction <add>, %237, %cst_100 [1] : vector<16x16xf32> to vector<16xf32>
    %239 = vector.shape_cast %238 : vector<16xf32> to vector<16x1xf32>
    %240 = tpu.reciprocal %239 {approx = true} : vector<16x1xf32> -> vector<16x1xf32>
    %241 = vector.broadcast %240 : vector<16x1xf32> to vector<16x16xf32>
    %242 = arith.mulf %237, %241 : vector<16x16xf32>
    %243 = vector.extract_strided_slice %224 {offsets = [0, 0], sizes = [16, 32], strides = [1, 1]} : vector<16x128xf32> to vector<16x32xf32>
    %cst_101 = arith.constant dense<0.000000e+00> : vector<16x32xf32>
    %244 = tpu.matmul %242, %243, %cst_101 {dimension_numbers = #tpu.dot_dimension_numbers<[1], [0], [0], [1], [0, 0, 1, 1], [], []>} : vector<16x16xf32>, vector<16x32xf32>, vector<16x32xf32> -> vector<16x32xf32>
    %245 = vector.extract_strided_slice %222 {offsets = [0, 32], sizes = [16, 32], strides = [1, 1]} : vector<16x128xf32> to vector<16x32xf32>
    %246 = vector.extract_strided_slice %223 {offsets = [0, 32], sizes = [16, 32], strides = [1, 1]} : vector<16x128xf32> to vector<16x32xf32>
    %247 = tpu.transpose %246, [1, 0] : vector<16x32xf32> -> vector<32x16xf32>
    %cst_102 = arith.constant dense<0.000000e+00> : vector<16x16xf32>
    %248 = tpu.matmul %245, %247, %cst_102 {dimension_numbers = #tpu.dot_dimension_numbers<[1], [0], [0], [1], [0, 0, 1, 1], [], []>} : vector<16x32xf32>, vector<32x16xf32>, vector<16x16xf32> -> vector<16x16xf32>
    %cst_103 = arith.constant 0.176776692 : f32
    %249 = vector.broadcast %cst_103 : f32 to vector<16x16xf32>
    %250 = arith.mulf %248, %249 : vector<16x16xf32>
    %cst_104 = arith.constant -1.000000e+30 : f32
    %251 = vector.broadcast %cst_104 : f32 to vector<16x16xf32>
    %252 = arith.select %4, %250, %251 : vector<16x16xi1>, vector<16x16xf32>
    %cst_105 = arith.constant dense<0xFF800000> : vector<16xf32>
    %253 = vector.multi_reduction <maximumf>, %252, %cst_105 [1] : vector<16x16xf32> to vector<16xf32>
    %254 = vector.shape_cast %253 : vector<16xf32> to vector<16x1xf32>
    %255 = vector.broadcast %254 : vector<16x1xf32> to vector<16x16xf32>
    %256 = arith.subf %252, %255 : vector<16x16xf32>
    %257 = math.exp %256 : vector<16x16xf32>
    %cst_106 = arith.constant dense<0.000000e+00> : vector<16xf32>
    %258 = vector.multi_reduction <add>, %257, %cst_106 [1] : vector<16x16xf32> to vector<16xf32>
    %259 = vector.shape_cast %258 : vector<16xf32> to vector<16x1xf32>
    %260 = tpu.reciprocal %259 {approx = true} : vector<16x1xf32> -> vector<16x1xf32>
    %261 = vector.broadcast %260 : vector<16x1xf32> to vector<16x16xf32>
    %262 = arith.mulf %257, %261 : vector<16x16xf32>
    %263 = vector.extract_strided_slice %224 {offsets = [0, 32], sizes = [16, 32], strides = [1, 1]} : vector<16x128xf32> to vector<16x32xf32>
    %cst_107 = arith.constant dense<0.000000e+00> : vector<16x32xf32>
    %264 = tpu.matmul %262, %263, %cst_107 {dimension_numbers = #tpu.dot_dimension_numbers<[1], [0], [0], [1], [0, 0, 1, 1], [], []>} : vector<16x16xf32>, vector<16x32xf32>, vector<16x32xf32> -> vector<16x32xf32>
    %265 = vector.extract_strided_slice %222 {offsets = [0, 64], sizes = [16, 32], strides = [1, 1]} : vector<16x128xf32> to vector<16x32xf32>
    %266 = vector.extract_strided_slice %223 {offsets = [0, 64], sizes = [16, 32], strides = [1, 1]} : vector<16x128xf32> to vector<16x32xf32>
    %267 = tpu.transpose %266, [1, 0] : vector<16x32xf32> -> vector<32x16xf32>
    %cst_108 = arith.constant dense<0.000000e+00> : vector<16x16xf32>
    %268 = tpu.matmul %265, %267, %cst_108 {dimension_numbers = #tpu.dot_dimension_numbers<[1], [0], [0], [1], [0, 0, 1, 1], [], []>} : vector<16x32xf32>, vector<32x16xf32>, vector<16x16xf32> -> vector<16x16xf32>
    %cst_109 = arith.constant 0.176776692 : f32
    %269 = vector.broadcast %cst_109 : f32 to vector<16x16xf32>
    %270 = arith.mulf %268, %269 : vector<16x16xf32>
    %cst_110 = arith.constant -1.000000e+30 : f32
    %271 = vector.broadcast %cst_110 : f32 to vector<16x16xf32>
    %272 = arith.select %4, %270, %271 : vector<16x16xi1>, vector<16x16xf32>
    %cst_111 = arith.constant dense<0xFF800000> : vector<16xf32>
    %273 = vector.multi_reduction <maximumf>, %272, %cst_111 [1] : vector<16x16xf32> to vector<16xf32>
    %274 = vector.shape_cast %273 : vector<16xf32> to vector<16x1xf32>
    %275 = vector.broadcast %274 : vector<16x1xf32> to vector<16x16xf32>
    %276 = arith.subf %272, %275 : vector<16x16xf32>
    %277 = math.exp %276 : vector<16x16xf32>
    %cst_112 = arith.constant dense<0.000000e+00> : vector<16xf32>
    %278 = vector.multi_reduction <add>, %277, %cst_112 [1] : vector<16x16xf32> to vector<16xf32>
    %279 = vector.shape_cast %278 : vector<16xf32> to vector<16x1xf32>
    %280 = tpu.reciprocal %279 {approx = true} : vector<16x1xf32> -> vector<16x1xf32>
    %281 = vector.broadcast %280 : vector<16x1xf32> to vector<16x16xf32>
    %282 = arith.mulf %277, %281 : vector<16x16xf32>
    %283 = vector.extract_strided_slice %224 {offsets = [0, 64], sizes = [16, 32], strides = [1, 1]} : vector<16x128xf32> to vector<16x32xf32>
    %cst_113 = arith.constant dense<0.000000e+00> : vector<16x32xf32>
    %284 = tpu.matmul %282, %283, %cst_113 {dimension_numbers = #tpu.dot_dimension_numbers<[1], [0], [0], [1], [0, 0, 1, 1], [], []>} : vector<16x16xf32>, vector<16x32xf32>, vector<16x32xf32> -> vector<16x32xf32>
    %285 = vector.extract_strided_slice %222 {offsets = [0, 96], sizes = [16, 32], strides = [1, 1]} : vector<16x128xf32> to vector<16x32xf32>
    %286 = vector.extract_strided_slice %223 {offsets = [0, 96], sizes = [16, 32], strides = [1, 1]} : vector<16x128xf32> to vector<16x32xf32>
    %287 = tpu.transpose %286, [1, 0] : vector<16x32xf32> -> vector<32x16xf32>
    %cst_114 = arith.constant dense<0.000000e+00> : vector<16x16xf32>
    %288 = tpu.matmul %285, %287, %cst_114 {dimension_numbers = #tpu.dot_dimension_numbers<[1], [0], [0], [1], [0, 0, 1, 1], [], []>} : vector<16x32xf32>, vector<32x16xf32>, vector<16x16xf32> -> vector<16x16xf32>
    %cst_115 = arith.constant 0.176776692 : f32
    %289 = vector.broadcast %cst_115 : f32 to vector<16x16xf32>
    %290 = arith.mulf %288, %289 : vector<16x16xf32>
    %cst_116 = arith.constant -1.000000e+30 : f32
    %291 = vector.broadcast %cst_116 : f32 to vector<16x16xf32>
    %292 = arith.select %4, %290, %291 : vector<16x16xi1>, vector<16x16xf32>
    %cst_117 = arith.constant dense<0xFF800000> : vector<16xf32>
    %293 = vector.multi_reduction <maximumf>, %292, %cst_117 [1] : vector<16x16xf32> to vector<16xf32>
    %294 = vector.shape_cast %293 : vector<16xf32> to vector<16x1xf32>
    %295 = vector.broadcast %294 : vector<16x1xf32> to vector<16x16xf32>
    %296 = arith.subf %292, %295 : vector<16x16xf32>
    %297 = math.exp %296 : vector<16x16xf32>
    %cst_118 = arith.constant dense<0.000000e+00> : vector<16xf32>
    %298 = vector.multi_reduction <add>, %297, %cst_118 [1] : vector<16x16xf32> to vector<16xf32>
    %299 = vector.shape_cast %298 : vector<16xf32> to vector<16x1xf32>
    %300 = tpu.reciprocal %299 {approx = true} : vector<16x1xf32> -> vector<16x1xf32>
    %301 = vector.broadcast %300 : vector<16x1xf32> to vector<16x16xf32>
    %302 = arith.mulf %297, %301 : vector<16x16xf32>
    %303 = vector.extract_strided_slice %224 {offsets = [0, 96], sizes = [16, 32], strides = [1, 1]} : vector<16x128xf32> to vector<16x32xf32>
    %cst_119 = arith.constant dense<0.000000e+00> : vector<16x32xf32>
    %304 = tpu.matmul %302, %303, %cst_119 {dimension_numbers = #tpu.dot_dimension_numbers<[1], [0], [0], [1], [0, 0, 1, 1], [], []>} : vector<16x16xf32>, vector<16x32xf32>, vector<16x32xf32> -> vector<16x32xf32>
    %305 = tpu.concatenate %244, %264, %284, %304 in 1 : vector<16x32xf32>, vector<16x32xf32>, vector<16x32xf32>, vector<16x32xf32> -> vector<16x128xf32>
    %c1_120 = arith.constant 1 : index
    %c0_121 = arith.constant 0 : index
    %c0_122 = arith.constant 0 : index
    %306 = vector.load %arg7[%c1_120, %c0_121, %c0_122] : memref<2x128x128xbf16, #tpu.memory_space<vmem>>, vector<1x128x128xbf16>
    %307 = vector.shape_cast %306 : vector<1x128x128xbf16> to vector<128x128xbf16>
    %c1_123 = arith.constant 1 : index
    %c0_124 = arith.constant 0 : index
    %c0_125 = arith.constant 0 : index
    %308 = vector.load %arg8[%c1_123, %c0_124, %c0_125] : memref<2x1x128xf32, #tpu.memory_space<vmem>>, vector<1x1x128xf32>
    %309 = vector.shape_cast %308 : vector<1x1x128xf32> to vector<1x128xf32>
    %310 = arith.truncf %305 : vector<16x128xf32> to vector<16x128xbf16>
    %cst_126 = arith.constant dense<0.000000e+00> : vector<16x128xf32>
    %311 = tpu.matmul %310, %307, %cst_126 {dimension_numbers = #tpu.dot_dimension_numbers<[1], [0], [0], [1], [0, 0, 1, 1], [], []>} : vector<16x128xbf16>, vector<128x128xbf16>, vector<16x128xf32> -> vector<16x128xf32>
    %312 = vector.broadcast %309 : vector<1x128xf32> to vector<16x128xf32>
    %313 = arith.addf %311, %312 : vector<16x128xf32>
    %314 = arith.addf %187, %313 : vector<16x128xf32>
    %c1_127 = arith.constant 1 : index
    %c0_128 = arith.constant 0 : index
    %c0_129 = arith.constant 0 : index
    %315 = vector.load %arg9[%c1_127, %c0_128, %c0_129] : memref<2x1x128xf32, #tpu.memory_space<vmem>>, vector<1x1x128xf32>
    %316 = vector.shape_cast %315 : vector<1x1x128xf32> to vector<1x128xf32>
    %c1_130 = arith.constant 1 : index
    %c0_131 = arith.constant 0 : index
    %c0_132 = arith.constant 0 : index
    %317 = vector.load %arg10[%c1_130, %c0_131, %c0_132] : memref<2x1x128xf32, #tpu.memory_space<vmem>>, vector<1x1x128xf32>
    %318 = vector.shape_cast %317 : vector<1x1x128xf32> to vector<1x128xf32>
    %cst_133 = arith.constant dense<0.000000e+00> : vector<16xf32>
    %319 = vector.multi_reduction <add>, %314, %cst_133 [1] : vector<16x128xf32> to vector<16xf32>
    %320 = vector.shape_cast %319 : vector<16xf32> to vector<16x1xf32>
    %cst_134 = arith.constant 1.280000e+02 : f32
    %321 = vector.broadcast %cst_134 : f32 to vector<16x1xf32>
    %322 = arith.divf %320, %321 : vector<16x1xf32>
    %323 = vector.broadcast %322 : vector<16x1xf32> to vector<16x128xf32>
    %324 = arith.subf %314, %323 : vector<16x128xf32>
    %325 = arith.mulf %324, %324 : vector<16x128xf32>
    %cst_135 = arith.constant dense<0.000000e+00> : vector<16xf32>
    %326 = vector.multi_reduction <add>, %325, %cst_135 [1] : vector<16x128xf32> to vector<16xf32>
    %327 = vector.shape_cast %326 : vector<16xf32> to vector<16x1xf32>
    %cst_136 = arith.constant 1.280000e+02 : f32
    %328 = vector.broadcast %cst_136 : f32 to vector<16x1xf32>
    %329 = arith.divf %327, %328 : vector<16x1xf32>
    %330 = vector.broadcast %322 : vector<16x1xf32> to vector<16x128xf32>
    %331 = arith.subf %314, %330 : vector<16x128xf32>
    %cst_137 = arith.constant 9.99999974E-6 : f32
    %332 = vector.broadcast %cst_137 : f32 to vector<16x1xf32>
    %333 = arith.addf %329, %332 : vector<16x1xf32>
    %334 = math.rsqrt %333 : vector<16x1xf32>
    %335 = vector.broadcast %334 : vector<16x1xf32> to vector<16x128xf32>
    %336 = arith.mulf %331, %335 : vector<16x128xf32>
    %337 = vector.broadcast %316 : vector<1x128xf32> to vector<16x128xf32>
    %338 = arith.mulf %336, %337 : vector<16x128xf32>
    %339 = vector.broadcast %318 : vector<1x128xf32> to vector<16x128xf32>
    %340 = arith.addf %338, %339 : vector<16x128xf32>
    %c1_138 = arith.constant 1 : index
    %c0_139 = arith.constant 0 : index
    %c0_140 = arith.constant 0 : index
    %341 = vector.load %arg11[%c1_138, %c0_139, %c0_140] : memref<2x128x256xbf16, #tpu.memory_space<vmem>>, vector<1x128x256xbf16>
    %342 = vector.shape_cast %341 : vector<1x128x256xbf16> to vector<128x256xbf16>
    %c1_141 = arith.constant 1 : index
    %c0_142 = arith.constant 0 : index
    %c0_143 = arith.constant 0 : index
    %343 = vector.load %arg12[%c1_141, %c0_142, %c0_143] : memref<2x1x256xf32, #tpu.memory_space<vmem>>, vector<1x1x256xf32>
    %344 = vector.shape_cast %343 : vector<1x1x256xf32> to vector<1x256xf32>
    %345 = arith.truncf %340 : vector<16x128xf32> to vector<16x128xbf16>
    %cst_144 = arith.constant dense<0.000000e+00> : vector<16x256xf32>
    %346 = tpu.matmul %345, %342, %cst_144 {dimension_numbers = #tpu.dot_dimension_numbers<[1], [0], [0], [1], [0, 0, 1, 1], [], []>} : vector<16x128xbf16>, vector<128x256xbf16>, vector<16x256xf32> -> vector<16x256xf32>
    %347 = vector.broadcast %344 : vector<1x256xf32> to vector<16x256xf32>
    %348 = arith.addf %346, %347 : vector<16x256xf32>
    %349 = arith.mulf %348, %348 : vector<16x256xf32>
    %350 = arith.mulf %348, %349 : vector<16x256xf32>
    %cst_145 = arith.constant 4.471500e-02 : f32
    %351 = vector.broadcast %cst_145 : f32 to vector<16x256xf32>
    %352 = arith.mulf %351, %350 : vector<16x256xf32>
    %353 = arith.addf %348, %352 : vector<16x256xf32>
    %cst_146 = arith.constant 0.797884583 : f32
    %354 = vector.broadcast %cst_146 : f32 to vector<16x256xf32>
    %355 = arith.mulf %354, %353 : vector<16x256xf32>
    %356 = math.tanh %355 : vector<16x256xf32>
    %cst_147 = arith.constant 1.000000e+00 : f32
    %357 = vector.broadcast %cst_147 : f32 to vector<16x256xf32>
    %358 = arith.addf %357, %356 : vector<16x256xf32>
    %cst_148 = arith.constant 5.000000e-01 : f32
    %359 = vector.broadcast %cst_148 : f32 to vector<16x256xf32>
    %360 = arith.mulf %359, %358 : vector<16x256xf32>
    %361 = arith.mulf %348, %360 : vector<16x256xf32>
    %c1_149 = arith.constant 1 : index
    %c0_150 = arith.constant 0 : index
    %c0_151 = arith.constant 0 : index
    %362 = vector.load %arg13[%c1_149, %c0_150, %c0_151] : memref<2x256x128xbf16, #tpu.memory_space<vmem>>, vector<1x256x128xbf16>
    %363 = vector.shape_cast %362 : vector<1x256x128xbf16> to vector<256x128xbf16>
    %c1_152 = arith.constant 1 : index
    %c0_153 = arith.constant 0 : index
    %c0_154 = arith.constant 0 : index
    %364 = vector.load %arg14[%c1_152, %c0_153, %c0_154] : memref<2x1x128xf32, #tpu.memory_space<vmem>>, vector<1x1x128xf32>
    %365 = vector.shape_cast %364 : vector<1x1x128xf32> to vector<1x128xf32>
    %366 = arith.truncf %361 : vector<16x256xf32> to vector<16x256xbf16>
    %cst_155 = arith.constant dense<0.000000e+00> : vector<16x128xf32>
    %367 = tpu.matmul %366, %363, %cst_155 {dimension_numbers = #tpu.dot_dimension_numbers<[1], [0], [0], [1], [0, 0, 1, 1], [], []>} : vector<16x256xbf16>, vector<256x128xbf16>, vector<16x128xf32> -> vector<16x128xf32>
    %368 = vector.broadcast %365 : vector<1x128xf32> to vector<16x128xf32>
    %369 = arith.addf %367, %368 : vector<16x128xf32>
    %370 = arith.addf %314, %369 : vector<16x128xf32>
    %c0_156 = arith.constant 0 : index
    %c0_157 = arith.constant 0 : index
    %371 = vector.load %arg15[%c0_156, %c0_157] : memref<1x128xf32, #tpu.memory_space<vmem>>, vector<1x128xf32>
    %c0_158 = arith.constant 0 : index
    %c0_159 = arith.constant 0 : index
    %372 = vector.load %arg16[%c0_158, %c0_159] : memref<1x128xf32, #tpu.memory_space<vmem>>, vector<1x128xf32>
    %cst_160 = arith.constant dense<0.000000e+00> : vector<16xf32>
    %373 = vector.multi_reduction <add>, %370, %cst_160 [1] : vector<16x128xf32> to vector<16xf32>
    %374 = vector.shape_cast %373 : vector<16xf32> to vector<16x1xf32>
    %cst_161 = arith.constant 1.280000e+02 : f32
    %375 = vector.broadcast %cst_161 : f32 to vector<16x1xf32>
    %376 = arith.divf %374, %375 : vector<16x1xf32>
    %377 = vector.broadcast %376 : vector<16x1xf32> to vector<16x128xf32>
    %378 = arith.subf %370, %377 : vector<16x128xf32>
    %379 = arith.mulf %378, %378 : vector<16x128xf32>
    %cst_162 = arith.constant dense<0.000000e+00> : vector<16xf32>
    %380 = vector.multi_reduction <add>, %379, %cst_162 [1] : vector<16x128xf32> to vector<16xf32>
    %381 = vector.shape_cast %380 : vector<16xf32> to vector<16x1xf32>
    %cst_163 = arith.constant 1.280000e+02 : f32
    %382 = vector.broadcast %cst_163 : f32 to vector<16x1xf32>
    %383 = arith.divf %381, %382 : vector<16x1xf32>
    %384 = vector.broadcast %376 : vector<16x1xf32> to vector<16x128xf32>
    %385 = arith.subf %370, %384 : vector<16x128xf32>
    %cst_164 = arith.constant 9.99999974E-6 : f32
    %386 = vector.broadcast %cst_164 : f32 to vector<16x1xf32>
    %387 = arith.addf %383, %386 : vector<16x1xf32>
    %388 = math.rsqrt %387 : vector<16x1xf32>
    %389 = vector.broadcast %388 : vector<16x1xf32> to vector<16x128xf32>
    %390 = arith.mulf %385, %389 : vector<16x128xf32>
    %391 = vector.broadcast %371 : vector<1x128xf32> to vector<16x128xf32>
    %392 = arith.mulf %390, %391 : vector<16x128xf32>
    %393 = vector.broadcast %372 : vector<1x128xf32> to vector<16x128xf32>
    %394 = arith.addf %392, %393 : vector<16x128xf32>
    %c0_165 = arith.constant 0 : index
    %395 = memref.load %arg1[%c0_165] : memref<1xi32, #tpu.memory_space<smem>>
    %396 = tpu.iota {dimensions = array<i32: 0>} : vector<16x1xi32>
    %397 = vector.broadcast %395 : i32 to vector<16x1xi32>
    %398 = arith.cmpi eq, %396, %397 : vector<16x1xi32>
    %cst_166 = arith.constant 0.000000e+00 : f32
    %399 = vector.shape_cast %398 : vector<16x1xi1> to vector<16x1xi1>
    %400 = vector.broadcast %399 : vector<16x1xi1> to vector<16x128xi1>
    %401 = vector.broadcast %cst_166 : f32 to vector<16x128xf32>
    %402 = arith.select %400, %394, %401 : vector<16x128xi1>, vector<16x128xf32>
    %cst_167 = arith.constant dense<0.000000e+00> : vector<128xf32>
    %403 = vector.multi_reduction <add>, %402, %cst_167 [0] : vector<16x128xf32> to vector<128xf32>
    %404 = vector.shape_cast %403 : vector<128xf32> to vector<1x128xf32>
    %c0_168 = arith.constant 0 : index
    %c0_169 = arith.constant 0 : index
    %405 = vector.load %arg17[%c0_168, %c0_169] : memref<128x256xbf16, #tpu.memory_space<vmem>>, vector<128x256xbf16>
    %c0_170 = arith.constant 0 : index
    %c0_171 = arith.constant 0 : index
    %406 = vector.load %arg18[%c0_170, %c0_171] : memref<1x256xf32, #tpu.memory_space<vmem>>, vector<1x256xf32>
    %407 = arith.truncf %404 : vector<1x128xf32> to vector<1x128xbf16>
    %cst_172 = arith.constant dense<0.000000e+00> : vector<1x256xf32>
    %408 = tpu.matmul %407, %405, %cst_172 {dimension_numbers = #tpu.dot_dimension_numbers<[1], [0], [0], [1], [0, 0, 1, 1], [], []>} : vector<1x128xbf16>, vector<128x256xbf16>, vector<1x256xf32> -> vector<1x256xf32>
    %409 = arith.addf %408, %406 : vector<1x256xf32>
    %410 = tpu.iota {dimensions = array<i32: 1>} : vector<1x256xi32>
    %411 = arith.sitofp %410 : vector<1x256xi32> to vector<1x256xf32>
    %cst_173 = arith.constant dense<0xFF800000> : vector<1xf32>
    %412 = vector.multi_reduction <maximumf>, %409, %cst_173 [1] : vector<1x256xf32> to vector<1xf32>
    %413 = vector.shape_cast %412 : vector<1xf32> to vector<1x1xf32>
    %414 = vector.broadcast %413 : vector<1x1xf32> to vector<1x256xf32>
    %415 = arith.cmpf oeq, %409, %414 : vector<1x256xf32>
    %cst_174 = arith.constant 2.560000e+02 : f32
    %416 = vector.broadcast %cst_174 : f32 to vector<1x256xf32>
    %417 = arith.select %415, %411, %416 : vector<1x256xi1>, vector<1x256xf32>
    %cst_175 = arith.constant dense<0x7F800000> : vector<1xf32>
    %418 = vector.multi_reduction <minimumf>, %417, %cst_175 [1] : vector<1x256xf32> to vector<1xf32>
    %419 = vector.shape_cast %418 : vector<1xf32> to vector<1x1xf32>
    %420 = arith.fptosi %419 : vector<1x1xf32> to vector<1x1xi32>
    %421 = vector.shape_cast %420 : vector<1x1xi32> to vector<1x1x1xi32>
    %422 = vector.shape_cast %421 : vector<1x1x1xi32> to vector<1x1x1xi32>
    %423 = vector.broadcast %422 : vector<1x1x1xi32> to vector<1x1x128xi32>
    %c0_176 = arith.constant 0 : index
    %c0_177 = arith.constant 0 : index
    %c0_178 = arith.constant 0 : index
    %424 = vector.load %arg19[%c0_176, %c0_177, %c0_178] : memref<1x1x128xi32, #tpu.memory_space<vmem>>, vector<1x1x128xi32>
    tpu.vector_store %arg19[%c0_176, %c0_177, %c0_178], %423 {strides = array<i32>} : memref<1x1x128xi32, #tpu.memory_space<vmem>>, vector<1x1x128xi32>,
    return
  }
  func.func @transform_0(%arg0: i32, %arg1: memref<1xi32, #tpu.memory_space<smem>>) -> (i32, i32, i32) {
    %c0_i32 = arith.constant 0 : i32
    %c0_i32_0 = arith.constant 0 : i32
    %c0_i32_1 = arith.constant 0 : i32
    return %arg0, %c0_i32, %c0_i32_0 : i32, i32, i32
  }
  func.func @transform_1(%arg0: i32, %arg1: memref<1xi32, #tpu.memory_space<smem>>) -> (i32, i32, i32) {
    %c0_i32 = arith.constant 0 : i32
    %c0_i32_0 = arith.constant 0 : i32
    %c0_i32_1 = arith.constant 0 : i32
    %c0_i32_2 = arith.constant 0 : i32
    return %c0_i32, %c0_i32_0, %c0_i32_1 : i32, i32, i32
  }
  func.func @transform_2(%arg0: i32, %arg1: memref<1xi32, #tpu.memory_space<smem>>) -> (i32, i32, i32) {
    %c0_i32 = arith.constant 0 : i32
    %c0_i32_0 = arith.constant 0 : i32
    %c0_i32_1 = arith.constant 0 : i32
    %c0_i32_2 = arith.constant 0 : i32
    return %c0_i32, %c0_i32_0, %c0_i32_1 : i32, i32, i32
  }
  func.func @transform_3(%arg0: i32, %arg1: memref<1xi32, #tpu.memory_space<smem>>) -> (i32, i32, i32) {
    %c0_i32 = arith.constant 0 : i32
    %c0_i32_0 = arith.constant 0 : i32
    %c0_i32_1 = arith.constant 0 : i32
    %c0_i32_2 = arith.constant 0 : i32
    return %c0_i32, %c0_i32_0, %c0_i32_1 : i32, i32, i32
  }
  func.func @transform_4(%arg0: i32, %arg1: memref<1xi32, #tpu.memory_space<smem>>) -> (i32, i32, i32) {
    %c0_i32 = arith.constant 0 : i32
    %c0_i32_0 = arith.constant 0 : i32
    %c0_i32_1 = arith.constant 0 : i32
    %c0_i32_2 = arith.constant 0 : i32
    return %c0_i32, %c0_i32_0, %c0_i32_1 : i32, i32, i32
  }
  func.func @transform_5(%arg0: i32, %arg1: memref<1xi32, #tpu.memory_space<smem>>) -> (i32, i32, i32) {
    %c0_i32 = arith.constant 0 : i32
    %c0_i32_0 = arith.constant 0 : i32
    %c0_i32_1 = arith.constant 0 : i32
    %c0_i32_2 = arith.constant 0 : i32
    return %c0_i32, %c0_i32_0, %c0_i32_1 : i32, i32, i32
  }
  func.func @transform_6(%arg0: i32, %arg1: memref<1xi32, #tpu.memory_space<smem>>) -> (i32, i32, i32) {
    %c0_i32 = arith.constant 0 : i32
    %c0_i32_0 = arith.constant 0 : i32
    %c0_i32_1 = arith.constant 0 : i32
    %c0_i32_2 = arith.constant 0 : i32
    return %c0_i32, %c0_i32_0, %c0_i32_1 : i32, i32, i32
  }
  func.func @transform_7(%arg0: i32, %arg1: memref<1xi32, #tpu.memory_space<smem>>) -> (i32, i32, i32) {
    %c0_i32 = arith.constant 0 : i32
    %c0_i32_0 = arith.constant 0 : i32
    %c0_i32_1 = arith.constant 0 : i32
    %c0_i32_2 = arith.constant 0 : i32
    return %c0_i32, %c0_i32_0, %c0_i32_1 : i32, i32, i32
  }
  func.func @transform_8(%arg0: i32, %arg1: memref<1xi32, #tpu.memory_space<smem>>) -> (i32, i32, i32) {
    %c0_i32 = arith.constant 0 : i32
    %c0_i32_0 = arith.constant 0 : i32
    %c0_i32_1 = arith.constant 0 : i32
    %c0_i32_2 = arith.constant 0 : i32
    return %c0_i32, %c0_i32_0, %c0_i32_1 : i32, i32, i32
  }
  func.func @transform_9(%arg0: i32, %arg1: memref<1xi32, #tpu.memory_space<smem>>) -> (i32, i32, i32) {
    %c0_i32 = arith.constant 0 : i32
    %c0_i32_0 = arith.constant 0 : i32
    %c0_i32_1 = arith.constant 0 : i32
    %c0_i32_2 = arith.constant 0 : i32
    return %c0_i32, %c0_i32_0, %c0_i32_1 : i32, i32, i32
  }
  func.func @transform_10(%arg0: i32, %arg1: memref<1xi32, #tpu.memory_space<smem>>) -> (i32, i32, i32) {
    %c0_i32 = arith.constant 0 : i32
    %c0_i32_0 = arith.constant 0 : i32
    %c0_i32_1 = arith.constant 0 : i32
    %c0_i32_2 = arith.constant 0 : i32
    return %c0_i32, %c0_i32_0, %c0_i32_1 : i32, i32, i32
  }
  func.func @transform_11(%arg0: i32, %arg1: memref<1xi32, #tpu.memory_space<smem>>) -> (i32, i32, i32) {
    %c0_i32 = arith.constant 0 : i32
    %c0_i32_0 = arith.constant 0 : i32
    %c0_i32_1 = arith.constant 0 : i32
    %c0_i32_2 = arith.constant 0 : i32
    return %c0_i32, %c0_i32_0, %c0_i32_1 : i32, i32, i32
  }
  func.func @transform_12(%arg0: i32, %arg1: memref<1xi32, #tpu.memory_space<smem>>) -> (i32, i32, i32) {
    %c0_i32 = arith.constant 0 : i32
    %c0_i32_0 = arith.constant 0 : i32
    %c0_i32_1 = arith.constant 0 : i32
    %c0_i32_2 = arith.constant 0 : i32
    return %c0_i32, %c0_i32_0, %c0_i32_1 : i32, i32, i32
  }
  func.func @transform_13(%arg0: i32, %arg1: memref<1xi32, #tpu.memory_space<smem>>) -> (i32, i32) {
    %c0_i32 = arith.constant 0 : i32
    %c0_i32_0 = arith.constant 0 : i32
    %c0_i32_1 = arith.constant 0 : i32
    return %c0_i32, %c0_i32_0 : i32, i32
  }
  func.func @transform_14(%arg0: i32, %arg1: memref<1xi32, #tpu.memory_space<smem>>) -> (i32, i32) {
    %c0_i32 = arith.constant 0 : i32
    %c0_i32_0 = arith.constant 0 : i32
    %c0_i32_1 = arith.constant 0 : i32
    return %c0_i32, %c0_i32_0 : i32, i32
  }
  func.func @transform_15(%arg0: i32, %arg1: memref<1xi32, #tpu.memory_space<smem>>) -> (i32, i32) {
    %c0_i32 = arith.constant 0 : i32
    %c0_i32_0 = arith.constant 0 : i32
    %c0_i32_1 = arith.constant 0 : i32
    return %c0_i32, %c0_i32_0 : i32, i32
  }
  func.func @transform_16(%arg0: i32, %arg1: memref<1xi32, #tpu.memory_space<smem>>) -> (i32, i32) {
    %c0_i32 = arith.constant 0 : i32
    %c0_i32_0 = arith.constant 0 : i32
    %c0_i32_1 = arith.constant 0 : i32
    return %c0_i32, %c0_i32_0 : i32, i32
  }
  func.func @transform_17(%arg0: i32, %arg1: memref<1xi32, #tpu.memory_space<smem>>) -> (i32, i32, i32) {
    %c0_i32 = arith.constant 0 : i32
    %c0_i32_0 = arith.constant 0 : i32
    %c0_i32_1 = arith.constant 0 : i32
    return %arg0, %c0_i32, %c0_i32_0 : i32, i32, i32
  }
}

</mosaic_0001>

<bundles_post_ra>
// kernel: closed_call.30
= control target key start
LH: loop header
LB: loop body
LE: loop exit
PB: predicated region body
PF: predicated region fallthrough
CT: control target
= control target key end

     0   :  { %s6369_s0 = inlined_call_operand.<no memory space> [shape: s32[1], index: 0, kind: input, shape index: {}]   ;;  %s6370_s1 = inlined_call_operand.vmem [shape: f32[2,16,128], index: 1, kind: input, shape index: {}]   ;;  %s6371_s2 = inlined_call_operand.vmem [shape: f32[2,1,128], index: 2, kind: input, shape index: {}]   ;;  %s6372_s3 = inlined_call_operand.vmem [shape: f32[2,1,128], index: 3, kind: input, shape index: {}]   ;;  %s6373_s4 = inlined_call_operand.vmem [shape: bf16[2,128,384], index: 4, kind: input, shape index: {}]   ;;  %s6374_s5 = inlined_call_operand.vmem [shape: f32[2,1,384], index: 5, kind: input, shape index: {}]   ;;  %s6375_s6 = inlined_call_operand.hbm [shape: bf16[2,128,128], index: 6, kind: input, shape index: {}]   ;;  %s6376_s7 = inlined_call_operand.vmem [shape: f32[2,1,128], index: 7, kind: input, shape index: {}]   ;;  %s6377_s8 = inlined_call_operand.vmem [shape: f32[2,1,128], index: 8, kind: input, shape index: {}]   ;;  %s6378_s9 = inlined_call_operand.vmem [shape: f32[2,1,128], index: 9, kind: input, shape index: {}]   ;;  %s6379_s10 = inlined_call_operand.hbm [shape: bf16[2,128,256], index: 10, kind: input, shape index: {}]   ;;  %s6380_s11 = inlined_call_operand.vmem [shape: f32[2,1,256], index: 11, kind: input, shape index: {}]   ;;  %s6381_s12 = inlined_call_operand.hbm [shape: bf16[2,256,128], index: 12, kind: input, shape index: {}]   ;;  %s6382_s13 = inlined_call_operand.vmem [shape: f32[2,1,128], index: 13, kind: input, shape index: {}]   ;;  %s6383_s14 = inlined_call_operand.vmem [shape: f32[1,128], index: 14, kind: input, shape index: {}]   ;;  %s6384_s15 = inlined_call_operand.vmem [shape: f32[1,128], index: 15, kind: input, shape index: {}]   ;;  %s6385_s16 = inlined_call_operand.hbm [shape: bf16[128,256], index: 16, kind: input, shape index: {}]   ;;  %s6386_s17 = inlined_call_operand.vmem [shape: f32[1,256], index: 17, kind: input, shape index: {}]   ;;  %s6387_s18 = inlined_call_operand.vmem [shape: s32[2,1,128], index: 18, kind: output, shape index: {}]  }
   0x1   :  { %6394 = sst [smem:[#allocation15_spill]] %s6369_s0 }
   0x2   :  { %6395 = sst [smem:[#allocation16_spill]] %s6370_s1  ;;  %s6401_s29 = sld [smem:[#allocation15_spill]] }
   0x3   :  { %6396 = sst [smem:[#allocation17_spill]] %s6371_s2 }
   0x4   :  { %6397 = sst [smem:[#allocation18_spill]] %s6379_s10 }
   0x5   :  { %6398 = sst [smem:[#allocation19_spill]] %s6384_s15 }
   0x6   :  { %6399 = sst [smem:[#allocation20_spill]] %s6386_s17 }
   0x7   :  { %6400 = sst [smem:[#allocation21_spill]] %s6387_s18 }
   0x8   :  { %23 = sst [smem:[#allocation3]] %s6401_s29 }
   0x9   :  { %24 = vsyncpa [#allocation5], 0 }
   0xa   :  { %25 = vsyncpa [#allocation7], 0 }
   0xb   :  { %26 = vsyncpa [#allocation10], 0  ;;  %s5635_s30 = smov 0  }
   0xc LB: > { %6402 = sst [smem:[#allocation14_spill]] %s5521_s30  ;;  %s5523_s0 = smov [#allocation6]   ;;  %s5521_s30 = sphi %s5635_s30, %s32_s30  }
   0xd   : > { %s471_s19 = sshll.u32 %s5523_s0, 4  ;;  %s5641_s1 = sadd.s32 4294967295, %s5521_s30   ;;  %s5646_s19 = int_to_ptr.vmem [resolvable:$true] %s471_s19 }
   0xe   : > { %p4276_p0 = scmp.ge.s32.totalorder %s5521_s30, 1  ;;  %p425_p1 = scmp.lt.s32.totalorder %s5521_s30, 3 }
   0xf   : > { %p6392_p2 = scmp.eq.s32.totalorder %s5641_s1, 0  ;;  %s5524_s21 = smov [#allocation4]  }
  0x10   : > { %p5648_p3 = pnand %p4276_p0, %p425_p1  ;;  %s449_s22 = sshll.u32 %s5524_s21, 4  ;;  %s5654_s22 = int_to_ptr.vmem [resolvable:$true] %s449_s22 }
  0x11   : > { %s5525_s23 = smov [#allocation8]   ;;  %s6405_s10 = sld [smem:[#allocation18_spill]] }
  0x12   : > { %s6403_s20 = scalar_select %p5648_p3, 1, 0 }
  0x13   : > { %p4972_p4 = pneg %p5648_p3  ;;  %s5662_s24 = sshll.u32 %s5525_s23, 4  ;;  %s488_s24 = int_to_ptr.vmem [resolvable:$true] %s5662_s24 }
  0x15   : > { %p5658_p5 = pnand %p6392_p2, %p4972_p4 }
  0x17   : > { %s5391_s27 = scalar_lea.hbm %s6405_s10, 4096  ;;  %p5672_p7 = pneg %p5658_p5 }
  0x18   : > { %p5392_p6 = scmp.ne.s32.totalorder %s6405_s10, %s5391_s27  ;;  %p5398_p10 = scmp.lt.u32.totalorder %s5391_s27, %s6405_s10 }
  0x1a   : > { %p5394_p8 = pnand %p5672_p7, %p5392_p6 }
  0x1c   : > { %p5395_p9 = pneg %p5394_p8 }
  0x1e   : > { %p5400_p11 = pnand %p5398_p10, %p5395_p9 }
  0x20   : > { %5403 = shalt.err (!%p5400_p11)
}
  0x21   : > { %s5404_s25 = scalar_lea.vmem %s5646_s19, 4096  ;;  %p5412_p1 = scmp.lt.s32.totalorder %s5646_s19, %s5646_s19 }
  0x22   : > { %p5405_p12 = scmp.ne.s32.totalorder %s5646_s19, %s5404_s25  ;;  %p5413_p4 = scmp.lt.s32.totalorder %s5404_s25, %s5404_s25 }
  0x24   : > { %p5407_p13 = pnand %p5405_p12, %p5672_p7  ;;  %p5414_p6 = por %p5413_p4, %p5412_p1 }
  0x26   : > { %p5408_p0 = pneg %p5407_p13 }
  0x28   : > { %p5415_p8 = pnand %p5414_p6, %p5408_p0 }
  0x2a   : > { %5418 = shalt.err (!%p5415_p8)
}
  0x2b   : > { %s6390_s26 = smov 128   ;;  %s6391_s27 = smov 8  }
  0x2c   : > { %4978 = dma.hbm_to_vmem [thread:$0]  (!%p5658_p5), %s6405_s10, 4096, %s5646_s19, [#allocation7], %s6390_s26, %s6390_s26, %s6391_s27  }
  0x2d   : > { %s5419_s25 = scalar_lea.hbm %s6375_s6, 2048 }
  0x2e   : > { %p5420_p9 = scmp.ne.s32.totalorder %s6375_s6, %s5419_s25  ;;  %p5426_p12 = scmp.lt.u32.totalorder %s5419_s25, %s6375_s6 }
  0x30   : > { %p5422_p10 = pnand %p5420_p9, %p5672_p7 }
  0x32   : > { %p5423_p11 = pneg %p5422_p10 }
  0x34   : > { %p5428_p13 = pnand %p5426_p12, %p5423_p11 }
  0x36   : > { %5431 = shalt.err (!%p5428_p13)
}
  0x37   : > { %s5432_s19 = scalar_lea.vmem %s5654_s22, 2048  ;;  %p5440_p6 = scmp.lt.s32.totalorder %s5654_s22, %s5654_s22 }
  0x38   : > { %p5433_p0 = scmp.ne.s32.totalorder %s5654_s22, %s5432_s19  ;;  %p5441_p8 = scmp.lt.s32.totalorder %s5432_s19, %s5432_s19 }
  0x3a   : > { %p5435_p1 = pnand %p5433_p0, %p5672_p7  ;;  %p5442_p9 = por %p5441_p8, %p5440_p6 }
  0x3c   : > { %p5436_p4 = pneg %p5435_p1 }
  0x3e   : > { %p5443_p10 = pnand %p5442_p9, %p5436_p4 }
  0x40   : > { %5446 = shalt.err (!%p5443_p10)
}
  0x41   : > { %s5528_s18 = smov 64   ;;  %s5529_s15 = smov 4  }
  0x42   : > { %4975 = dma.hbm_to_vmem [thread:$0]  (!%p5658_p5), %s6375_s6, 2048, %s5654_s22, [#allocation5], %s5528_s18, %s5528_s18, %s5529_s15  }
  0x43   : > { %s5530_s28 = smov [#allocation9]   ;;  %s5447_s25 = scalar_lea.hbm %s6381_s12, 4096 }
  0x44   : > { %s509_s29 = sshll.u32 %s5530_s28, 4  ;;  %p5448_p11 = scmp.ne.s32.totalorder %s6381_s12, %s5447_s25  ;;  %s510_s29 = int_to_ptr.vmem [resolvable:$true] %s509_s29 }
  0x45   : > { %p5454_p0 = scmp.lt.u32.totalorder %s5447_s25, %s6381_s12 }
  0x46   : > { %p5450_p12 = pnand %p5448_p11, %p5672_p7 }
  0x48   : > { %p5451_p13 = pneg %p5450_p12 }
  0x4a   : > { %p5456_p1 = pnand %p5454_p0, %p5451_p13 }
  0x4c   : > { %5459 = shalt.err (!%p5456_p1)
}
  0x4d   : > { %s5460_s22 = scalar_lea.vmem %s488_s24, 4096  ;;  %p5468_p9 = scmp.lt.s32.totalorder %s488_s24, %s488_s24 }
  0x4e   : > { %p5461_p4 = scmp.ne.s32.totalorder %s488_s24, %s5460_s22  ;;  %p5469_p10 = scmp.lt.s32.totalorder %s5460_s22, %s5460_s22 }
  0x50   : > { %p5463_p6 = pnand %p5461_p4, %p5672_p7  ;;  %p5470_p2 = por %p5469_p10, %p5468_p9 }
  0x52   : > { %p5464_p8 = pneg %p5463_p6 }
  0x54   : > { %p5471_p3 = pnand %p5470_p2, %p5464_p8 }
  0x56   : > { %5474 = shalt.err (!%p5471_p3)
}
  0x57   : > { %4981 = dma.hbm_to_vmem [thread:$0]  (!%p5658_p5), %s6381_s12, 4096, %s488_s24, [#allocation7], %s5528_s18, %s5528_s18, %s5529_s15  }
  0x58   : > { %s5475_s30 = scalar_lea.hbm %s6385_s16, 2048 }
  0x59   : > { %p5476_p11 = scmp.ne.s32.totalorder %s6385_s16, %s5475_s30  ;;  %p5482_p3 = scmp.lt.u32.totalorder %s5475_s30, %s6385_s16 }
  0x5b   : > { %p5478_p12 = pnand %p5476_p11, %p5672_p7 }
  0x5d   : > { %p5479_p2 = pneg %p5478_p12 }
  0x5f   : > { %p5484_p13 = pnand %p5482_p3, %p5479_p2 }
  0x61   : > { %5487 = shalt.err (!%p5484_p13)
}
  0x62   : > { %s5488_s19 = scalar_lea.vmem %s510_s29, 2048  ;;  %p5496_p6 = scmp.lt.s32.totalorder %s510_s29, %s510_s29 }
  0x63   : > { %p5489_p0 = scmp.ne.s32.totalorder %s510_s29, %s5488_s19  ;;  %p5497_p8 = scmp.lt.s32.totalorder %s5488_s19, %s5488_s19 }
  0x65   : > { %p5491_p1 = pnand %p5489_p0, %p5672_p7  ;;  %p5498_p9 = por %p5497_p8, %p5496_p6 }
  0x67   : > { %p5492_p4 = pneg %p5491_p1 }
  0x69   : > { %p5499_p10 = pnand %p5498_p9, %p5492_p4 }
  0x6b   : > { %5502 = shalt.err (!%p5499_p10)
}
  0x6c   : > { %s6407_s24 = smov 8   ;;  %s6408_s18 = smov 128  }
  0x6d   : > { %4984 = dma.hbm_to_vmem [thread:$0]  (!%p5658_p5), %s6385_s16, 2048, %s510_s29, [#allocation10], %s6408_s18, %s6408_s18, %s6407_s24  }
  0x6e   : > { %p6409_p11 = scmp.ne.s32.totalorder %s6403_s20, 0 }
  0x6f   : > { %p6410_p7 = scmp.eq.s32.totalorder (!%p6409_p11), %s5641_s1, 0 }
  0x70   : > { %536 = sbr.rel (%p6409_p11) target bundleno = 8093 (0x1f9d), region = 88 }
  0x77   : > { %5508 = dma.done.wait (%p6410_p7), [#allocation5], 2048   ;;  %p6411_p12 = pmov %p6410_p7 }
  0x78   : > { %p6412_p2 = pmov %p6410_p7 }
  0x79   : > { %5510 = vsyncadd (%p6411_p12), [#allocation5], 4294965248 }
  0x7a   : > { %5512 = dma.done.wait (%p6412_p2), [#allocation7], 8192   ;;  %p6413_p3 = pmov %p6412_p2 }
  0x7b   : > { %p6414_p13 = pmov %p6412_p2 }
  0x7c   : > { %5514 = vsyncadd (%p6413_p3), [#allocation7], 4294959104 }
  0x7d   : > { %5516 = dma.done.wait (%p6414_p13), [#allocation10], 2048   ;;  %p6415_p5 = pmov %p6412_p2 }
  0x7e   : > { %p598_p0 = scmp.lt.s32.totalorder %s5641_s1, 1  ;;  %s6416_s29 = sld [smem:[#allocation16_spill]]  ;;  %v5105_v2 = vld [vmem:[%s6373_s4 + $0x4] ss:$12 sps:$4 sm:$0xff]   ;;  %v5107_v3 = vld [vmem:[%s6373_s4] ss:$12 sps:$4 sm:$0xff]   ;;  %v609_v53 = vlaneseq }
  0x7f   : > { %5518 = vsyncadd (%p6415_p5), [#allocation10], 4294965248  ;;  %v5531_v4 = vmov 0.0   ;;  %v5108_v5 = vld [vmem:[%s6373_s4 + $0x8] ss:$12 sps:$4 sm:$0xff]   ;;  %835 = vmatprep.subr.bf16.mxu0 %v5105_v2  ;;  %v5532_v30 = vmov 0  }
  0x80   : > { %s6429_s1 = smov (!%p598_p0, %s5641_s1), 1  ;;  %4682 = vmatprep.subr.bf16.mxu1 %v5531_v4  ;;  %v5109_v6 = vld [vmem:[%s6373_s4 + $0x1c] ss:$12 sps:$4 sm:$0xff]   ;;  %836 = vmatpush1.bf16.msra.mxu0 %v5107_v3  ;;  %v5111_v15 = vld [vmem:[%s6373_s4 + $0x18] ss:$12 sps:$4 sm:$0xff]   ;;  %vm5533_vm0 = vmmov 0  }
  0x81   : > { %s4537_s20 = sshll.u32 %s6429_s1, 4  ;;  %4683 = vmatpush3.bf16.msra.mxu1 %v5108_v5  ;;  %837 = vmatprep.subr.bf16.mxu0 %v5109_v6  ;;  %v5112_v16 = vld [vmem:[%s6373_s4 + $0x20] ss:$12 sps:$4 sm:$0xff]   ;;  %v5115_v18 = vld [vmem:[%s6373_s4 + $0x30] ss:$12 sps:$4 sm:$0xff]   ;;  %v5884_v54 = vshrl.u32 %v609_v53, 7 }
  0x82   : > { %4684 = vmatprep.subr.bf16.mxu1 %v5531_v4  ;;  %v5113_v17 = vld [vmem:[%s6373_s4 + $0x34] ss:$12 sps:$4 sm:$0xff]   ;;  %v5116_v19 = vld [vmem:[%s6373_s4 + $0x38] ss:$12 sps:$4 sm:$0xff]   ;;  %v5120_v22 = vld [vmem:[%s6373_s4 + $0x50] ss:$12 sps:$4 sm:$0xff]   ;;  %867 = vmatprep.mubr.bf16.mxu0 %v5532_v30 }
  0x83   : > { %v5117_v20 = vld [vmem:[%s6373_s4 + $0x4c] ss:$12 sps:$4 sm:$0xff]   ;;  %v5119_v21 = vld [vmem:[%s6373_s4 + $0x48] ss:$12 sps:$4 sm:$0xff]   ;;  %v5121_v23 = vld [vmem:[%s6373_s4 + $0x64] ss:$12 sps:$4 sm:$0xff]   ;;  %4698 = vmatprep.mubr.msk.bf16.mxu1 %vm5533_vm0, %v5531_v4 }
  0x84   : > { %s5781_s26 = scalar_lea.vmem %s6416_s29, %s4537_s20  ;;  %838 = vmatpush1.bf16.msra.mxu0 %v5111_v15  ;;  %v5123_v24 = vld [vmem:[%s6373_s4 + $0x60] ss:$12 sps:$4 sm:$0xff]   ;;  %v5124_v25 = vld [vmem:[%s6373_s4 + $0x68] ss:$12 sps:$4 sm:$0xff]   ;;  %v5127_v27 = vld [vmem:[%s6373_s4 + $0x78] ss:$12 sps:$4 sm:$0xff]  }
  0x85   : > { %v607_v0 = vld [vmem:[%s5781_s26] sm:$0xff]  ;;  %v608_v1 = vld [vmem:[%s5781_s26 + $0x8] sm:$0xff]  ;;  %4685 = vmatpush3.bf16.msra.mxu1 %v5112_v16  ;;  %839 = vmatprep.subr.bf16.mxu0 %v5113_v17  ;;  %v5131_v31 = vld [vmem:[%s6373_s4 + $0x90] ss:$12 sps:$4 sm:$0xff]   ;;  %s6417_s29 = sld [smem:[#allocation17_spill]]  ;;  %v5887_v55 = vsub.s32 0, %v5884_v54 }
  0x86   : > { %618 = vadd.xlane.f32.xlu0 %v607_v0  ;;  %4686 = vmatprep.subr.bf16.mxu1 %v5531_v4  ;;  %v5125_v26 = vld [vmem:[%s6373_s4 + $0x7c] ss:$12 sps:$4 sm:$0xff]   ;;  %v5128_v28 = vld [vmem:[%s6373_s4 + $0x80] ss:$12 sps:$4 sm:$0xff]   ;;  %v5132_v32 = vld [vmem:[%s6373_s4 + $0x98] ss:$12 sps:$4 sm:$0xff]  }
  0x87   : > { %v5129_v29 = vld [vmem:[%s6373_s4 + $0x94] ss:$12 sps:$4 sm:$0xff]   ;;  %v5133_v33 = vld [vmem:[%s6373_s4 + $0xac] ss:$12 sps:$4 sm:$0xff]   ;;  %v5136_v35 = vld [vmem:[%s6373_s4 + $0xb0] ss:$12 sps:$4 sm:$0xff]  }
  0x88   : > { %840 = vmatpush1.bf16.msra.mxu0 %v5115_v18  ;;  %v5135_v34 = vld [vmem:[%s6373_s4 + $0xa8] ss:$12 sps:$4 sm:$0xff]   ;;  %v4290_v48 = vld [vmem:[%s6372_s3] ss:$0 sm:$0xff]  ;;  %v702_v57 = vsub.s32 2, %v5884_v54  ;;  %v5894_v58 = vsub.s32 1, %v5884_v54 }
  0x89   : > { %4687 = vmatpush3.bf16.msra.mxu1 %v5116_v19  ;;  %841 = vmatprep.subr.bf16.mxu0 %v5117_v20  ;;  %v689_v56 = vld [vmem:[%s6374_s5] sm:$0x7]  ;;  %vm919_vm1 = vcmask 261120   ;;  %s5534_s28 = smov 96   ;;  %vm1011_vm4 = vcmask 130048   ;;  %s5535_s21 = smov 64  }
  0x8a   : > { %620 = vadd.xlane.f32.xlu0 %v608_v1  ;;  %4688 = vmatprep.subr.bf16.mxu1 %v5531_v4  ;;  %v695_v59 = vrot.slane %v689_v56, %v5887_v55  ;;  %v703_v60 = vrot.slane %v689_v56, %v702_v57  ;;  %v699_v63 = vrot.slane %v689_v56, %v5894_v58  ;;  %vm5914_vm2 = vmpackc.low %vm919_vm1, %vm919_vm1  ;;  %s5536_s23 = smov 32   ;;  %vm1755_vm6 = vcmask 523264   ;;  %s3999_s19 = sld [smem:[#allocation3]] }
  0x8b   : > { %v4289_v44 = vld [vmem:[%s6417_s29] ss:$0 sm:$0xff]  ;;  %vm1758_vm7 = vcmask 785408   ;;  %s6424_s22 = sld [smem:[#allocation19_spill]]  ;;  %vm4169_vm10 = vcmask 1040384   ;;  %s6426_s0 = sld [smem:[#allocation21_spill]] }
  0x8c   : > { %842 = vmatpush1.bf16.msra.mxu0 %v5119_v21 }
  0x8d   : > { %4689 = vmatpush3.bf16.msra.mxu1 %v5120_v22  ;;  %843 = vmatprep.subr.bf16.mxu0 %v5121_v23 }
  0x8e   : > { %4690 = vmatprep.subr.bf16.mxu1 %v5531_v4 }
  0x90   : > { %844 = vmatpush1.bf16.msra.mxu0 %v5123_v24  ;;  %v5935_v24 = vadd.s32 8, %v5884_v54 }
  0x91   : > { %4691 = vmatpush3.bf16.msra.mxu1 %v5124_v25  ;;  %845 = vmatprep.subr.bf16.mxu0 %v5125_v26  ;;  %v5937_v25 = vand.u32 127, %v609_v53  ;;  %s605_s17 = scalar_lea.vmem %s6426_s0, %s6429_s1 }
  0x92   : > { %4692 = vmatprep.subr.bf16.mxu1 %v5531_v4 }
  0x93   : > { %vm5941_vm3 = vcmp.le.s32.totalorder %v5937_v25, %v5935_v24  ;;  %vm5947_vm5 = vcmp.le.s32.totalorder %v5937_v25, %v5884_v54 }
  0x94   : > { %846 = vmatpush1.bf16.msra.mxu0 %v5127_v27 }
  0x95   : > { %4693 = vmatpush3.bf16.msra.mxu1 %v5128_v28  ;;  %847 = vmatprep.subr.bf16.mxu0 %v5129_v29 }
  0x96   : > { %4694 = vmatprep.subr.bf16.mxu1 %v5531_v4 }
  0x98   : > { %848 = vmatpush1.bf16.msra.mxu0 %v5131_v31 }
  0x99   : > { %4695 = vmatpush3.bf16.msra.mxu1 %v5132_v32  ;;  %849 = vmatprep.subr.bf16.mxu0 %v5133_v33 }
  0x9a   : > { %4696 = vmatprep.subr.bf16.mxu1 %v5531_v4 }
  0x9c   : > { %850 = vmatpush1.bf16.msra.mxu0 %v5135_v34 }
  0x9d   : > { %4697 = vmatpush3.bf16.msra.mxu1 %v5136_v35 }
 0x113   : > { %v619_v7 = vpop.xlane.xlu0 %618 }
 0x114   : > { %v623_v8 = vmul.f32 0.0078125, %v619_v7 }
 0x116   : > { %v5799_v9 = vsub.f32 %v607_v0, %v623_v8 }
 0x117   : > { %v621_v10 = vpop.xlane.xlu0 %620 }
 0x118   : > { %v624_v11 = vmul.f32 0.0078125, %v621_v10  ;;  %v627_v12 = vmul.f32 %v5799_v9, %v5799_v9 }
 0x11a   : > { %v5803_v13 = vsub.f32 %v608_v1, %v624_v11  ;;  %629 = vadd.xlane.f32.xlu1 %v627_v12 }
 0x11c   : > { %v628_v14 = vmul.f32 %v5803_v13, %v5803_v13 }
 0x11e   : > { %631 = vadd.xlane.f32.xlu1 %v628_v14 }
 0x1a7   : > { %v630_v36 = vpop.xlane.xlu1 %629 }
 0x1a8   : > { %v633_v37 = vmul.f32 0.0078125, %v630_v36 }
 0x1aa   : > { %v635_v38 = vadd.f32 1e-05, %v633_v37 }
 0x1ab   : > { %v632_v39 = vpop.xlane.xlu1 %631 }
 0x1ac   : > { %5289 = vrsqrt.f32 %v635_v38  ;;  %v634_v40 = vmul.f32 0.0078125, %v632_v39 }
 0x1ae   : > { %v636_v41 = vadd.f32 1e-05, %v634_v40 }
 0x1b0   : > { %5291 = vrsqrt.f32 %v636_v41 }
 0x1b6   : > { %v5290_v42 = vpop.eup %5289 }
 0x1b7   : > { %v639_v43 = vmul.f32 %v5290_v42, %v5799_v9 }
 0x1b9   : > { %v647_v47 = vmul.f32 %v4289_v44, %v639_v43 }
 0x1ba   : > { %v5292_v45 = vpop.eup %5291 }
 0x1bb   : > { %v640_v46 = vmul.f32 %v5292_v45, %v5803_v13  ;;  %v655_v50 = vadd.f32 %v4290_v48, %v647_v47 }
 0x1bd   : > { %v648_v49 = vmul.f32 %v4289_v44, %v640_v46 }
 0x1bf   : > { %v656_v51 = vadd.f32 %v4290_v48, %v648_v49 }
 0x1c1   : > { %v690_v52 = vpack.c.bf16 %v656_v51, %v655_v50 }
 0x1c3   : > { %868 = vmatmul.mubr.bf16.vlgmr.msra.gmra.mrb[0].mxu0 %v690_v52  ;;  %4699 = vmatmul.mubr.bf16.vlgmr.msra.gmra.mrb[0].mxu1 %v690_v52 }
 0x296   : > { %v869_v61 = vpop.f32.mrb[0].mxu0  ;;  %v912_v62 = vpop.f32.mrb[0].mxu1 }
 0x297   : > { %v5900_v0 = vadd.f32 %v869_v61, %v695_v59  ;;  %v871_v1 = vpop.f32.mrb[1].mxu0  ;;  %v4700_v2 = vpop.f32.mrb[1].mxu1  ;;  %v913_v6 = vadd.f32 %v912_v62, %v703_v60 }
 0x298   : > { %v873_v3 = vpop.f32.mrb[2].mxu0  ;;  %v915_v5 = vpop.f32.mrb[2].mxu1  ;;  %v872_v10 = vadd.f32 %v871_v1, %v699_v63 }
 0x299   : > { %v916_v7 = vadd.f32 %v915_v5, %v703_v60  ;;  %v875_v8 = vpop.f32.mrb[3].mxu0  ;;  %v4701_v9 = vpop.f32.mrb[3].mxu1  ;;  %1115 = vrot.lane.b32.xlu1 %v5900_v0, %s5534_s28  ;;  %4706 = vmatprep.mubr.msk.f32.mxu0 %vm919_vm1, %v5900_v0  ;;  %v5906_v11 = vadd.f32 %v873_v3, %v695_v59 }
 0x29a   : > { %v876_v12 = vadd.f32 %v875_v8, %v699_v63 }
 0x29b   : > { %v4880_v13 = vpack.c.bf16 %v916_v7, %v913_v6  ;;  %v5908_v14 = vpack.i.bf16 %v916_v7, %v913_v6 }
 0x29c   : > { %v5910_v15 = vpack.i.bf16 %v876_v12, %v872_v10  ;;  %v4874_v16 = vpack.c.bf16 %v876_v12, %v872_v10 }
 0x29d   : > { %4881 = vmatprep.subr.bf16.mxu1 %v4880_v13  ;;  %1117 = vrot.lane.b32.xlu1 %v5906_v11, %s5534_s28 }
 0x29e   : > { %4883 = vmatpush3.bf16.msra.mxu1 %v4880_v13  ;;  %5016 = vrot.lane.b32.xlu0 %v5910_v15, %s5534_s28 }
 0x29f   : > { %4876 = vmatprep.subr.msk.bf16.mxu0 %vm5914_vm2, %v4874_v16 }
 0x2a0   : > { %4879 = vmatpush3.bf16.xpose.msk.msra.mxu0 %vm5914_vm2, %v4874_v16 }
 0x2a7   : > { %4707 = vmatmul.mubr.msk.f32.vlgmr.msra.gmra.mrb[4].mxu0 %vm919_vm1, %v5906_v11 }
 0x30b   : > { %v1116_v18 = vpop.permute.xlu1 %1115 }
 0x30c   : > { %4720 = vmatprep.mubr.msk.f32.mxu0 %vm919_vm1, %v1116_v18 }
 0x30f   : > { %v1118_v23 = vpop.permute.xlu1 %1117 }
 0x310   : > { %v5017_v19 = vpop.permute.xlu0 %5016 }
 0x311   : > { %v5019_v20 = vunpack.i.h.bf16 %v5017_v19  ;;  %v5018_v21 = vunpack.i.l.bf16 %v5017_v19 }
 0x313   : > { %v4884_v22 = vpack.c.bf16 %v5019_v20, %v5018_v21 }
 0x315   : > { %4886 = vmatprep.subr.msk.bf16.mxu0 %vm5914_vm2, %v4884_v22 }
 0x316   : > { %4889 = vmatpush3.bf16.xpose.msk.msra.mxu0 %vm5914_vm2, %v4884_v22 }
 0x31d   : > { %4721 = vmatmul.mubr.msk.f32.vlgmr.msra.gmra.mrb[6].mxu0 %vm919_vm1, %v1118_v23 }
 0x37a   : > { %v4708_v26 = vpop.f32.mrb[4].mxu0 }
 0x37b   : > { %v1008_v28 = vmul.f32 0.17677669, %v4708_v26  ;;  %v998_v29 = vpop.f32.mrb[5].mxu0 }
 0x37c   : > { %v1007_v32 = vmul.f32 0.17677669, %v998_v29 }
 0x37d   : > { %v1010_v33 = vsel %vm5941_vm3, %v1008_v28, -1e+30 }
 0x37e   : > { %v1015_v34 = vsel %vm1011_vm4, %v1010_v33, -inf  ;;  %v1009_v35 = vsel %vm5947_vm5, %v1007_v32, -1e+30 }
 0x37f   : > { %1016 = vmax.xlane.f32.xlu0 %v1015_v34  ;;  %v1012_v36 = vsel %vm1011_vm4, %v1009_v35, -inf }
 0x380   : > { %1013 = vmax.xlane.f32.xlu1 %v1012_v36 }
 0x391   : > { %5021 = vrot.lane.b32.xlu1 %v5908_v14, %s5534_s28 }
 0x3f0   : > { %v4722_v37 = vpop.f32.mrb[6].mxu0 }
 0x3f1   : > { %v1197_v38 = vpop.f32.mrb[7].mxu0  ;;  %v1207_v39 = vmul.f32 0.17677669, %v4722_v37 }
 0x3f2   : > { %v1206_v40 = vmul.f32 0.17677669, %v1197_v38 }
 0x3f3   : > { %v1209_v43 = vsel %vm5941_vm3, %v1207_v39, -1e+30 }
 0x3f4   : > { %v1208_v41 = vsel %vm5947_vm5, %v1206_v40, -1e+30  ;;  %v1213_v44 = vsel %vm1011_vm4, %v1209_v43, -inf }
 0x3f5   : > { %v1210_v42 = vsel %vm1011_vm4, %v1208_v41, -inf }
 0x3f6   : > { %1211 = vmax.xlane.f32.xlu0 %v1210_v42 }
 0x3fa   : > { %1214 = vmax.xlane.f32.xlu0 %v1213_v44 }
 0x40c   : > { %v1017_v45 = vpop.xlane.xlu0 %1016 }
 0x40d   : > { %v1019_v46 = vsub.f32 %v1010_v33, %v1017_v45  ;;  %v1014_v47 = vpop.xlane.xlu1 %1013 }
 0x40e   : > { %v1018_v48 = vsub.f32 %v1009_v35, %v1014_v47 }
 0x40f   : > { %v1022_v49 = vmul.f32 1.442695, %v1019_v46 }
 0x410   : > { %v1020_v50 = vmul.f32 1.442695, %v1018_v48 }
 0x411   : > { %5293 = vpow2.f32 %v1022_v49  ;;  %v5022_v51 = vpop.permute.xlu1 %5021 }
 0x412   : > { %5295 = vpow2.f32 %v1020_v50  ;;  %v5024_v52 = vunpack.i.h.bf16 %v5022_v51  ;;  %v5023_v53 = vunpack.i.l.bf16 %v5022_v51 }
 0x414   : > { %v4890_v56 = vpack.c.bf16 %v5024_v52, %v5023_v53 }
 0x416   : > { %4891 = vmatprep.subr.bf16.mxu1 %v4890_v56 }
 0x41b   : > { %v5294_v59 = vpop.eup %5293 }
 0x41c   : > { %v5296_v60 = vpop.eup %5295  ;;  %v1027_v61 = vsel %vm1011_vm4, %v5294_v59, 0.0 }
 0x41d   : > { %1028 = vadd.xlane.f32.xlu0 %v1027_v61  ;;  %v1024_v62 = vsel %vm1011_vm4, %v5296_v60, 0.0 }
 0x41e   : > { %1025 = vadd.xlane.f32.xlu1 %v1024_v62 }
 0x42f   : > { %1321 = vrot.lane.b32.xlu1 %v5900_v0, %s5535_s21 }
 0x483   : > { %v1212_v63 = vpop.xlane.xlu0 %1211 }
 0x484   : > { %v1216_v1 = vsub.f32 %v1208_v41, %v1212_v63 }
 0x486   : > { %v1218_v2 = vmul.f32 1.442695, %v1216_v1 }
 0x487   : > { %v1215_v3 = vpop.xlane.xlu0 %1214 }
 0x488   : > { %5297 = vpow2.f32 %v1218_v2  ;;  %v1217_v5 = vsub.f32 %v1209_v43, %v1215_v3 }
 0x48a   : > { %v1220_v6 = vmul.f32 1.442695, %v1217_v5 }
 0x48c   : > { %5299 = vpow2.f32 %v1220_v6 }
 0x492   : > { %v5298_v7 = vpop.eup %5297 }
 0x493   : > { %v1222_v8 = vsel %vm1011_vm4, %v5298_v7, 0.0 }
 0x494   : > { %1223 = vadd.xlane.f32.xlu1 %v1222_v8 }
 0x496   : > { %v5300_v9 = vpop.eup %5299 }
 0x497   : > { %v1225_v10 = vsel %vm1011_vm4, %v5300_v9, 0.0 }
 0x498   : > { %1226 = vadd.xlane.f32.xlu0 %v1225_v10 }
 0x4a5   : > { %1323 = vrot.lane.b32.xlu1 %v5906_v11, %s5535_s21 }
 0x4aa   : > { %v1029_v12 = vpop.xlane.xlu0 %1028 }
 0x4ab   : > { %5301 = vrcp.f32 %v1029_v12  ;;  %v1026_v13 = vpop.xlane.xlu1 %1025 }
 0x4ac   : > { %5303 = vrcp.f32 %v1026_v13 }
 0x4ae   : > { %5026 = vrot.lane.b32.xlu0 %v5910_v15, %s5535_s21 }
 0x4af   : > { %v1322_v21 = vpop.permute.xlu1 %1321 }
 0x4b5   : > { %v5302_v16 = vpop.eup %5301 }
 0x4b6   : > { %v5304_v18 = vpop.eup %5303  ;;  %v1033_v20 = vmul.f32 %v5302_v16, %v5294_v59 }
 0x4b7   : > { %v1032_v19 = vmul.f32 %v5304_v18, %v5296_v60 }
 0x4b9   : > { %4713 = vmatprep.mubr.msk.f32.mxu1 %vm1011_vm4, %v1032_v19 }
 0x4ba   : > { %4714 = vmatmul.mubr.msk.f32.vlgmr.msra.gmra.mrb[4].mxu1 %vm1011_vm4, %v1033_v20 }
 0x4bb   : > { %4893 = vmatpush3.bf16.msra.mxu1 %v4890_v56 }
 0x521   : > { %v1224_v22 = vpop.xlane.xlu1 %1223 }
 0x522   : > { %5305 = vrcp.f32 %v1224_v22 }
 0x525   : > { %v1227_v23 = vpop.xlane.xlu0 %1226  ;;  %v1324_v37 = vpop.permute.xlu1 %1323 }
 0x526   : > { %5307 = vrcp.f32 %v1227_v23 }
 0x529   : > { %v5027_v26 = vpop.permute.xlu0 %5026 }
 0x52a   : > { %v5029_v28 = vunpack.i.h.bf16 %v5027_v26  ;;  %v5028_v29 = vunpack.i.l.bf16 %v5027_v26 }
 0x52c   : > { %v5306_v32 = vpop.eup %5305  ;;  %v4894_v33 = vpack.c.bf16 %v5029_v28, %v5028_v29 }
 0x52d   : > { %v1230_v34 = vmul.f32 %v5306_v32, %v5298_v7 }
 0x52e   : > { %4896 = vmatprep.subr.msk.bf16.mxu1 %vm5914_vm2, %v4894_v33 }
 0x52f   : > { %4727 = vmatprep.mubr.msk.f32.mxu1 %vm1011_vm4, %v1230_v34 }
 0x530   : > { %v5308_v35 = vpop.eup %5307 }
 0x531   : > { %v1231_v36 = vmul.f32 %v5308_v35, %v5300_v9 }
 0x533   : > { %4728 = vmatmul.mubr.msk.f32.vlgmr.msra.gmra.mrb[6].mxu1 %vm1011_vm4, %v1231_v36 }
 0x534   : > { %4899 = vmatpush3.bf16.xpose.msk.msra.mxu1 %vm5914_vm2, %v4894_v33  ;;  %4734 = vmatprep.mubr.msk.f32.mxu1 %vm919_vm1, %v1322_v21 }
 0x53b   : > { %4735 = vmatmul.mubr.msk.f32.vlgmr.msra.gmra.mrb[8].mxu1 %vm919_vm1, %v1324_v37 }
 0x58d   : > { %v5985_v38 = vpop.f32.mrb[4].mxu1 }
 0x58e   : > { %v5987_v39 = vpop.f32.mrb[5].mxu1 }
 0x606   : > { %v5989_v40 = vpop.f32.mrb[6].mxu1 }
 0x607   : > { %v5991_v41 = vpop.f32.mrb[7].mxu1 }
 0x608   : > { %v5045_v42 = vpack.i.bf16 %v5989_v40, %v5991_v41  ;;  %v5139_v40 = vld [vmem:[#allocation4 + $0x10] sm:$0xff]   ;;  %v5140_v41 = vld [vmem:[#allocation4 + $0x18] sm:$0xff]  }
 0x60e   : > { %v4736_v43 = vpop.f32.mrb[8].mxu1 }
 0x60f   : > { %v1413_v44 = vmul.f32 0.17677669, %v4736_v43  ;;  %v1403_v45 = vpop.f32.mrb[9].mxu1 }
 0x610   : > { %v1412_v46 = vmul.f32 0.17677669, %v1403_v45 }
 0x611   : > { %v1415_v47 = vsel %vm5941_vm3, %v1413_v44, -1e+30 }
 0x612   : > { %v1419_v48 = vsel %vm1011_vm4, %v1415_v47, -inf  ;;  %v1414_v49 = vsel %vm5947_vm5, %v1412_v46, -1e+30 }
 0x613   : > { %1420 = vmax.xlane.f32.xlu0 %v1419_v48  ;;  %v1416_v50 = vsel %vm1011_vm4, %v1414_v49, -inf }
 0x614   : > { %1417 = vmax.xlane.f32.xlu1 %v1416_v50 }
 0x625   : > { %5031 = vrot.lane.b32.xlu1 %v5908_v14, %s5535_s21 }
 0x629   : > { %1525 = vrot.lane.b32.xlu1 %v5900_v0, %s5536_s23 }
 0x62d   : > { %1527 = vrot.lane.b32.xlu1 %v5906_v11, %s5536_s23 }
 0x6a0   : > { %v1421_v51 = vpop.xlane.xlu0 %1420 }
 0x6a1   : > { %v1423_v52 = vsub.f32 %v1415_v47, %v1421_v51  ;;  %v1418_v53 = vpop.xlane.xlu1 %1417 }
 0x6a2   : > { %v1422_v56 = vsub.f32 %v1414_v49, %v1418_v53 }
 0x6a3   : > { %v1426_v59 = vmul.f32 1.442695, %v1423_v52 }
 0x6a4   : > { %v1424_v60 = vmul.f32 1.442695, %v1422_v56 }
 0x6a5   : > { %5309 = vpow2.f32 %v1426_v59  ;;  %v5032_v61 = vpop.permute.xlu1 %5031 }
 0x6a6   : > { %v5034_v62 = vunpack.i.h.bf16 %v5032_v61  ;;  %v5033_v63 = vunpack.i.l.bf16 %v5032_v61  ;;  %5311 = vpow2.f32 %v1424_v60 }
 0x6a8   : > { %v4900_v1 = vpack.c.bf16 %v5034_v62, %v5033_v63 }
 0x6a9   : > { %v1526_v19 = vpop.permute.xlu1 %1525 }
 0x6aa   : > { %4901 = vmatprep.subr.bf16.mxu0 %v4900_v1 }
 0x6ab   : > { %4903 = vmatpush3.bf16.msra.mxu0 %v4900_v1  ;;  %v5137_v1 = vld [vmem:[#allocation4] sm:$0xff]  }
 0x6af   : > { %v5310_v2 = vpop.eup %5309 }
 0x6b0   : > { %v1431_v0 = vsel %vm1011_vm4, %v5310_v2, 0.0  ;;  %v5312_v3 = vpop.eup %5311 }
 0x6b1   : > { %1432 = vadd.xlane.f32.xlu0 %v1431_v0  ;;  %v1428_v11 = vsel %vm1011_vm4, %v5312_v3, 0.0  ;;  %v5142_v0 = vld [vmem:[#allocation4 + $0x28] sm:$0xff]  }
 0x6b5   : > { %1429 = vadd.xlane.f32.xlu0 %v1428_v11  ;;  %v5144_v11 = vld [vmem:[#allocation4 + $0x38] sm:$0xff]  }
 0x6cb   : > { %5036 = vrot.lane.b32.xlu0 %v5910_v15, %s5536_s23  ;;  %v1528_v15 = vpop.permute.xlu1 %1527 }
 0x73e   : > { %v1433_v5 = vpop.xlane.xlu0 %1432 }
 0x73f   : > { %5313 = vrcp.f32 %v1433_v5 }
 0x742   : > { %v1430_v6 = vpop.xlane.xlu0 %1429 }
 0x743   : > { %5315 = vrcp.f32 %v1430_v6 }
 0x746   : > { %v5037_v7 = vpop.permute.xlu0 %5036 }
 0x747   : > { %v5039_v8 = vunpack.i.h.bf16 %v5037_v7  ;;  %v5038_v9 = vunpack.i.l.bf16 %v5037_v7 }
 0x749   : > { %v4904_v10 = vpack.c.bf16 %v5039_v8, %v5038_v9  ;;  %v5314_v12 = vpop.eup %5313 }
 0x74a   : > { %v1437_v18 = vmul.f32 %v5314_v12, %v5310_v2  ;;  %v5138_v2 = vld [vmem:[#allocation4 + $0x8] sm:$0xff]  }
 0x74b   : > { %4906 = vmatprep.subr.msk.bf16.mxu0 %vm5914_vm2, %v4904_v10 }
 0x74d   : > { %v5316_v13 = vpop.eup %5315 }
 0x74e   : > { %v1436_v16 = vmul.f32 %v5316_v13, %v5312_v3  ;;  %v5143_v3 = vld [vmem:[#allocation4 + $0x30] sm:$0xff]  }
 0x750   : > { %4741 = vmatprep.mubr.msk.f32.mxu0 %vm1011_vm4, %v1436_v16 }
 0x751   : > { %4742 = vmatmul.mubr.msk.f32.vlgmr.msra.gmra.mrb[8].mxu0 %vm1011_vm4, %v1437_v18 }
 0x752   : > { %4909 = vmatpush3.bf16.xpose.msk.msra.mxu0 %vm5914_vm2, %v4904_v10  ;;  %4748 = vmatprep.mubr.msk.f32.mxu0 %vm919_vm1, %v1526_v19 }
 0x759   : > { %4749 = vmatmul.mubr.msk.f32.vlgmr.msra.gmra.mrb[10].mxu0 %vm919_vm1, %v1528_v15 }
 0x75a   : > { %2057 = vmatprep.mubr.bf16.mxu0 %v5532_v30 }
 0x824   : > { %v4743_v20 = vpop.f32.mrb[8].mxu0 }
 0x825   : > { %v1516_v21 = vpop.f32.mrb[9].mxu0 }
 0x826   : > { %v5050_v22 = vpack.i.bf16 %v4743_v20, %v1516_v21 }
 0x82c   : > { %v4750_v23 = vpop.f32.mrb[10].mxu0 }
 0x82d   : > { %v1617_v26 = vmul.f32 0.17677669, %v4750_v23  ;;  %v1607_v28 = vpop.f32.mrb[11].mxu0 }
 0x82e   : > { %v1616_v29 = vmul.f32 0.17677669, %v1607_v28 }
 0x82f   : > { %v1619_v32 = vsel %vm5941_vm3, %v1617_v26, -1e+30 }
 0x830   : > { %v1623_v33 = vsel %vm1011_vm4, %v1619_v32, -inf  ;;  %v1618_v34 = vsel %vm5947_vm5, %v1616_v29, -1e+30 }
 0x831   : > { %1624 = vmax.xlane.f32.xlu0 %v1623_v33  ;;  %v1620_v35 = vsel %vm1011_vm4, %v1618_v34, -inf }
 0x832   : > { %1621 = vmax.xlane.f32.xlu1 %v1620_v35  ;;  %v5389_v35 = vld [vmem:[%s5781_s26] sm:$0xff] }
 0x843   : > { %5041 = vrot.lane.b32.xlu1 %v5908_v14, %s5536_s23 }
 0x847   : > { %5051 = vrot.lane.b32.xlu1 %v5050_v22, %s5535_s21 }
 0x8be   : > { %v1625_v36 = vpop.xlane.xlu0 %1624 }
 0x8bf   : > { %v1627_v37 = vsub.f32 %v1619_v32, %v1625_v36  ;;  %v1622_v43 = vpop.xlane.xlu1 %1621 }
 0x8c0   : > { %v1626_v44 = vsub.f32 %v1618_v34, %v1622_v43 }
 0x8c1   : > { %v1630_v45 = vmul.f32 1.442695, %v1627_v37 }
 0x8c2   : > { %v1628_v46 = vmul.f32 1.442695, %v1626_v44  ;;  %v5390_v44 = vld [vmem:[%s5781_s26 + $0x8] sm:$0xff] }
 0x8c3   : > { %v5042_v47 = vpop.permute.xlu1 %5041 }
 0x8c4   : > { %5317 = vpow2.f32 %v1628_v46  ;;  %v5044_v48 = vunpack.i.h.bf16 %v5042_v47  ;;  %v5043_v49 = vunpack.i.l.bf16 %v5042_v47  ;;  %v5145_v46 = vld [vmem:[#allocation6] ss:$8 sps:$4 sm:$0xff]   ;;  %v5147_v47 = vld [vmem:[#allocation6 + $0x4] ss:$8 sps:$4 sm:$0xff]  }
 0x8c5   : > { %5319 = vpow2.f32 %v1630_v45  ;;  %2025 = vmatprep.subr.bf16.mxu0 %v5147_v47  ;;  %v5180_v47 = vld [vmem:[#allocation8 + $0x28] sm:$0xff]  }
 0x8c6   : > { %v4910_v50 = vpack.c.bf16 %v5044_v48, %v5043_v49  ;;  %v5150_v48 = vld [vmem:[#allocation6 + $0x14] ss:$8 sps:$4 sm:$0xff]   ;;  %2026 = vmatpush1.bf16.msra.mxu0 %v5145_v46  ;;  %v5148_v49 = vld [vmem:[#allocation6 + $0x10] ss:$8 sps:$4 sm:$0xff]   ;;  %v5179_v46 = vld [vmem:[#allocation8 + $0x68] sm:$0xff]  }
 0x8c7   : > { %v5052_v12 = vpop.permute.xlu1 %5051  ;;  %2027 = vmatprep.subr.bf16.mxu0 %v5150_v48  ;;  %v5181_v48 = vld [vmem:[#allocation8 + $0x70] sm:$0xff]  }
 0x8c8   : > { %4911 = vmatprep.subr.bf16.mxu1 %v4910_v50  ;;  %v5054_v18 = vunpack.i.h.bf16 %v5052_v12  ;;  %v5053_v19 = vunpack.i.l.bf16 %v5052_v12 }
 0x8c9   : > { %4913 = vmatpush3.bf16.msra.mxu1 %v4910_v50 }
 0x8ca   : > { %4758 = vmatprep.subr.bf16.mxu1 %v5531_v4  ;;  %2028 = vmatpush1.bf16.msra.mxu0 %v5148_v49  ;;  %v5182_v49 = vld [vmem:[#allocation8 + $0x30] sm:$0xff]  }
 0x8ce   : > { %v5318_v51 = vpop.eup %5317 }
 0x8cf   : > { %v1632_v14 = vsel %vm1011_vm4, %v5318_v51, 0.0  ;;  %v5320_v52 = vpop.eup %5319 }
 0x8d0   : > { %1633 = vadd.xlane.f32.xlu0 %v1632_v14  ;;  %v1635_v53 = vsel %vm1011_vm4, %v5320_v52, 0.0 }
 0x8d4   : > { %1636 = vadd.xlane.f32.xlu0 %v1635_v53 }
 0x8ea   : > { %5046 = vrot.lane.b32.xlu0 %v5045_v42, %s5536_s23  ;;  %v5141_v42 = vld [vmem:[#allocation4 + $0x20] sm:$0xff]  }
 0x95d   : > { %v1634_v56 = vpop.xlane.xlu0 %1633 }
 0x95e   : > { %5321 = vrcp.f32 %v1634_v56 }
 0x961   : > { %v1637_v59 = vpop.xlane.xlu0 %1636 }
 0x962   : > { %5323 = vrcp.f32 %v1637_v59 }
 0x965   : > { %v5047_v8 = vpop.permute.xlu0 %5046 }
 0x966   : > { %v5049_v9 = vunpack.i.h.bf16 %v5047_v8  ;;  %v5048_v10 = vunpack.i.l.bf16 %v5047_v8 }
 0x968   : > { %v5322_v60 = vpop.eup %5321  ;;  %v1754_v13 = vsel %vm919_vm1, %v5985_v38, %v5049_v9  ;;  %v1753_v16 = vsel %vm919_vm1, %v5987_v39, %v5048_v10  ;;  %v4339_v39 = vld [vmem:[%s6376_s7] ss:$0 sm:$0xff] }
 0x969   : > { %v1640_v61 = vmul.f32 %v5322_v60, %v5318_v51  ;;  %v1756_v22 = vsel %vm1755_vm6, %v1753_v16, %v5053_v19  ;;  %v1757_v23 = vsel %vm1755_vm6, %v1754_v13, %v5054_v18  ;;  %v4348_v18 = vld [vmem:[%s6377_s8] ss:$0 sm:$0xff] }
 0x96b   : > { %4755 = vmatprep.mubr.msk.f32.mxu1 %vm1011_vm4, %v1640_v61  ;;  %v5153_v61 = vld [vmem:[#allocation6 + $0x24] ss:$8 sps:$4 sm:$0xff]  }
 0x96c   : > { %v5324_v62 = vpop.eup %5323  ;;  %2029 = vmatprep.subr.bf16.mxu0 %v5153_v61 }
 0x96d   : > { %v1641_v63 = vmul.f32 %v5324_v62, %v5320_v52  ;;  %v5151_v62 = vld [vmem:[#allocation6 + $0x20] ss:$8 sps:$4 sm:$0xff]  }
 0x96e   : > { %2030 = vmatpush1.bf16.msra.mxu0 %v5151_v62 }
 0x96f   : > { %4756 = vmatmul.mubr.msk.f32.vlgmr.msra.gmra.mrb[10].mxu1 %vm1011_vm4, %v1641_v63  ;;  %v5156_v63 = vld [vmem:[#allocation6 + $0x34] ss:$8 sps:$4 sm:$0xff]  }
 0x970   : > { %4774 = vmatprep.mubr.msk.bf16.mxu1 %vm5533_vm0, %v5531_v4  ;;  %4759 = vmatpush3.bf16.msra.mxu1 %v5137_v1  ;;  %v5154_v1 = vld [vmem:[#allocation6 + $0x30] ss:$8 sps:$4 sm:$0xff]  }
 0x971   : > { %4760 = vmatprep.subr.bf16.mxu1 %v5531_v4  ;;  %2031 = vmatprep.subr.bf16.mxu0 %v5156_v63 }
 0x972   : > { %2032 = vmatpush1.bf16.msra.mxu0 %v5154_v1 }
 0x974   : > { %4761 = vmatpush3.bf16.msra.mxu1 %v5138_v2  ;;  %v5159_v2 = vld [vmem:[#allocation6 + $0x44] ss:$8 sps:$4 sm:$0xff]  }
 0x975   : > { %4762 = vmatprep.subr.bf16.mxu1 %v5531_v4  ;;  %2033 = vmatprep.subr.bf16.mxu0 %v5159_v2 }
 0x978   : > { %4763 = vmatpush3.bf16.msra.mxu1 %v5139_v40  ;;  %v5157_v40 = vld [vmem:[#allocation6 + $0x40] ss:$8 sps:$4 sm:$0xff]  }
 0x979   : > { %4764 = vmatprep.subr.bf16.mxu1 %v5531_v4  ;;  %2034 = vmatpush1.bf16.msra.mxu0 %v5157_v40 }
 0x97c   : > { %4765 = vmatpush3.bf16.msra.mxu1 %v5140_v41  ;;  %v5162_v41 = vld [vmem:[#allocation6 + $0x54] ss:$8 sps:$4 sm:$0xff]  }
 0x97d   : > { %4766 = vmatprep.subr.bf16.mxu1 %v5531_v4  ;;  %2035 = vmatprep.subr.bf16.mxu0 %v5162_v41 }
 0x980   : > { %4767 = vmatpush3.bf16.msra.mxu1 %v5141_v42  ;;  %v5160_v42 = vld [vmem:[#allocation6 + $0x50] ss:$8 sps:$4 sm:$0xff]  }
 0x981   : > { %4768 = vmatprep.subr.bf16.mxu1 %v5531_v4  ;;  %2036 = vmatpush1.bf16.msra.mxu0 %v5160_v42 }
 0x984   : > { %4769 = vmatpush3.bf16.msra.mxu1 %v5142_v0  ;;  %v5165_v0 = vld [vmem:[#allocation6 + $0x64] ss:$8 sps:$4 sm:$0xff]  }
 0x985   : > { %4770 = vmatprep.subr.bf16.mxu1 %v5531_v4  ;;  %2037 = vmatprep.subr.bf16.mxu0 %v5165_v0 }
 0x988   : > { %4771 = vmatpush3.bf16.msra.mxu1 %v5143_v3  ;;  %v5163_v3 = vld [vmem:[#allocation6 + $0x60] ss:$8 sps:$4 sm:$0xff]  }
 0x989   : > { %4772 = vmatprep.subr.bf16.mxu1 %v5531_v4  ;;  %2038 = vmatpush1.bf16.msra.mxu0 %v5163_v3 }
 0x98c   : > { %4773 = vmatpush3.bf16.msra.mxu1 %v5144_v11  ;;  %v5168_v11 = vld [vmem:[#allocation6 + $0x74] ss:$8 sps:$4 sm:$0xff]  }
 0x98d   : > { %2039 = vmatprep.subr.bf16.mxu0 %v5168_v11 }
 0xa42   : > { %v4757_v5 = vpop.f32.mrb[10].mxu1 }
 0xa43   : > { %v1720_v6 = vpop.f32.mrb[11].mxu1 }
 0xa44   : > { %v5055_v7 = vpack.i.bf16 %v4757_v5, %v1720_v6  ;;  %v5166_v5 = vld [vmem:[#allocation6 + $0x70] ss:$8 sps:$4 sm:$0xff]  }
 0xa45   : > { %2040 = vmatpush1.bf16.msra.mxu0 %v5166_v5 }
 0xa46   : > { %5056 = vrot.lane.b32.xlu1 %v5055_v7, %s5534_s28 }
 0xab8   : > { %v5057_v15 = vpop.permute.xlu1 %5056 }
 0xab9   : > { %v5059_v20 = vunpack.i.h.bf16 %v5057_v15  ;;  %v5058_v21 = vunpack.i.l.bf16 %v5057_v15 }
 0xabb   : > { %v1760_v26 = vsel %vm1758_vm7, %v1757_v23, %v5059_v20  ;;  %v1759_v38 = vsel %vm1758_vm7, %v1756_v22, %v5058_v21  ;;  %v4349_v21 = vld [vmem:[%s6378_s9] ss:$0 sm:$0xff] }
 0xabc   : > { %v1778_v28 = vpack.c.bf16 %v1760_v26, %v1759_v38 }
 0xabe   : > { %4775 = vmatmul.mubr.bf16.vlgmr.msra.gmra.mrb[12].mxu1 %v1778_v28  ;;  %v5169_v28 = vld [vmem:[#allocation8 + $0x40] sm:$0xff]  }
 0xabf   : > { %4588 = vmatprep.subr.bf16.mxu1 %v5169_v28 }
 0xb91   : > { %v1867_v29 = vpop.f32.mrb[12].mxu1 }
 0xb92   : > { %v1868_v32 = vadd.f32 %v4339_v39, %v1867_v29  ;;  %v4776_v33 = vpop.f32.mrb[13].mxu1  ;;  %v5171_v29 = vld [vmem:[#allocation8 + $0x48] sm:$0xff]  }
 0xb93   : > { %v1870_v34 = vpop.f32.mrb[14].mxu1  ;;  %v5173_v33 = vld [vmem:[#allocation8 + $0x50] sm:$0xff]  }
 0xb94   : > { %v6060_v36 = vadd.f32 %v5389_v35, %v1868_v32  ;;  %v1871_v37 = vadd.f32 %v4339_v39, %v1870_v34  ;;  %v4777_v43 = vpop.f32.mrb[15].mxu1  ;;  %v5170_v39 = vld [vmem:[#allocation8] sm:$0xff]   ;;  %v5172_v32 = vld [vmem:[#allocation8 + $0x8] sm:$0xff]   ;;  %v5174_v34 = vld [vmem:[#allocation8 + $0x10] sm:$0xff]  }
 0xb95   : > { %4589 = vmatpush3.bf16.msra.mxu1 %v5170_v39  ;;  %v5175_v35 = vld [vmem:[#allocation8 + $0x58] sm:$0xff]   ;;  %v5177_v43 = vld [vmem:[#allocation8 + $0x60] sm:$0xff]  }
 0xb96   : > { %v6063_v45 = vadd.f32 %v5390_v44, %v1871_v37  ;;  %1878 = vadd.xlane.f32.xlu1 %v6060_v36  ;;  %4590 = vmatprep.subr.bf16.mxu1 %v5171_v29  ;;  %v5176_v37 = vld [vmem:[#allocation8 + $0x18] sm:$0xff]   ;;  %v5178_v44 = vld [vmem:[#allocation8 + $0x20] sm:$0xff]  }
 0xb98   : > { %1880 = vadd.xlane.f32.xlu0 %v6063_v45 }
 0xb99   : > { %4591 = vmatpush3.bf16.msra.mxu1 %v5172_v32 }
 0xb9a   : > { %4592 = vmatprep.subr.bf16.mxu1 %v5173_v33 }
 0xb9d   : > { %4593 = vmatpush3.bf16.msra.mxu1 %v5174_v34 }
 0xb9e   : > { %4594 = vmatprep.subr.bf16.mxu1 %v5175_v35 }
 0xba1   : > { %4595 = vmatpush3.bf16.msra.mxu1 %v5176_v37 }
 0xba2   : > { %4596 = vmatprep.subr.bf16.mxu1 %v5177_v43 }
 0xba5   : > { %4597 = vmatpush3.bf16.msra.mxu1 %v5178_v44 }
 0xba6   : > { %4598 = vmatprep.subr.bf16.mxu1 %v5179_v46 }
 0xba9   : > { %4599 = vmatpush3.bf16.msra.mxu1 %v5180_v47 }
 0xbaa   : > { %4600 = vmatprep.subr.bf16.mxu1 %v5181_v48 }
 0xbad   : > { %4601 = vmatpush3.bf16.msra.mxu1 %v5182_v49 }
 0xc23   : > { %v1879_v50 = vpop.xlane.xlu1 %1878 }
 0xc24   : > { %v1882_v51 = vmul.f32 0.0078125, %v1879_v50  ;;  %v5183_v50 = vld [vmem:[#allocation8 + $0x78] sm:$0xff]  }
 0xc25   : > { %v1881_v14 = vpop.xlane.xlu0 %1880  ;;  %4602 = vmatprep.subr.bf16.mxu1 %v5183_v50 }
 0xc26   : > { %v1884_v52 = vsub.f32 %v6060_v36, %v1882_v51  ;;  %v1883_v53 = vmul.f32 0.0078125, %v1881_v14  ;;  %v5184_v51 = vld [vmem:[#allocation8 + $0x38] sm:$0xff]   ;;  %v1932_v14 = vld [vmem:[%s6380_s11] sm:$0x3] }
 0xc27   : > { %4603 = vmatpush3.bf16.msra.mxu1 %v5184_v51  ;;  %v4366_v51 = vld [vmem:[%s6382_s13] ss:$0 sm:$0xff] }
 0xc28   : > { %v1885_v56 = vsub.f32 %v6063_v45, %v1883_v53  ;;  %v1886_v59 = vmul.f32 %v1884_v52, %v1884_v52  ;;  %4778 = vmatprep.subr.bf16.mxu1 %v5531_v4  ;;  %v1942_v53 = vrot.slane %v1932_v14, %v5894_v58 }
 0xc2a   : > { %1888 = vadd.xlane.f32.xlu0 %v1886_v59  ;;  %v1887_v60 = vmul.f32 %v1885_v56, %v1885_v56 }
 0xc2e   : > { %1890 = vadd.xlane.f32.xlu0 %v1887_v60 }
 0xcb7   : > { %v1889_v6 = vpop.xlane.xlu0 %1888 }
 0xcb8   : > { %v1892_v7 = vmul.f32 0.0078125, %v1889_v6 }
 0xcba   : > { %v1894_v8 = vadd.f32 1e-05, %v1892_v7 }
 0xcbb   : > { %v1891_v9 = vpop.xlane.xlu0 %1890 }
 0xcbc   : > { %5325 = vrsqrt.f32 %v1894_v8  ;;  %v1893_v10 = vmul.f32 0.0078125, %v1891_v9 }
 0xcbe   : > { %v1895_v12 = vadd.f32 1e-05, %v1893_v10 }
 0xcc0   : > { %5327 = vrsqrt.f32 %v1895_v12 }
 0xcc6   : > { %v5326_v13 = vpop.eup %5325 }
 0xcc7   : > { %v1898_v16 = vmul.f32 %v5326_v13, %v1884_v52  ;;  %v1938_v52 = vrot.slane %v1932_v14, %v5887_v55 }
 0xcc9   : > { %v1906_v20 = vmul.f32 %v4348_v18, %v1898_v16 }
 0xcca   : > { %v5328_v19 = vpop.eup %5327 }
 0xccb   : > { %v1899_v15 = vmul.f32 %v5328_v19, %v1885_v56  ;;  %v1914_v23 = vadd.f32 %v4349_v21, %v1906_v20 }
 0xccd   : > { %v1907_v22 = vmul.f32 %v4348_v18, %v1899_v15 }
 0xccf   : > { %v1915_v26 = vadd.f32 %v4349_v21, %v1907_v22 }
 0xcd1   : > { %v1933_v38 = vpack.c.bf16 %v1915_v26, %v1914_v23 }
 0xcd3   : > { %2058 = vmatmul.mubr.bf16.vlgmr.msra.gmra.mrb[12].mxu0 %v1933_v38 }
 0xcd4   : > { %2538 = vmatprep.mubr.bf16.mxu0 %v5532_v30 }
 0xda6   : > { %v2059_v56 = vpop.f32.mrb[12].mxu0 }
 0xda7   : > { %v2060_v59 = vadd.f32 %v2059_v56, %v1938_v52  ;;  %v2061_v60 = vpop.f32.mrb[13].mxu0 }
 0xda8   : > { %v2062_v61 = vadd.f32 %v2061_v60, %v1942_v53  ;;  %v2063_v62 = vpop.f32.mrb[14].mxu0 }
 0xda9   : > { %v2068_v63 = vmul.f32 %v2060_v59, %v2060_v59  ;;  %v2064_v1 = vadd.f32 %v2063_v62, %v1938_v52  ;;  %v2065_v2 = vpop.f32.mrb[15].mxu0 }
 0xdaa   : > { %v2069_v40 = vmul.f32 %v2062_v61, %v2062_v61  ;;  %v2066_v41 = vadd.f32 %v2065_v2, %v1942_v53  ;;  %v5187_v2 = vld [vmem:[%s6373_s4 + $0xc4] ss:$12 sps:$4 sm:$0xff]  }
 0xdab   : > { %v2072_v42 = vmul.f32 %v2068_v63, %v2060_v59  ;;  %v2070_v0 = vmul.f32 %v2064_v1, %v2064_v1  ;;  %2506 = vmatprep.subr.bf16.mxu0 %v5187_v2 }
 0xdac   : > { %v2073_v3 = vmul.f32 %v2069_v40, %v2062_v61  ;;  %v2071_v11 = vmul.f32 %v2066_v41, %v2066_v41  ;;  %v5191_v40 = vld [vmem:[%s6373_s4 + $0xdc] ss:$12 sps:$4 sm:$0xff]  }
 0xdad   : > { %v2076_v5 = vmul.f32 0.044715, %v2072_v42  ;;  %v2074_v6 = vmul.f32 %v2070_v0, %v2064_v1 }
 0xdae   : > { %v2077_v7 = vmul.f32 0.044715, %v2073_v3  ;;  %v2075_v8 = vmul.f32 %v2071_v11, %v2066_v41 }
 0xdaf   : > { %v2080_v9 = vadd.f32 %v2076_v5, %v2060_v59  ;;  %v2078_v10 = vmul.f32 0.044715, %v2074_v6 }
 0xdb0   : > { %v2081_v12 = vadd.f32 %v2077_v7, %v2062_v61  ;;  %v2079_v13 = vmul.f32 0.044715, %v2075_v8 }
 0xdb1   : > { %v2084_v16 = vmul.f32 0.7978846, %v2080_v9  ;;  %v2082_v18 = vadd.f32 %v2078_v10, %v2064_v1  ;;  %v5195_v9 = vld [vmem:[%s6373_s4 + $0xf4] ss:$12 sps:$4 sm:$0xff]   ;;  %v5193_v10 = vld [vmem:[%s6373_s4 + $0xf0] ss:$12 sps:$4 sm:$0xff]  }
 0xdb2   : > { %v2085_v19 = vmul.f32 0.7978846, %v2081_v12  ;;  %v2083_v15 = vadd.f32 %v2079_v13, %v2066_v41  ;;  %v5196_v12 = vld [vmem:[%s6373_s4 + $0xf8] ss:$12 sps:$4 sm:$0xff]  }
 0xdb3   : > { %5329 = vtanh.f32 %v2084_v16  ;;  %v2086_v20 = vmul.f32 0.7978846, %v2082_v18  ;;  %v5199_v13 = vld [vmem:[%s6373_s4 + $0x10c] ss:$12 sps:$4 sm:$0xff]   ;;  %v5197_v16 = vld [vmem:[%s6373_s4 + $0x108] ss:$12 sps:$4 sm:$0xff]  }
 0xdb4   : > { %5331 = vtanh.f32 %v2085_v19  ;;  %v2087_v21 = vmul.f32 0.7978846, %v2083_v15  ;;  %v5200_v18 = vld [vmem:[%s6373_s4 + $0x110] ss:$12 sps:$4 sm:$0xff]   ;;  %v5201_v15 = vld [vmem:[%s6373_s4 + $0x120] ss:$12 sps:$4 sm:$0xff]  }
 0xdb5   : > { %5333 = vtanh.f32 %v2086_v20  ;;  %v5203_v19 = vld [vmem:[%s6373_s4 + $0x124] ss:$12 sps:$4 sm:$0xff]   ;;  %v5204_v20 = vld [vmem:[%s6373_s4 + $0x128] ss:$12 sps:$4 sm:$0xff]  }
 0xdb6   : > { %5335 = vtanh.f32 %v2087_v21  ;;  %v5207_v21 = vld [vmem:[%s6373_s4 + $0x13c] ss:$12 sps:$4 sm:$0xff]  }
 0xdbd   : > { %v5330_v22 = vpop.eup %5329 }
 0xdbe   : > { %v5332_v23 = vpop.eup %5331  ;;  %v2092_v26 = vadd.f32 1.0, %v5330_v22  ;;  %v5205_v22 = vld [vmem:[%s6373_s4 + $0x138] ss:$12 sps:$4 sm:$0xff]  }
 0xdbf   : > { %v5334_v38 = vpop.eup %5333  ;;  %v2093_v28 = vadd.f32 1.0, %v5332_v23  ;;  %v5208_v23 = vld [vmem:[%s6373_s4 + $0x140] ss:$12 sps:$4 sm:$0xff]  }
 0xdc0   : > { %v5336_v39 = vpop.eup %5335  ;;  %v2096_v29 = vmul.f32 0.5, %v2092_v26  ;;  %v2094_v32 = vadd.f32 1.0, %v5334_v38  ;;  %v5211_v26 = vld [vmem:[%s6373_s4 + $0x154] ss:$12 sps:$4 sm:$0xff]   ;;  %v5209_v38 = vld [vmem:[%s6373_s4 + $0x150] ss:$12 sps:$4 sm:$0xff]  }
 0xdc1   : > { %v2095_v33 = vadd.f32 1.0, %v5336_v39  ;;  %v2097_v34 = vmul.f32 0.5, %v2093_v28  ;;  %v5212_v28 = vld [vmem:[%s6373_s4 + $0x158] ss:$12 sps:$4 sm:$0xff]  }
 0xdc2   : > { %v2098_v35 = vmul.f32 0.5, %v2094_v32  ;;  %v2100_v43 = vmul.f32 %v2096_v29, %v2060_v59  ;;  %v5215_v39 = vld [vmem:[%s6373_s4 + $0x16c] ss:$12 sps:$4 sm:$0xff]   ;;  %v5213_v29 = vld [vmem:[%s6373_s4 + $0x168] ss:$12 sps:$4 sm:$0xff]  }
 0xdc3   : > { %v2099_v37 = vmul.f32 0.5, %v2095_v33  ;;  %v2101_v46 = vmul.f32 %v2097_v34, %v2062_v61  ;;  %v5216_v32 = vld [vmem:[%s6373_s4 + $0x170] ss:$12 sps:$4 sm:$0xff]  }
 0xdc4   : > { %v2102_v44 = vmul.f32 %v2098_v35, %v2064_v1  ;;  %v5185_v1 = vld [vmem:[%s6373_s4 + $0xc0] ss:$12 sps:$4 sm:$0xff]  }
 0xdc5   : > { %v2103_v47 = vmul.f32 %v2099_v37, %v2066_v41  ;;  %2507 = vmatpush1.bf16.msra.mxu0 %v5185_v1  ;;  %v5189_v41 = vld [vmem:[%s6373_s4 + $0xd8] ss:$12 sps:$4 sm:$0xff]  }
 0xdc6   : > { %v2137_v48 = vpack.c.bf16 %v2102_v44, %v2100_v43  ;;  %2508 = vmatprep.subr.bf16.mxu0 %v5191_v40 }
 0xdc7   : > { %v2138_v49 = vpack.c.bf16 %v2103_v47, %v2101_v46  ;;  %v4385_v47 = vld [vmem:[%s6417_s29 + $0x1] ss:$0 sm:$0xff] }
 0xdc9   : > { %2273 = vmatprep.mubr.bf16.mxu1 %v2138_v49  ;;  %2509 = vmatpush1.bf16.msra.mxu0 %v5189_v41 }
 0xdca   : > { %2274 = vmatmul.mubr.bf16.vlgmr.msra.gmra.mrb[16].mxu1 %v2137_v48  ;;  %2510 = vmatprep.subr.bf16.mxu0 %v5195_v9 }
 0xdcb   : > { %4794 = vmatprep.mubr.msk.bf16.mxu1 %vm5533_vm0, %v5531_v4 }
 0xdcd   : > { %2511 = vmatpush1.bf16.msra.mxu0 %v5193_v10 }
 0xdce   : > { %2512 = vmatprep.subr.bf16.mxu0 %v5199_v13 }
 0xdd1   : > { %2513 = vmatpush1.bf16.msra.mxu0 %v5197_v16 }
 0xdd2   : > { %2514 = vmatprep.subr.bf16.mxu0 %v5203_v19 }
 0xdd5   : > { %2515 = vmatpush1.bf16.msra.mxu0 %v5201_v15 }
 0xdd6   : > { %2516 = vmatprep.subr.bf16.mxu0 %v5207_v21 }
 0xdd9   : > { %2517 = vmatpush1.bf16.msra.mxu0 %v5205_v22 }
 0xdda   : > { %2518 = vmatprep.subr.bf16.mxu0 %v5211_v26 }
 0xddd   : > { %2519 = vmatpush1.bf16.msra.mxu0 %v5209_v38 }
 0xdde   : > { %2520 = vmatprep.subr.bf16.mxu0 %v5215_v39 }
 0xde1   : > { %2521 = vmatpush1.bf16.msra.mxu0 %v5213_v29 }
 0xe9d   : > { %v4604_v50 = vpop.f32.mrb[16].mxu1 }
 0xe9e   : > { %v4605_v14 = vpop.f32.mrb[17].mxu1 }
 0xe9f   : > { %v4606_v52 = vadd.f32 %v4605_v14, %v4604_v50  ;;  %v4607_v53 = vpop.f32.mrb[18].mxu1  ;;  %v4386_v14 = vld [vmem:[%s6372_s3 + $0x1] ss:$0 sm:$0xff] }
 0xea0   : > { %v4608_v56 = vpop.f32.mrb[19].mxu1 }
 0xea1   : > { %v2276_v59 = vadd.f32 %v4606_v52, %v4366_v51  ;;  %v4609_v60 = vadd.f32 %v4608_v56, %v4607_v53 }
 0xea3   : > { %v2279_v61 = vadd.f32 %v4609_v60, %v4366_v51  ;;  %v6088_v62 = vadd.f32 %v2276_v59, %v6060_v36  ;;  %v5188_v36 = vld [vmem:[%s6373_s4 + $0xc8] ss:$12 sps:$4 sm:$0xff]   ;;  %v4419_v60 = vld [vmem:[%s6374_s5 + $0x3] sm:$0x7] }
 0xea4   : > { %4779 = vmatpush3.bf16.msra.mxu1 %v5188_v36  ;;  %v2374_v1 = vrot.slane %v4419_v60, %v702_v57  ;;  %v2370_v40 = vrot.slane %v4419_v60, %v5894_v58 }
 0xea5   : > { %2288 = vadd.xlane.f32.xlu1 %v6088_v62  ;;  %v6092_v63 = vadd.f32 %v2279_v61, %v6063_v45  ;;  %v5192_v45 = vld [vmem:[%s6373_s4 + $0xe0] ss:$12 sps:$4 sm:$0xff]   ;;  %4780 = vmatprep.subr.bf16.mxu1 %v5531_v4  ;;  %v2366_v61 = vrot.slane %v4419_v60, %v5887_v55 }
 0xea7   : > { %2290 = vadd.xlane.f32.xlu0 %v6092_v63 }
 0xea8   : > { %4781 = vmatpush3.bf16.msra.mxu1 %v5192_v45 }
 0xea9   : > { %4782 = vmatprep.subr.bf16.mxu1 %v5531_v4 }
 0xeac   : > { %4783 = vmatpush3.bf16.msra.mxu1 %v5196_v12 }
 0xead   : > { %4784 = vmatprep.subr.bf16.mxu1 %v5531_v4 }
 0xeb0   : > { %4785 = vmatpush3.bf16.msra.mxu1 %v5200_v18 }
 0xeb1   : > { %4786 = vmatprep.subr.bf16.mxu1 %v5531_v4 }
 0xeb4   : > { %4787 = vmatpush3.bf16.msra.mxu1 %v5204_v20 }
 0xeb5   : > { %4788 = vmatprep.subr.bf16.mxu1 %v5531_v4 }
 0xeb8   : > { %4789 = vmatpush3.bf16.msra.mxu1 %v5208_v23 }
 0xeb9   : > { %4790 = vmatprep.subr.bf16.mxu1 %v5531_v4 }
 0xebc   : > { %4791 = vmatpush3.bf16.msra.mxu1 %v5212_v28 }
 0xebd   : > { %4792 = vmatprep.subr.bf16.mxu1 %v5531_v4 }
 0xec0   : > { %4793 = vmatpush3.bf16.msra.mxu1 %v5216_v32 }
 0xf32   : > { %v2289_v42 = vpop.xlane.xlu1 %2288 }
 0xf33   : > { %v2292_v0 = vmul.f32 0.0078125, %v2289_v42 }
 0xf34   : > { %v2291_v3 = vpop.xlane.xlu0 %2290 }
 0xf35   : > { %v2294_v11 = vsub.f32 %v6088_v62, %v2292_v0  ;;  %v2293_v5 = vmul.f32 0.0078125, %v2291_v3 }
 0xf37   : > { %v2295_v6 = vsub.f32 %v6092_v63, %v2293_v5  ;;  %v2296_v7 = vmul.f32 %v2294_v11, %v2294_v11 }
 0xf39   : > { %2298 = vadd.xlane.f32.xlu1 %v2296_v7  ;;  %v2297_v8 = vmul.f32 %v2295_v6, %v2295_v6 }
 0xf3b   : > { %2300 = vadd.xlane.f32.xlu0 %v2297_v8 }
 0xfc6   : > { %v2299_v33 = vpop.xlane.xlu1 %2298 }
 0xfc7   : > { %v2302_v34 = vmul.f32 0.0078125, %v2299_v33 }
 0xfc8   : > { %v2301_v35 = vpop.xlane.xlu0 %2300 }
 0xfc9   : > { %v2304_v37 = vadd.f32 1e-05, %v2302_v34  ;;  %v2303_v43 = vmul.f32 0.0078125, %v2301_v35 }
 0xfcb   : > { %5337 = vrsqrt.f32 %v2304_v37  ;;  %v2305_v44 = vadd.f32 1e-05, %v2303_v43 }
 0xfcd   : > { %5339 = vrsqrt.f32 %v2305_v44 }
 0xfd5   : > { %v5338_v46 = vpop.eup %5337 }
 0xfd6   : > { %v2308_v48 = vmul.f32 %v5338_v46, %v2294_v11 }
 0xfd7   : > { %v5340_v49 = vpop.eup %5339 }
 0xfd8   : > { %v2309_v50 = vmul.f32 %v5340_v49, %v2295_v6  ;;  %v2316_v51 = vmul.f32 %v4385_v47, %v2308_v48 }
 0xfda   : > { %v2317_v52 = vmul.f32 %v4385_v47, %v2309_v50  ;;  %v2324_v53 = vadd.f32 %v4386_v14, %v2316_v51 }
 0xfdc   : > { %v2325_v56 = vadd.f32 %v4386_v14, %v2317_v52 }
 0xfde   : > { %v2361_v59 = vpack.c.bf16 %v2325_v56, %v2324_v53 }
 0xfe0   : > { %2539 = vmatmul.mubr.bf16.vlgmr.msra.gmra.mrb[16].mxu0 %v2361_v59  ;;  %4795 = vmatmul.mubr.bf16.vlgmr.msra.gmra.mrb[20].mxu1 %v2361_v59 }
0x10b3   : > { %v2540_v2 = vpop.f32.mrb[16].mxu0  ;;  %v2583_v36 = vpop.f32.mrb[20].mxu1 }
0x10b4   : > { %v6189_v45 = vadd.f32 %v2540_v2, %v2366_v61  ;;  %v2542_v41 = vpop.f32.mrb[17].mxu0  ;;  %v4796_v42 = vpop.f32.mrb[21].mxu1  ;;  %v2584_v11 = vadd.f32 %v2583_v36, %v2374_v1 }
0x10b5   : > { %v2544_v0 = vpop.f32.mrb[18].mxu0  ;;  %v2586_v3 = vpop.f32.mrb[22].mxu1  ;;  %v2543_v8 = vadd.f32 %v2542_v41, %v2370_v40 }
0x10b6   : > { %v2587_v5 = vadd.f32 %v2586_v3, %v2374_v1  ;;  %v2546_v6 = vpop.f32.mrb[19].mxu0  ;;  %v4797_v7 = vpop.f32.mrb[23].mxu1  ;;  %4802 = vmatprep.mubr.msk.f32.mxu0 %vm919_vm1, %v6189_v45  ;;  %v6201_v16 = vadd.f32 %v2544_v0, %v2366_v61 }
0x10b7   : > { %v2547_v9 = vadd.f32 %v2546_v6, %v2370_v40 }
0x10b8   : > { %v4920_v57 = vpack.c.bf16 %v2587_v5, %v2584_v11  ;;  %v6193_v10 = vpack.i.bf16 %v2587_v5, %v2584_v11 }
0x10b9   : > { %v4914_v12 = vpack.c.bf16 %v2547_v9, %v2543_v8  ;;  %v6195_v13 = vpack.i.bf16 %v2547_v9, %v2543_v8 }
0x10bb   : > { %4916 = vmatprep.subr.msk.bf16.mxu0 %vm5914_vm2, %v4914_v12 }
0x10bc   : > { %4919 = vmatpush3.bf16.xpose.msk.msra.mxu0 %vm5914_vm2, %v4914_v12 }
0x10bd   : > { %4921 = vmatprep.subr.bf16.mxu0 %v4920_v57 }
0x10c3   : > { %4803 = vmatmul.mubr.msk.f32.vlgmr.msra.gmra.mrb[20].mxu0 %vm919_vm1, %v6201_v16 }
0x10c4   : > { %4923 = vmatpush3.bf16.msra.mxu0 %v4920_v57 }
0x1196   : > { %v4804_v18 = vpop.f32.mrb[20].mxu0 }
0x1197   : > { %v2678_v19 = vmul.f32 0.17677669, %v4804_v18  ;;  %v2668_v15 = vpop.f32.mrb[21].mxu0 }
0x1198   : > { %v2677_v20 = vmul.f32 0.17677669, %v2668_v15 }
0x1199   : > { %v2680_v21 = vsel %vm5941_vm3, %v2678_v19, -1e+30 }
0x119a   : > { %v2684_v22 = vsel %vm1011_vm4, %v2680_v21, -inf  ;;  %v2679_v23 = vsel %vm5947_vm5, %v2677_v20, -1e+30 }
0x119b   : > { %2685 = vmax.xlane.f32.xlu0 %v2684_v22  ;;  %v2681_v26 = vsel %vm1011_vm4, %v2679_v23, -inf }
0x119c   : > { %2682 = vmax.xlane.f32.xlu1 %v2681_v26 }
0x11ad   : > { %5061 = vrot.lane.b32.xlu1 %v6195_v13, %s5534_s28 }
0x1228   : > { %v2686_v38 = vpop.xlane.xlu0 %2685 }
0x1229   : > { %v2688_v28 = vsub.f32 %v2680_v21, %v2686_v38  ;;  %v2683_v39 = vpop.xlane.xlu1 %2682 }
0x122a   : > { %v2687_v29 = vsub.f32 %v2679_v23, %v2683_v39 }
0x122b   : > { %v2691_v32 = vmul.f32 1.442695, %v2688_v28 }
0x122c   : > { %v2689_v33 = vmul.f32 1.442695, %v2687_v29 }
0x122d   : > { %5341 = vpow2.f32 %v2691_v32  ;;  %v5062_v34 = vpop.permute.xlu1 %5061 }
0x122e   : > { %5343 = vpow2.f32 %v2689_v33  ;;  %v5064_v35 = vunpack.i.h.bf16 %v5062_v34  ;;  %v5063_v37 = vunpack.i.l.bf16 %v5062_v34 }
0x1230   : > { %v4924_v43 = vpack.c.bf16 %v5064_v35, %v5063_v37 }
0x1232   : > { %4926 = vmatprep.subr.msk.bf16.mxu0 %vm5914_vm2, %v4924_v43 }
0x1237   : > { %v5342_v44 = vpop.eup %5341 }
0x1238   : > { %v5344_v46 = vpop.eup %5343  ;;  %v2696_v47 = vsel %vm1011_vm4, %v5342_v44, 0.0 }
0x1239   : > { %2697 = vadd.xlane.f32.xlu0 %v2696_v47  ;;  %v2693_v48 = vsel %vm1011_vm4, %v5344_v46, 0.0 }
0x123a   : > { %2694 = vadd.xlane.f32.xlu1 %v2693_v48 }
0x124b   : > { %2786 = vrot.lane.b32.xlu1 %v6201_v16, %s5534_s28 }
0x124f   : > { %2784 = vrot.lane.b32.xlu0 %v6189_v45, %s5534_s28 }
0x12c6   : > { %v2698_v49 = vpop.xlane.xlu0 %2697 }
0x12c7   : > { %5345 = vrcp.f32 %v2698_v49  ;;  %v2695_v50 = vpop.xlane.xlu1 %2694 }
0x12c8   : > { %5347 = vrcp.f32 %v2695_v50 }
0x12ca   : > { %v2785_v56 = vpop.permute.xlu0 %2784 }
0x12cb   : > { %v2787_v59 = vpop.permute.xlu1 %2786 }
0x12d1   : > { %v5346_v51 = vpop.eup %5345 }
0x12d2   : > { %v5348_v14 = vpop.eup %5347  ;;  %v2702_v53 = vmul.f32 %v5346_v51, %v5342_v44 }
0x12d3   : > { %v2701_v52 = vmul.f32 %v5348_v14, %v5344_v46 }
0x12d5   : > { %4809 = vmatprep.mubr.msk.f32.mxu0 %vm1011_vm4, %v2701_v52 }
0x12d6   : > { %4810 = vmatmul.mubr.msk.f32.vlgmr.msra.gmra.mrb[22].mxu0 %vm1011_vm4, %v2702_v53 }
0x12d7   : > { %4929 = vmatpush3.bf16.xpose.msk.msra.mxu0 %vm5914_vm2, %v4924_v43  ;;  %4816 = vmatprep.mubr.msk.f32.mxu0 %vm919_vm1, %v2785_v56 }
0x12de   : > { %4817 = vmatmul.mubr.msk.f32.vlgmr.msra.gmra.mrb[24].mxu0 %vm919_vm1, %v2787_v59 }
0x13a9   : > { %v6227_v60 = vpop.f32.mrb[22].mxu0 }
0x13aa   : > { %v6229_v61 = vpop.f32.mrb[23].mxu0 }
0x13b1   : > { %v4818_v1 = vpop.f32.mrb[24].mxu0 }
0x13b2   : > { %v2876_v2 = vmul.f32 0.17677669, %v4818_v1  ;;  %v2866_v36 = vpop.f32.mrb[25].mxu0 }
0x13b3   : > { %v2875_v40 = vmul.f32 0.17677669, %v2866_v36 }
0x13b4   : > { %v2878_v41 = vsel %vm5941_vm3, %v2876_v2, -1e+30 }
0x13b5   : > { %v2882_v42 = vsel %vm1011_vm4, %v2878_v41, -inf  ;;  %v2877_v0 = vsel %vm5947_vm5, %v2875_v40, -1e+30 }
0x13b6   : > { %2883 = vmax.xlane.f32.xlu0 %v2882_v42  ;;  %v2879_v3 = vsel %vm1011_vm4, %v2877_v0, -inf }
0x13b7   : > { %2880 = vmax.xlane.f32.xlu1 %v2879_v3 }
0x1443   : > { %v2884_v11 = vpop.xlane.xlu0 %2883 }
0x1444   : > { %v2886_v5 = vsub.f32 %v2878_v41, %v2884_v11  ;;  %v2881_v6 = vpop.xlane.xlu1 %2880 }
0x1445   : > { %v2885_v7 = vsub.f32 %v2877_v0, %v2881_v6 }
0x1446   : > { %v2889_v8 = vmul.f32 1.442695, %v2886_v5 }
0x1447   : > { %v2887_v9 = vmul.f32 1.442695, %v2885_v7 }
0x1448   : > { %5349 = vpow2.f32 %v2889_v8 }
0x1449   : > { %5351 = vpow2.f32 %v2887_v9 }
0x1452   : > { %v5350_v57 = vpop.eup %5349 }
0x1453   : > { %v5352_v12 = vpop.eup %5351  ;;  %v2894_v18 = vsel %vm1011_vm4, %v5350_v57, 0.0 }
0x1454   : > { %2895 = vadd.xlane.f32.xlu1 %v2894_v18  ;;  %v2891_v19 = vsel %vm1011_vm4, %v5352_v12, 0.0 }
0x1455   : > { %2892 = vadd.xlane.f32.xlu0 %v2891_v19 }
0x1465   : > { %5071 = vrot.lane.b32.xlu1 %v6195_v13, %s5535_s21 }
0x1469   : > { %5076 = vrot.lane.b32.xlu1 %v6195_v13, %s5536_s23 }
0x146b   : > { %5066 = vrot.lane.b32.xlu0 %v6193_v10, %s5534_s28 }
0x146d   : > { %2990 = vrot.lane.b32.xlu1 %v6189_v45, %s5535_s21 }
0x146f   : > { %2992 = vrot.lane.b32.xlu0 %v6201_v16, %s5535_s21 }
0x1471   : > { %3194 = vrot.lane.b32.xlu1 %v6189_v45, %s5536_s23 }
0x1473   : > { %3196 = vrot.lane.b32.xlu0 %v6201_v16, %s5536_s23 }
0x14e1   : > { %v2896_v15 = vpop.xlane.xlu1 %2895 }
0x14e2   : > { %5353 = vrcp.f32 %v2896_v15  ;;  %v2893_v20 = vpop.xlane.xlu0 %2892 }
0x14e3   : > { %5355 = vrcp.f32 %v2893_v20 }
0x14e5   : > { %v5072_v13 = vpop.permute.xlu1 %5071 }
0x14e6   : > { %v5067_v21 = vpop.permute.xlu0 %5066  ;;  %v5074_v22 = vunpack.i.h.bf16 %v5072_v13  ;;  %v5073_v23 = vunpack.i.l.bf16 %v5072_v13 }
0x14e7   : > { %v5069_v26 = vunpack.i.h.bf16 %v5067_v21  ;;  %v5068_v38 = vunpack.i.l.bf16 %v5067_v21 }
0x14e8   : > { %v4934_v33 = vpack.c.bf16 %v5074_v22, %v5073_v23 }
0x14e9   : > { %v4930_v28 = vpack.c.bf16 %v5069_v26, %v5068_v38  ;;  %v5077_v39 = vpop.permute.xlu1 %5076 }
0x14ea   : > { %v5079_v29 = vunpack.i.h.bf16 %v5077_v39  ;;  %v5078_v32 = vunpack.i.l.bf16 %v5077_v39  ;;  %v2993_v44 = vpop.permute.xlu0 %2992 }
0x14eb   : > { %4931 = vmatprep.subr.bf16.mxu0 %v4930_v28 }
0x14ec   : > { %v5354_v45 = vpop.eup %5353  ;;  %v4944_v34 = vpack.c.bf16 %v5079_v29, %v5078_v32  ;;  %4933 = vmatpush3.bf16.msra.mxu0 %v4930_v28 }
0x14ed   : > { %v5356_v16 = vpop.eup %5355  ;;  %v2991_v35 = vpop.permute.xlu1 %2990  ;;  %4936 = vmatprep.subr.msk.bf16.mxu0 %vm5914_vm2, %v4934_v33  ;;  %v2900_v43 = vmul.f32 %v5354_v45, %v5350_v57 }
0x14ee   : > { %4946 = vmatprep.subr.msk.bf16.mxu1 %vm5914_vm2, %v4944_v34  ;;  %v2899_v37 = vmul.f32 %v5356_v16, %v5352_v12  ;;  %v3197_v47 = vpop.permute.xlu0 %3196 }
0x14ef   : > { %4949 = vmatpush3.bf16.xpose.msk.msra.mxu1 %vm5914_vm2, %v4944_v34 }
0x14f0   : > { %4823 = vmatprep.mubr.msk.f32.mxu0 %vm1011_vm4, %v2899_v37  ;;  %4854 = vmatprep.subr.bf16.mxu1 %v5531_v4 }
0x14f1   : > { %4824 = vmatmul.mubr.msk.f32.vlgmr.msra.gmra.mrb[26].mxu0 %vm1011_vm4, %v2900_v43  ;;  %v3195_v46 = vpop.permute.xlu1 %3194 }
0x14f2   : > { %4830 = vmatprep.mubr.msk.f32.mxu0 %vm919_vm1, %v2991_v35  ;;  %4844 = vmatprep.mubr.msk.f32.mxu1 %vm919_vm1, %v3195_v46 }
0x14f5   : > { %4939 = vmatpush3.bf16.xpose.msk.msra.mxu0 %vm5914_vm2, %v4934_v33 }
0x14f6   : > { %4845 = vmatmul.mubr.msk.f32.vlgmr.msra.gmra.mrb[24].mxu1 %vm919_vm1, %v3197_v47 }
0x14f7   : > { %4870 = vmatprep.mubr.msk.bf16.mxu1 %vm5533_vm0, %v5531_v4 }
0x14fc   : > { %4831 = vmatmul.mubr.msk.f32.vlgmr.msra.gmra.mrb[28].mxu0 %vm919_vm1, %v2993_v44 }
0x15c4   : > { %v4825_v48 = vpop.f32.mrb[26].mxu0 }
0x15c5   : > { %v2981_v49 = vpop.f32.mrb[27].mxu0 }
0x15c6   : > { %v5090_v50 = vpack.i.bf16 %v4825_v48, %v2981_v49 }
0x15c9   : > { %v4846_v51 = vpop.f32.mrb[24].mxu1 }
0x15ca   : > { %v3276_v14 = vpop.f32.mrb[25].mxu1  ;;  %v3286_v40 = vmul.f32 0.17677669, %v4846_v51 }
0x15cb   : > { %v3285_v53 = vmul.f32 0.17677669, %v3276_v14 }
0x15cc   : > { %v3288_v3 = vsel %vm5941_vm3, %v3286_v40, -1e+30  ;;  %v5224_v40 = vld [vmem:[#allocation4 + $0x78] sm:$0xff]  }
0x15cd   : > { %v3287_v42 = vsel %vm5947_vm5, %v3285_v53, -1e+30  ;;  %v3292_v11 = vsel %vm1011_vm4, %v3288_v3, -inf  ;;  %v5217_v53 = vld [vmem:[#allocation4 + $0x40] sm:$0xff]  }
0x15ce   : > { %v3289_v0 = vsel %vm1011_vm4, %v3287_v42, -inf  ;;  %4855 = vmatpush3.bf16.msra.mxu1 %v5217_v53  ;;  %v5240_v53 = vld [vmem:[#allocation6 + $0xd0] ss:$8 sps:$4 sm:$0xff]  }
0x15cf   : > { %v4832_v52 = vpop.f32.mrb[28].mxu0  ;;  %4856 = vmatprep.subr.bf16.mxu1 %v5531_v4 }
0x15d0   : > { %v3082_v56 = vmul.f32 0.17677669, %v4832_v52  ;;  %v3072_v59 = vpop.f32.mrb[29].mxu0 }
0x15d1   : > { %v3081_v1 = vmul.f32 0.17677669, %v3072_v59  ;;  %v5219_v59 = vld [vmem:[#allocation4 + $0x50] sm:$0xff]  }
0x15d2   : > { %v3084_v17 = vsel %vm5941_vm3, %v3082_v56, -1e+30  ;;  %v5218_v56 = vld [vmem:[#allocation4 + $0x48] sm:$0xff]  }
0x15d3   : > { %v3088_v2 = vsel %vm1011_vm4, %v3084_v17, -inf  ;;  %v3083_v36 = vsel %vm5947_vm5, %v3081_v1, -1e+30  ;;  %4857 = vmatpush3.bf16.msra.mxu1 %v5218_v56  ;;  %v5220_v1 = vld [vmem:[#allocation4 + $0x58] sm:$0xff]   ;;  %v5245_v56 = vld [vmem:[#allocation6 + $0xe4] ss:$8 sps:$4 sm:$0xff]  }
0x15d4   : > { %3089 = vmax.xlane.f32.xlu0 %v3088_v2  ;;  %v3085_v41 = vsel %vm1011_vm4, %v3083_v36, -inf  ;;  %4858 = vmatprep.subr.bf16.mxu1 %v5531_v4  ;;  %v5222_v2 = vld [vmem:[#allocation4 + $0x68] sm:$0xff]  }
0x15d5   : > { %3086 = vmax.xlane.f32.xlu1 %v3085_v41 }
0x15d7   : > { %4859 = vmatpush3.bf16.msra.mxu1 %v5219_v59  ;;  %v5243_v59 = vld [vmem:[#allocation6 + $0xe0] ss:$8 sps:$4 sm:$0xff]  }
0x15d8   : > { %3290 = vmax.xlane.f32.xlu0 %v3289_v0  ;;  %4860 = vmatprep.subr.bf16.mxu1 %v5531_v4 }
0x15db   : > { %4861 = vmatpush3.bf16.msra.mxu1 %v5220_v1  ;;  %v5248_v1 = vld [vmem:[#allocation6 + $0xf4] ss:$8 sps:$4 sm:$0xff]  }
0x15dc   : > { %3293 = vmax.xlane.f32.xlu0 %v3292_v11  ;;  %4862 = vmatprep.subr.bf16.mxu1 %v5531_v4 }
0x1661   : > { %v3090_v5 = vpop.xlane.xlu0 %3089 }
0x1662   : > { %v3087_v6 = vpop.xlane.xlu1 %3086  ;;  %v3092_v57 = vsub.f32 %v3084_v17, %v3090_v5  ;;  %v5221_v17 = vld [vmem:[#allocation4 + $0x60] sm:$0xff]  }
0x1663   : > { %v3091_v7 = vsub.f32 %v3083_v36, %v3087_v6  ;;  %4863 = vmatpush3.bf16.msra.mxu1 %v5221_v17  ;;  %v5223_v36 = vld [vmem:[#allocation4 + $0x70] sm:$0xff]  }
0x1664   : > { %v3095_v15 = vmul.f32 1.442695, %v3092_v57  ;;  %4864 = vmatprep.subr.bf16.mxu1 %v5531_v4  ;;  %v5246_v17 = vld [vmem:[#allocation6 + $0xf0] ss:$8 sps:$4 sm:$0xff]  }
0x1665   : > { %v3291_v8 = vpop.xlane.xlu0 %3290  ;;  %v3093_v12 = vmul.f32 1.442695, %v3091_v7 }
0x1666   : > { %v3295_v9 = vsub.f32 %v3287_v42, %v3291_v8 }
0x1667   : > { %4865 = vmatpush3.bf16.msra.mxu1 %v5222_v2 }
0x1668   : > { %v3297_v18 = vmul.f32 1.442695, %v3295_v9  ;;  %4866 = vmatprep.subr.bf16.mxu1 %v5531_v4 }
0x1669   : > { %v3294_v31 = vpop.xlane.xlu0 %3293 }
0x166a   : > { %5357 = vpow2.f32 %v3297_v18  ;;  %v3296_v19 = vsub.f32 %v3288_v3, %v3294_v31 }
0x166b   : > { %5359 = vpow2.f32 %v3093_v12  ;;  %4867 = vmatpush3.bf16.msra.mxu1 %v5223_v36 }
0x166c   : > { %v3299_v20 = vmul.f32 1.442695, %v3296_v19  ;;  %4868 = vmatprep.subr.bf16.mxu1 %v5531_v4 }
0x166e   : > { %5361 = vpow2.f32 %v3299_v20 }
0x166f   : > { %5363 = vpow2.f32 %v3095_v15  ;;  %4869 = vmatpush3.bf16.msra.mxu1 %v5224_v40 }
0x1674   : > { %v5358_v27 = vpop.eup %5357 }
0x1675   : > { %v3301_v13 = vsel %vm1011_vm4, %v5358_v27, 0.0  ;;  %v5360_v21 = vpop.eup %5359 }
0x1676   : > { %3302 = vadd.xlane.f32.xlu1 %v3301_v13  ;;  %v3097_v26 = vsel %vm1011_vm4, %v5360_v21, 0.0 }
0x1678   : > { %v5362_v22 = vpop.eup %5361 }
0x1679   : > { %v3304_v23 = vsel %vm1011_vm4, %v5362_v22, 0.0  ;;  %v5364_v38 = vpop.eup %5363 }
0x167a   : > { %3305 = vadd.xlane.f32.xlu0 %v3304_v23  ;;  %3098 = vadd.xlane.f32.xlu1 %v3097_v26  ;;  %v3100_v28 = vsel %vm1011_vm4, %v5364_v38, 0.0  ;;  %v4469_v23 = vld [vmem:[%s6376_s7 + $0x1] ss:$0 sm:$0xff] }
0x167e   : > { %3101 = vadd.xlane.f32.xlu0 %v3100_v28 }
0x168b   : > { %5081 = vrot.lane.b32.xlu1 %v6193_v10, %s5535_s21 }
0x168f   : > { %5091 = vrot.lane.b32.xlu1 %v5090_v50, %s5536_s23 }
0x1694   : > { %5086 = vrot.lane.b32.xlu0 %v6193_v10, %s5536_s23 }
0x1703   : > { %v3303_v39 = vpop.xlane.xlu1 %3302 }
0x1707   : > { %v3306_v29 = vpop.xlane.xlu0 %3305  ;;  %v3099_v32 = vpop.xlane.xlu1 %3098 }
0x1708   : > { %5365 = vrcp.f32 %v3099_v32 }
0x1709   : > { %5367 = vrcp.f32 %v3303_v39 }
0x170b   : > { %v3102_v33 = vpop.xlane.xlu0 %3101  ;;  %v5082_v45 = vpop.permute.xlu1 %5081 }
0x170c   : > { %5369 = vrcp.f32 %v3102_v33  ;;  %v5084_v34 = vunpack.i.h.bf16 %v5082_v45  ;;  %v5083_v16 = vunpack.i.l.bf16 %v5082_v45  ;;  %v5225_v33 = vld [vmem:[#allocation6 + $0x80] ss:$8 sps:$4 sm:$0xff]   ;;  %v5227_v45 = vld [vmem:[#allocation6 + $0x84] ss:$8 sps:$4 sm:$0xff]  }
0x170d   : > { %5371 = vrcp.f32 %v3306_v29 }
0x170e   : > { %v4940_v35 = vpack.c.bf16 %v5084_v34, %v5083_v16  ;;  %v5230_v34 = vld [vmem:[#allocation6 + $0x94] ss:$8 sps:$4 sm:$0xff]   ;;  %v5228_v16 = vld [vmem:[#allocation6 + $0x90] ss:$8 sps:$4 sm:$0xff]  }
0x170f   : > { %v5087_v37 = vpop.permute.xlu0 %5086  ;;  %v5092_v6 = vpop.permute.xlu1 %5091 }
0x1710   : > { %v5089_v43 = vunpack.i.h.bf16 %v5087_v37  ;;  %v5088_v44 = vunpack.i.l.bf16 %v5087_v37  ;;  %4941 = vmatprep.subr.bf16.mxu0 %v4940_v35  ;;  %v5094_v8 = vunpack.i.h.bf16 %v5092_v6  ;;  %v5093_v9 = vunpack.i.l.bf16 %v5092_v6 }
0x1711   : > { %4943 = vmatpush3.bf16.msra.mxu0 %v4940_v35 }
0x1712   : > { %v4950_v46 = vpack.c.bf16 %v5089_v43, %v5088_v44  ;;  %v5366_v47 = vpop.eup %5365  ;;  %v3423_v4 = vsel %vm919_vm1, %v6227_v60, %v5094_v8  ;;  %v3422_v31 = vsel %vm919_vm1, %v6229_v61, %v5093_v9  ;;  %v4481_v9 = vld [vmem:[%s6378_s9 + $0x1] ss:$0 sm:$0xff] }
0x1713   : > { %v3105_v10 = vmul.f32 %v5366_v47, %v5360_v21  ;;  %v5368_v48 = vpop.eup %5367 }
0x1714   : > { %4951 = vmatprep.subr.bf16.mxu0 %v4950_v46  ;;  %v3309_v14 = vmul.f32 %v5368_v48, %v5358_v27  ;;  %v5231_v48 = vld [vmem:[#allocation6 + $0xa0] ss:$8 sps:$4 sm:$0xff]  }
0x1715   : > { %4837 = vmatprep.mubr.msk.f32.mxu0 %vm1011_vm4, %v3105_v10  ;;  %v5233_v10 = vld [vmem:[#allocation6 + $0xa4] ss:$8 sps:$4 sm:$0xff]  }
0x1716   : > { %v5370_v49 = vpop.eup %5369 }
0x1717   : > { %v3106_v50 = vmul.f32 %v5370_v49, %v5364_v38  ;;  %v5372_v51 = vpop.eup %5371  ;;  %v5236_v49 = vld [vmem:[#allocation6 + $0xb4] ss:$8 sps:$4 sm:$0xff]  }
0x1718   : > { %v3310_v52 = vmul.f32 %v5372_v51, %v5362_v22  ;;  %v5239_v51 = vld [vmem:[#allocation6 + $0xc4] ss:$8 sps:$4 sm:$0xff]  }
0x1719   : > { %4838 = vmatmul.mubr.msk.f32.vlgmr.msra.gmra.mrb[30].mxu0 %vm1011_vm4, %v3106_v50  ;;  %v5234_v50 = vld [vmem:[#allocation6 + $0xb0] ss:$8 sps:$4 sm:$0xff]  }
0x171a   : > { %4953 = vmatpush3.bf16.msra.mxu0 %v4950_v46  ;;  %4851 = vmatprep.mubr.msk.f32.mxu0 %vm1011_vm4, %v3309_v14  ;;  %v5237_v14 = vld [vmem:[#allocation6 + $0xc0] ss:$8 sps:$4 sm:$0xff]  }
0x171b   : > { %3698 = vmatprep.subr.bf16.mxu0 %v5227_v45 }
0x171d   : > { %4852 = vmatmul.mubr.msk.f32.vlgmr.msra.gmra.mrb[32].mxu0 %vm1011_vm4, %v3310_v52  ;;  %v5242_v52 = vld [vmem:[#allocation6 + $0xd4] ss:$8 sps:$4 sm:$0xff]  }
0x171e   : > { %3730 = vmatprep.mubr.bf16.mxu0 %v5532_v30  ;;  %3699 = vmatpush1.bf16.msra.mxu0 %v5225_v33  ;;  %v4482_v33 = vld [vmem:[%s6380_s11 + $0x2] sm:$0x3] }
0x171f   : > { %3700 = vmatprep.subr.bf16.mxu0 %v5230_v34  ;;  %v3611_v45 = vrot.slane %v4482_v33, %v5887_v55  ;;  %v3615_v34 = vrot.slane %v4482_v33, %v5894_v58 }
0x1722   : > { %3701 = vmatpush1.bf16.msra.mxu0 %v5228_v16 }
0x1723   : > { %3702 = vmatprep.subr.bf16.mxu0 %v5233_v10 }
0x1726   : > { %3703 = vmatpush1.bf16.msra.mxu0 %v5231_v48 }
0x1727   : > { %3704 = vmatprep.subr.bf16.mxu0 %v5236_v49 }
0x172a   : > { %3705 = vmatpush1.bf16.msra.mxu0 %v5234_v50 }
0x172b   : > { %3706 = vmatprep.subr.bf16.mxu0 %v5239_v51 }
0x172e   : > { %3707 = vmatpush1.bf16.msra.mxu0 %v5237_v14 }
0x172f   : > { %3708 = vmatprep.subr.bf16.mxu0 %v5242_v52 }
0x1732   : > { %3709 = vmatpush1.bf16.msra.mxu0 %v5240_v53 }
0x1733   : > { %3710 = vmatprep.subr.bf16.mxu0 %v5245_v56 }
0x1736   : > { %3711 = vmatpush1.bf16.msra.mxu0 %v5243_v59 }
0x1737   : > { %3712 = vmatprep.subr.bf16.mxu0 %v5248_v1 }
0x173a   : > { %3713 = vmatpush1.bf16.msra.mxu0 %v5246_v17 }
0x17ec   : > { %v4839_v41 = vpop.f32.mrb[30].mxu0 }
0x17ed   : > { %v3185_v42 = vpop.f32.mrb[31].mxu0 }
0x17ee   : > { %v5095_v0 = vpack.i.bf16 %v4839_v41, %v3185_v42 }
0x17f0   : > { %5096 = vrot.lane.b32.xlu1 %v5095_v0, %s5535_s21  ;;  %v4853_v3 = vpop.f32.mrb[32].mxu0  ;;  %s6425_s21 = sld [smem:[#allocation20_spill]] }
0x17f1   : > { %v3389_v11 = vpop.f32.mrb[33].mxu0 }
0x17f2   : > { %v5100_v5 = vpack.i.bf16 %v4853_v3, %v3389_v11 }
0x17f4   : > { %5101 = vrot.lane.b32.xlu1 %v5100_v5, %s5534_s28  ;;  %v4480_v5 = vld [vmem:[%s6377_s8 + $0x1] ss:$0 sm:$0xff] }
0x1862   : > { %v5097_v7 = vpop.permute.xlu1 %5096 }
0x1863   : > { %v5099_v57 = vunpack.i.h.bf16 %v5097_v7  ;;  %v5098_v12 = vunpack.i.l.bf16 %v5097_v7 }
0x1865   : > { %v3425_v20 = vsel %vm1755_vm6, %v3423_v4, %v5099_v57  ;;  %v3424_v27 = vsel %vm1755_vm6, %v3422_v31, %v5098_v12  ;;  %v5249_v31 = vld [vmem:[#allocation8 + $0xc0] sm:$0xff]  }
0x1866   : > { %v5102_v18 = vpop.permute.xlu1 %5101  ;;  %4660 = vmatprep.subr.bf16.mxu1 %v5249_v31 }
0x1867   : > { %v5104_v19 = vunpack.i.h.bf16 %v5102_v18  ;;  %v5103_v15 = vunpack.i.l.bf16 %v5102_v18 }
0x1869   : > { %v3427_v13 = vsel %vm1758_vm7, %v3425_v20, %v5104_v19  ;;  %v3426_v21 = vsel %vm1758_vm7, %v3424_v27, %v5103_v15  ;;  %v5250_v19 = vld [vmem:[#allocation8 + $0x80] sm:$0xff]   ;;  %v5251_v15 = vld [vmem:[#allocation8 + $0xc8] sm:$0xff]   ;;  %v5253_v27 = vld [vmem:[#allocation8 + $0xd0] sm:$0xff]  }
0x186a   : > { %v3447_v22 = vpack.c.bf16 %v3427_v13, %v3426_v21  ;;  %v5252_v20 = vld [vmem:[#allocation8 + $0x88] sm:$0xff]   ;;  %v5254_v13 = vld [vmem:[#allocation8 + $0x90] sm:$0xff]   ;;  %v5255_v21 = vld [vmem:[#allocation8 + $0xd8] sm:$0xff]  }
0x186c   : > { %4871 = vmatmul.mubr.bf16.vlgmr.msra.gmra.mrb[28].mxu1 %v3447_v22  ;;  %v5256_v22 = vld [vmem:[#allocation8 + $0x98] sm:$0xff]  }
0x186d   : > { %4661 = vmatpush3.bf16.msra.mxu1 %v5250_v19 }
0x186e   : > { %4662 = vmatprep.subr.bf16.mxu1 %v5251_v15 }
0x1871   : > { %4663 = vmatpush3.bf16.msra.mxu1 %v5252_v20 }
0x1872   : > { %4664 = vmatprep.subr.bf16.mxu1 %v5253_v27 }
0x1875   : > { %4665 = vmatpush3.bf16.msra.mxu1 %v5254_v13 }
0x1876   : > { %4666 = vmatprep.subr.bf16.mxu1 %v5255_v21 }
0x1879   : > { %4667 = vmatpush3.bf16.msra.mxu1 %v5256_v22 }
0x193f   : > { %v3536_v60 = vpop.f32.mrb[28].mxu1 }
0x1940   : > { %v3537_v26 = vadd.f32 %v4469_v23, %v3536_v60  ;;  %v4872_v38 = vpop.f32.mrb[29].mxu1  ;;  %v5258_v60 = vld [vmem:[#allocation8 + $0xa0] sm:$0xff]  }
0x1941   : > { %v3539_v61 = vpop.f32.mrb[30].mxu1  ;;  %v5261_v38 = vld [vmem:[#allocation8 + $0xf0] sm:$0xff]  }
0x1942   : > { %v6317_v28 = vadd.f32 %v3537_v26, %v6088_v62  ;;  %v3540_v39 = vadd.f32 %v4469_v23, %v3539_v61  ;;  %v4873_v29 = vpop.f32.mrb[31].mxu1  ;;  %v5257_v23 = vld [vmem:[#allocation8 + $0xe0] sm:$0xff]   ;;  %v5260_v26 = vld [vmem:[#allocation8 + $0xa8] sm:$0xff]   ;;  %v5262_v61 = vld [vmem:[#allocation8 + $0xb0] sm:$0xff]  }
0x1943   : > { %4668 = vmatprep.subr.bf16.mxu1 %v5257_v23  ;;  %v5264_v29 = vld [vmem:[#allocation8 + $0xb8] sm:$0xff]  }
0x1944   : > { %v6320_v32 = vadd.f32 %v3540_v39, %v6092_v63  ;;  %3549 = vadd.xlane.f32.xlu0 %v6317_v28  ;;  %4669 = vmatpush3.bf16.msra.mxu1 %v5258_v60  ;;  %v5263_v39 = vld [vmem:[#allocation8 + $0xf8] sm:$0xff]   ;;  %v4500_v60 = vld [vmem:[%s6382_s13 + $0x1] ss:$0 sm:$0xff] }
0x1946   : > { %3551 = vadd.xlane.f32.xlu1 %v6320_v32 }
0x19d1   : > { %v3550_v35 = vpop.xlane.xlu0 %3549 }
0x19d2   : > { %v3553_v62 = vmul.f32 0.0078125, %v3550_v35 }
0x19d3   : > { %v3552_v37 = vpop.xlane.xlu1 %3551 }
0x19d4   : > { %v3555_v43 = vsub.f32 %v6317_v28, %v3553_v62  ;;  %v3554_v44 = vmul.f32 0.0078125, %v3552_v37 }
0x19d6   : > { %v3556_v63 = vsub.f32 %v6320_v32, %v3554_v44  ;;  %v3557_v46 = vmul.f32 %v3555_v43, %v3555_v43 }
0x19d8   : > { %3559 = vadd.xlane.f32.xlu0 %v3557_v46  ;;  %v3558_v47 = vmul.f32 %v3556_v63, %v3556_v63 }
0x19dc   : > { %3561 = vadd.xlane.f32.xlu0 %v3558_v47 }
0x1a65   : > { %v3560_v2 = vpop.xlane.xlu0 %3559 }
0x1a66   : > { %v3563_v36 = vmul.f32 0.0078125, %v3560_v2 }
0x1a68   : > { %v3565_v40 = vadd.f32 1e-05, %v3563_v36 }
0x1a69   : > { %v3562_v41 = vpop.xlane.xlu0 %3561 }
0x1a6a   : > { %5373 = vrsqrt.f32 %v3565_v40  ;;  %v3564_v42 = vmul.f32 0.0078125, %v3562_v41 }
0x1a6c   : > { %v3566_v0 = vadd.f32 1e-05, %v3564_v42 }
0x1a6e   : > { %5375 = vrsqrt.f32 %v3566_v0 }
0x1a74   : > { %v5374_v3 = vpop.eup %5373 }
0x1a75   : > { %v3569_v11 = vmul.f32 %v5374_v3, %v3555_v43 }
0x1a77   : > { %v3577_v8 = vmul.f32 %v4480_v5, %v3569_v11 }
0x1a78   : > { %v5376_v6 = vpop.eup %5375 }
0x1a79   : > { %v3570_v7 = vmul.f32 %v5376_v6, %v3556_v63  ;;  %v3585_v12 = vadd.f32 %v4481_v9, %v3577_v8 }
0x1a7b   : > { %v3578_v57 = vmul.f32 %v4480_v5, %v3570_v7 }
0x1a7d   : > { %v3586_v18 = vadd.f32 %v4481_v9, %v3578_v57 }
0x1a7f   : > { %v3606_v4 = vpack.c.bf16 %v3586_v18, %v3585_v12 }
0x1a81   : > { %3731 = vmatmul.mubr.bf16.vlgmr.msra.gmra.mrb[36].mxu0 %v3606_v4 }
0x1a82   : > { %4157 = vmatprep.mubr.bf16.mxu0 %v5532_v30  ;;  %v5259_v30 = vld [vmem:[#allocation8 + $0xe8] sm:$0xff]  }
0x1a83   : > { %4670 = vmatprep.subr.bf16.mxu1 %v5259_v30 }
0x1a84   : > { %4671 = vmatpush3.bf16.msra.mxu1 %v5260_v26 }
0x1a85   : > { %4672 = vmatprep.subr.bf16.mxu1 %v5261_v38 }
0x1a88   : > { %4673 = vmatpush3.bf16.msra.mxu1 %v5262_v61 }
0x1a89   : > { %4674 = vmatprep.subr.bf16.mxu1 %v5263_v39 }
0x1a8c   : > { %4675 = vmatpush3.bf16.msra.mxu1 %v5264_v29 }
0x1b54   : > { %v3732_v16 = vpop.f32.mrb[36].mxu0 }
0x1b55   : > { %v3733_v35 = vadd.f32 %v3732_v16, %v3611_v45  ;;  %v3734_v62 = vpop.f32.mrb[37].mxu0 }
0x1b56   : > { %v3735_v37 = vadd.f32 %v3734_v62, %v3615_v34  ;;  %v3736_v43 = vpop.f32.mrb[38].mxu0 }
0x1b57   : > { %v3741_v44 = vmul.f32 %v3733_v35, %v3733_v35  ;;  %v3737_v63 = vadd.f32 %v3736_v43, %v3611_v45  ;;  %v3738_v46 = vpop.f32.mrb[39].mxu0 }
0x1b58   : > { %v3742_v47 = vmul.f32 %v3735_v37, %v3735_v37  ;;  %v3739_v10 = vadd.f32 %v3738_v46, %v3615_v34 }
0x1b59   : > { %v3745_v48 = vmul.f32 %v3741_v44, %v3733_v35  ;;  %v3743_v49 = vmul.f32 %v3737_v63, %v3737_v63 }
0x1b5a   : > { %v3746_v50 = vmul.f32 %v3742_v47, %v3735_v37  ;;  %v3744_v51 = vmul.f32 %v3739_v10, %v3739_v10  ;;  %v5267_v47 = vld [vmem:[#allocation9 + $0x4] ss:$8 sps:$4 sm:$0xff]  }
0x1b5b   : > { %v3749_v14 = vmul.f32 0.044715, %v3745_v48  ;;  %v3747_v52 = vmul.f32 %v3743_v49, %v3737_v63  ;;  %4125 = vmatprep.subr.bf16.mxu0 %v5267_v47  ;;  %v5270_v48 = vld [vmem:[#allocation9 + $0x14] ss:$8 sps:$4 sm:$0xff]   ;;  %v5271_v49 = vld [vmem:[#allocation9 + $0x20] ss:$8 sps:$4 sm:$0xff]  }
0x1b5c   : > { %v3750_v53 = vmul.f32 0.044715, %v3746_v50  ;;  %v3748_v56 = vmul.f32 %v3744_v51, %v3739_v10  ;;  %v5276_v50 = vld [vmem:[#allocation9 + $0x34] ss:$8 sps:$4 sm:$0xff]   ;;  %v5274_v51 = vld [vmem:[#allocation9 + $0x30] ss:$8 sps:$4 sm:$0xff]  }
0x1b5d   : > { %v3753_v59 = vadd.f32 %v3749_v14, %v3733_v35  ;;  %v3751_v1 = vmul.f32 0.044715, %v3747_v52  ;;  %v5279_v14 = vld [vmem:[#allocation9 + $0x44] ss:$8 sps:$4 sm:$0xff]   ;;  %v5277_v52 = vld [vmem:[#allocation9 + $0x40] ss:$8 sps:$4 sm:$0xff]  }
0x1b5e   : > { %v3754_v17 = vadd.f32 %v3750_v53, %v3735_v37  ;;  %v3752_v2 = vmul.f32 0.044715, %v3748_v56  ;;  %v5282_v53 = vld [vmem:[#allocation9 + $0x54] ss:$8 sps:$4 sm:$0xff]   ;;  %v5280_v56 = vld [vmem:[#allocation9 + $0x50] ss:$8 sps:$4 sm:$0xff]  }
0x1b5f   : > { %v3757_v36 = vmul.f32 0.7978846, %v3753_v59  ;;  %v3755_v40 = vadd.f32 %v3751_v1, %v3737_v63  ;;  %v5285_v59 = vld [vmem:[#allocation9 + $0x64] ss:$8 sps:$4 sm:$0xff]   ;;  %v5283_v1 = vld [vmem:[#allocation9 + $0x60] ss:$8 sps:$4 sm:$0xff]  }
0x1b60   : > { %v3758_v41 = vmul.f32 0.7978846, %v3754_v17  ;;  %v3756_v42 = vadd.f32 %v3752_v2, %v3739_v10  ;;  %v5288_v17 = vld [vmem:[#allocation9 + $0x74] ss:$8 sps:$4 sm:$0xff]   ;;  %v5286_v2 = vld [vmem:[#allocation9 + $0x70] ss:$8 sps:$4 sm:$0xff]  }
0x1b61   : > { %5377 = vtanh.f32 %v3757_v36  ;;  %v3759_v0 = vmul.f32 0.7978846, %v3755_v40 }
0x1b62   : > { %5379 = vtanh.f32 %v3758_v41  ;;  %v3760_v3 = vmul.f32 0.7978846, %v3756_v42 }
0x1b63   : > { %5381 = vtanh.f32 %v3759_v0 }
0x1b64   : > { %5383 = vtanh.f32 %v3760_v3 }
0x1b6b   : > { %v5378_v11 = vpop.eup %5377 }
0x1b6c   : > { %v5380_v5 = vpop.eup %5379  ;;  %v3765_v6 = vadd.f32 1.0, %v5378_v11 }
0x1b6d   : > { %v5382_v7 = vpop.eup %5381  ;;  %v3766_v8 = vadd.f32 1.0, %v5380_v5  ;;  %v4517_v5 = vld [vmem:[%s6383_s14] ss:$0 sm:$0xff] }
0x1b6e   : > { %v5384_v9 = vpop.eup %5383  ;;  %v3769_v57 = vmul.f32 0.5, %v3765_v6  ;;  %v3767_v12 = vadd.f32 1.0, %v5382_v7 }
0x1b6f   : > { %v3768_v18 = vadd.f32 1.0, %v5384_v9  ;;  %v3770_v4 = vmul.f32 0.5, %v3766_v8  ;;  %v4518_v8 = vld [vmem:[%s6424_s22] ss:$0 sm:$0xff] }
0x1b70   : > { %v3771_v31 = vmul.f32 0.5, %v3767_v12  ;;  %v3773_v15 = vmul.f32 %v3769_v57, %v3733_v35  ;;  %v4000_v12 = vstv %s3999_s19 }
0x1b71   : > { %v3772_v19 = vmul.f32 0.5, %v3768_v18  ;;  %v3774_v27 = vmul.f32 %v3770_v4, %v3735_v37  ;;  %vm4001_vm8 = vcmp.eq.s32.totalorder %v5884_v54, %v4000_v12  ;;  %vm4002_vm9 = vcmp.eq.s32.totalorder %v5935_v24, %v4000_v12 }
0x1b72   : > { %v3775_v20 = vmul.f32 %v3771_v31, %v3737_v63 }
0x1b73   : > { %v3776_v13 = vmul.f32 %v3772_v19, %v3739_v10  ;;  %v5265_v10 = vld [vmem:[#allocation9] ss:$8 sps:$4 sm:$0xff]  }
0x1b74   : > { %v3812_v21 = vpack.c.bf16 %v3775_v20, %v3773_v15  ;;  %4126 = vmatpush1.bf16.msra.mxu0 %v5265_v10 }
0x1b75   : > { %v3813_v22 = vpack.c.bf16 %v3776_v13, %v3774_v27  ;;  %4127 = vmatprep.subr.bf16.mxu0 %v5270_v48 }
0x1b77   : > { %3948 = vmatprep.mubr.bf16.mxu1 %v3813_v22 }
0x1b78   : > { %3949 = vmatmul.mubr.bf16.vlgmr.msra.gmra.mrb[32].mxu1 %v3812_v21 }
0x1c4b   : > { %v4676_v23 = vpop.f32.mrb[32].mxu1 }
0x1c4c   : > { %v4677_v30 = vpop.f32.mrb[33].mxu1 }
0x1c4d   : > { %v4678_v26 = vadd.f32 %v4677_v30, %v4676_v23  ;;  %v4679_v38 = vpop.f32.mrb[34].mxu1 }
0x1c4e   : > { %v4680_v61 = vpop.f32.mrb[35].mxu1 }
0x1c4f   : > { %v3951_v39 = vadd.f32 %v4678_v26, %v4500_v60  ;;  %v4681_v29 = vadd.f32 %v4680_v61, %v4679_v38  ;;  %v4032_v26 = vld [vmem:[%s6425_s21] sm:$0x3] }
0x1c50   : > { %v4118_v54 = vrot.slane %v4032_v26, %v5887_v55  ;;  %v4122_v24 = vrot.slane %v4032_v26, %v5894_v58  ;;  %v4167_v55 = vcvt.s32.f32 %v5937_v25 }
0x1c51   : > { %v3954_v33 = vadd.f32 %v4681_v29, %v4500_v60  ;;  %v3957_v45 = vadd.f32 %v3951_v39, %v6317_v28  ;;  %v5268_v28 = vld [vmem:[#allocation9 + $0x10] ss:$8 sps:$4 sm:$0xff]  }
0x1c52   : > { %4128 = vmatpush1.bf16.msra.mxu0 %v5268_v28 }
0x1c53   : > { %3961 = vadd.xlane.f32.xlu0 %v3957_v45  ;;  %v3958_v34 = vadd.f32 %v3954_v33, %v6320_v32  ;;  %v5273_v32 = vld [vmem:[#allocation9 + $0x24] ss:$8 sps:$4 sm:$0xff]  }
0x1c54   : > { %4129 = vmatprep.subr.bf16.mxu0 %v5273_v32 }
0x1c55   : > { %3963 = vadd.xlane.f32.xlu1 %v3958_v34 }
0x1c56   : > { %4130 = vmatpush1.bf16.msra.mxu0 %v5271_v49 }
0x1c57   : > { %4131 = vmatprep.subr.bf16.mxu0 %v5276_v50 }
0x1c5a   : > { %4132 = vmatpush1.bf16.msra.mxu0 %v5274_v51 }
0x1c5b   : > { %4133 = vmatprep.subr.bf16.mxu0 %v5279_v14 }
0x1c5e   : > { %4134 = vmatpush1.bf16.msra.mxu0 %v5277_v52 }
0x1c5f   : > { %4135 = vmatprep.subr.bf16.mxu0 %v5282_v53 }
0x1c62   : > { %4136 = vmatpush1.bf16.msra.mxu0 %v5280_v56 }
0x1c63   : > { %4137 = vmatprep.subr.bf16.mxu0 %v5285_v59 }
0x1c66   : > { %4138 = vmatpush1.bf16.msra.mxu0 %v5283_v1 }
0x1c67   : > { %4139 = vmatprep.subr.bf16.mxu0 %v5288_v17 }
0x1c6a   : > { %4140 = vmatpush1.bf16.msra.mxu0 %v5286_v2 }
0x1ce0   : > { %v3962_v16 = vpop.xlane.xlu0 %3961 }
0x1ce1   : > { %v3965_v35 = vmul.f32 0.0078125, %v3962_v16 }
0x1ce2   : > { %v3964_v62 = vpop.xlane.xlu1 %3963 }
0x1ce3   : > { %v3967_v37 = vsub.f32 %v3957_v45, %v3965_v35  ;;  %v3966_v43 = vmul.f32 0.0078125, %v3964_v62  ;;  %v4166_v62 = vadd.s32 128, %v5937_v25 }
0x1ce5   : > { %v3968_v44 = vsub.f32 %v3958_v34, %v3966_v43  ;;  %v3969_v63 = vmul.f32 %v3967_v37, %v3967_v37 }
0x1ce7   : > { %3971 = vadd.xlane.f32.xlu0 %v3969_v63  ;;  %v3970_v46 = vmul.f32 %v3968_v44, %v3968_v44 }
0x1ce9   : > { %3973 = vadd.xlane.f32.xlu1 %v3970_v46 }
0x1d74   : > { %v3972_v36 = vpop.xlane.xlu0 %3971 }
0x1d75   : > { %v3975_v40 = vmul.f32 0.0078125, %v3972_v36 }
0x1d76   : > { %v3974_v41 = vpop.xlane.xlu1 %3973 }
0x1d77   : > { %v3977_v42 = vadd.f32 1e-05, %v3975_v40  ;;  %v3976_v0 = vmul.f32 0.0078125, %v3974_v41 }
0x1d79   : > { %5385 = vrsqrt.f32 %v3977_v42  ;;  %v3978_v3 = vadd.f32 1e-05, %v3976_v0 }
0x1d7b   : > { %5387 = vrsqrt.f32 %v3978_v3 }
0x1d83   : > { %v5386_v11 = vpop.eup %5385 }
0x1d84   : > { %v3981_v6 = vmul.f32 %v5386_v11, %v3967_v37  ;;  %v4168_v37 = vcvt.s32.f32 %v4166_v62 }
0x1d85   : > { %v5388_v7 = vpop.eup %5387 }
0x1d86   : > { %v3989_v9 = vmul.f32 %v4517_v5, %v3981_v6  ;;  %v3982_v57 = vmul.f32 %v5388_v7, %v3968_v44 }
0x1d88   : > { %v3997_v18 = vadd.f32 %v4518_v8, %v3989_v9  ;;  %v3990_v4 = vmul.f32 %v4517_v5, %v3982_v57 }
0x1d8a   : > { %v3998_v31 = vadd.f32 %v4518_v8, %v3990_v4  ;;  %v4007_v19 = vsel %vm4001_vm8, %v3997_v18, 0.0 }
0x1d8c   : > { %v4008_v15 = vsel %vm4002_vm9, %v3998_v31, 0.0 }
0x1d8d   : > { %v4009_v20 = vadd.f32 %v4008_v15, %v4007_v19 }
0x1d8f   : > { %v4010_v27 = vrot.slane %v4009_v20, 4 }
0x1d91   : > { %v4011_v13 = vadd.f32 %v4010_v27, %v4009_v20 }
0x1d93   : > { %v4012_v21 = vrot.slane %v4011_v13, 2 }
0x1d95   : > { %v4013_v22 = vadd.f32 %v4012_v21, %v4011_v13 }
0x1d97   : > { %v4014_v23 = vrot.slane %v4013_v22, 1 }
0x1d99   : > { %v4015_v60 = vadd.f32 %v4014_v23, %v4013_v22 }
0x1d9b   : > { %v4033_v30 = vpack.c.bf16 %v4015_v60, %v4015_v60 }
0x1d9d   : > { %4158 = vmatmul.mubr.bf16.vlgmr.msra.gmra.mrb[40].mxu0 %v4033_v30 }
0x1e70   : > { %v4159_v38 = vpop.f32.mrb[40].mxu0 }
0x1e71   : > { %v4160_v61 = vadd.f32 %v4159_v38, %v4118_v54  ;;  %v4161_v39 = vpop.f32.mrb[41].mxu0 }
0x1e72   : > { %v4162_v29 = vadd.f32 %v4161_v39, %v4122_v24  ;;  %v4163_v33 = vpop.f32.mrb[42].mxu0 }
0x1e73   : > { %v4164_v45 = vpop.f32.mrb[43].mxu0  ;;  %v4170_v34 = vsel %vm4169_vm10, %v4160_v61, -inf }
0x1e74   : > { %v4171_v16 = vsel %vm4169_vm10, %v4162_v29, -inf }
0x1e75   : > { %v4172_v35 = vmax.f32 %v4170_v34, %v4171_v16 }
0x1e77   : > { %4173 = vmax.xlane.f32.xlu0 %v4172_v35 }
0x1f04   : > { %v4174_v58 = vpop.xlane.xlu0 %4173 }
0x1f05   : > { %vm4175_vm11 = vcmp.eq.f32.partialorder %v4160_v61, %v4174_v58  ;;  %vm4176_vm12 = vcmp.eq.f32.partialorder %v4162_v29, %v4174_v58 }
0x1f06   : > { %v4177_v43 = vsel %vm4175_vm11, %v4167_v55, 256.0  ;;  %v4178_v44 = vsel %vm4176_vm12, %v4168_v37, 256.0 }
0x1f07   : > { %v4179_v63 = vsel %vm4169_vm10, %v4177_v43, inf  ;;  %v4180_v46 = vsel %vm4169_vm10, %v4178_v44, inf }
0x1f08   : > { %v4181_v47 = vmin.f32 %v4179_v63, %v4180_v46 }
0x1f0a   : > { %4182 = vmin.xlane.f32.xlu1 %v4181_v47 }
0x1f97   : > { %v4183_v10 = vpop.xlane.xlu1 %4182 }
0x1f98   : > { %v4954_v48 = vtrunc.f32 %v4183_v10 }
0x1f9a   : > { %v4955_v28 = vcvt.f32.s32 %v4954_v48 }
0x1f9c   : > { %4185 = vst [vmem:[%s605_s17] sm:$0x1] %v4955_v28 }
0x1f9d PF: > { %s6427_s10 = sld [smem:[#allocation14_spill]] }
0x1fa3   : > { %s32_s30 = sadd.s32 1, %s6427_s10  }
0x1fa4   : > { %p29_p1 = scmp.ge.s32.totalorder %s32_s30, 4  }
0x1fa6   :  { %31 = sbr.rel (!%p29_p1) target bundleno = 12 (0xc), region = 147 }
0x1fad   :  { %4203 = vsyncpa [#allocation5], 1 }
0x1fae   :  { %4205 = vsyncpa [#allocation5 + $0x1], 1 }
0x1faf   :  { %4206 = vsyncpa [#allocation7], 1 }
0x1fb0   :  { %4207 = vsyncpa [#allocation10], 1 }

</bundles_post_ra>
